<compile_context>
chip_gen: v5e
topology: v5e:2x2
jax: 0.10.0
libtpu: 0.0.40
codegen_flags: <defaults>
</compile_context>

<pallas_src>
import functools

import numpy as np
import jax
import jax.numpy as jnp
from jax import lax
from jax.experimental import pallas as pl
from jax.experimental.pallas import tpu as pltpu


_VMEM_LIMIT_BYTES = 48 * 1024 * 1024   # fits under 64 MiB/TC on v7x, 128 MiB on v5e/v6e


def _round_up(x, m):
    return (x + m - 1) // m * m


# ------------------------------ Pallas kernels ------------------------------ #

def _accumulate_conv_taps(xr_ref, w_ref, acc_ref, *, Ho, Wo, Cin):
    """3x3 / stride-2 / pad-1 conv as 9 K=Cin matmuls into an f32 accumulator.

    xr_ref : (Ho+1, 2, Wo+1, 2*Cin)  padded activation, H/W regrouped by parity
    w_ref  : (9, Cin, Cout)          taps-major weights (bf16), VMEM-resident
    acc_ref: (Ho*Wo, Cout)           f32 VMEM scratch
    """
    M = Ho * Wo
    for t in range(9):
        kh, kw = t // 3, t % 3
        # padded row  2*oh + kh -> (h' = oh + kh//2, parity q = kh % 2)
        # padded col  2*ow + kw -> (w' = ow + kw//2, channel half = kw % 2)
        h0, q = kh // 2, kh % 2
        w0, c0 = kw // 2, (kw % 2) * Cin
        lhs = xr_ref[pl.ds(h0, Ho), pl.ds(q, 1), pl.ds(w0, Wo), pl.ds(c0, Cin)]
        lhs = lhs.reshape(M, Cin)                       # Wo % 8 == 0 -> cheap collapse
        part = jnp.dot(lhs, w_ref[t], preferred_element_type=jnp.float32)
        if t == 0:
            acc_ref[...] = part
        else:
            acc_ref[...] += part


def _conv_lrelu_kernel(xr_ref, w_ref, b_ref, o_ref, acc_ref, *,
                       Ho, Wo, Cin, neg_slope):
    _accumulate_conv_taps(xr_ref, w_ref, acc_ref, Ho=Ho, Wo=Wo, Cin=Cin)
    y = acc_ref[...] + b_ref[...]                       # f32 epilogue
    y = jnp.where(y >= 0.0, y, neg_slope * y)           # LeakyReLU (slope 0.01)
    o_ref[...] = y.astype(o_ref.dtype)                  # single lane-dense store


def _conv_lrelu_linear_kernel(xr_ref, w_ref, b_ref, wl_ref, bl_ref, o_ref,
                              acc_ref, *, Ho, Wo, Cin, neg_slope):
    """Final 2x2 -> 1x1 conv + LeakyReLU fused with the EqualLinear head."""
    _accumulate_conv_taps(xr_ref, w_ref, acc_ref, Ho=Ho, Wo=Wo, Cin=Cin)
    y = acc_ref[...] + b_ref[...]
    y = jnp.where(y >= 0.0, y, neg_slope * y)
    # Only row 0 (oh == ow == 0) is a real output position of the 1x1 result.
    z = jnp.dot(y[0:1, :].astype(jnp.bfloat16), wl_ref[...],
                preferred_element_type=jnp.float32) + bl_ref[...]
    o_ref[...] = z


# ------------------------------- JAX wrappers -------------------------------- #

def _pad_and_regroup(x_nhwc, wo_pad):
    """Zero-pad (1 top/left, >=1 bottom/right) and regroup H/W by parity.

    (B, H, W, C) -> (B, H//2 + 1, 2, wo_pad + 1, 2*C).  The reshape is a free
    regrouping of contiguous memory; only the pad is an HBM copy (~1.1x the
    activation, vs ~9x for a materialized im2col).
    """
    B, H, W, C = x_nhwc.shape
    ho = H // 2
    xp = jnp.pad(x_nhwc, ((0, 0), (1, 1), (1, 2 * wo_pad + 1 - W), (0, 0)))
    return xp.reshape(B, ho + 1, 2, wo_pad + 1, 2 * C)


def conv3x3s2_lrelu(x_nhwc, w_taps, bias, *, neg_slope=0.01):
    """One fused Conv2d(3x3, stride 2, pad 1) + LeakyReLU layer (NHWC, bf16)."""
    B, H, W, C = x_nhwc.shape
    assert H % 2 == 0 and W % 2 == 0, "even spatial dims expected"
    Ho, Wo = H // 2, W // 2
    Cout = w_taps.shape[2]
    Wo_pad = _round_up(Wo, 8)                 # junk columns read zeros, sliced off below
    Hp2, Wp2 = Ho + 1, Wo_pad + 1
    M = Ho * Wo_pad

    xr = _pad_and_regroup(x_nhwc.astype(jnp.bfloat16), Wo_pad)
    kernel = functools.partial(_conv_lrelu_kernel, Ho=Ho, Wo=Wo_pad, Cin=C,
                               neg_slope=neg_slope)
    out = pl.pallas_call(
        kernel,
        out_shape=jax.ShapeDtypeStruct((B, M, Cout), jnp.bfloat16),
        grid_spec=pltpu.PrefetchScalarGridSpec(
            num_scalar_prefetch=0,
            grid=(B,),
            in_specs=[
                pl.BlockSpec((None, Hp2, 2, Wp2, 2 * C),
                             lambda b: (b, 0, 0, 0, 0)),
                pl.BlockSpec((9, C, Cout), lambda b: (0, 0, 0)),    # resident
                pl.BlockSpec((1, Cout), lambda b: (0, 0)),          # resident
            ],
            out_specs=pl.BlockSpec((None, M, Cout), lambda b: (b, 0, 0)),
            scratch_shapes=[pltpu.VMEM((M, Cout), jnp.float32)],
        ),
        compiler_params=pltpu.CompilerParams(
            dimension_semantics=("parallel",),
            vmem_limit_bytes=_VMEM_LIMIT_BYTES,
        ),
        cost_estimate=pl.CostEstimate(
            flops=2 * B * M * 9 * C * Cout,
            bytes_accessed=(xr.size * 2 + w_taps.size * 2 + bias.size * 4
                            + B * M * Cout * 2),
            transcendentals=0,
        ),
    )(xr, w_taps, bias)

    out = out.reshape(B, Ho, Wo_pad, Cout)
    if Wo_pad != Wo:
        out = out[:, :, :Wo, :]
    return out


def conv3x3s2_lrelu_equallinear(x_nhwc, w_taps, bias, w_lin, b_lin, *,
                                neg_slope=0.01):
    """Final conv layer (2x2 -> 1x1) fused with EqualLinear; returns (B, out_c) f32."""
    B, H, W, C = x_nhwc.shape
    assert H == 2 and W == 2, "final GradualStyleBlock conv must reduce 2x2 -> 1x1"
    Ho, Wo_pad = 1, 8
    Hp2, Wp2 = Ho + 1, Wo_pad + 1
    M = Ho * Wo_pad
    Cout = w_taps.shape[2]
    out_c = w_lin.shape[1]

    xr = _pad_and_regroup(x_nhwc.astype(jnp.bfloat16), Wo_pad)
    kernel = functools.partial(_conv_lrelu_linear_kernel, Ho=Ho, Wo=Wo_pad,
                               Cin=C, neg_slope=neg_slope)
    out = pl.pallas_call(
        kernel,
        out_shape=jax.ShapeDtypeStruct((B, 1, out_c), jnp.float32),
        grid_spec=pltpu.PrefetchScalarGridSpec(
            num_scalar_prefetch=0,
            grid=(B,),
            in_specs=[
                pl.BlockSpec((None, Hp2, 2, Wp2, 2 * C),
                             lambda b: (b, 0, 0, 0, 0)),
                pl.BlockSpec((9, C, Cout), lambda b: (0, 0, 0)),
                pl.BlockSpec((1, Cout), lambda b: (0, 0)),
                pl.BlockSpec((Cout, out_c), lambda b: (0, 0)),
                pl.BlockSpec((1, out_c), lambda b: (0, 0)),
            ],
            out_specs=pl.BlockSpec((None, 1, out_c), lambda b: (b, 0, 0)),
            scratch_shapes=[pltpu.VMEM((M, Cout), jnp.float32)],
        ),
        compiler_params=pltpu.CompilerParams(
            dimension_semantics=("parallel",),
            vmem_limit_bytes=_VMEM_LIMIT_BYTES,
        ),
        cost_estimate=pl.CostEstimate(
            flops=2 * B * M * 9 * C * Cout + 2 * B * Cout * out_c,
            bytes_accessed=(xr.size * 2 + w_taps.size * 2 + bias.size * 4
                            + w_lin.size * 2 + b_lin.size * 4 + B * out_c * 4),
            transcendentals=0,
        ),
    )(xr, w_taps, bias, w_lin, b_lin)
    return out.reshape(B, out_c)


def prepack_params(params):
    """One-time repack: taps-major (9, Cin, Cout) bf16 weights, (1, N) f32 biases."""
    convs = []
    for w, b in params["convs"]:                       # w: (Cout, Cin, 3, 3)
        cout, cin = w.shape[0], w.shape[1]
        w_taps = jnp.transpose(w, (2, 3, 1, 0)).reshape(9, cin, cout)
        convs.append((w_taps.astype(jnp.bfloat16),
                      b.reshape(1, -1).astype(jnp.float32)))
    w_lin, b_lin, scale, lr_mul = params["linear"]
    wl = (w_lin * scale).T.astype(jnp.bfloat16)        # (in=out_c, out=out_c)
    bl = (b_lin * lr_mul).reshape(1, -1).astype(jnp.float32)
    return {"convs": tuple(convs), "linear": (wl, bl)}


@functools.partial(jax.jit, static_argnums=(2, 3))
def gradual_style_block_forward(x_nchw, packed, out_c, spatial):
    """Matches GradualStyleBlock.forward semantics: NCHW in, (B, out_c) out."""
    num_pools = int(np.log2(spatial))
    assert spatial == 2 ** num_pools, "power-of-two spatial size expected"
    x = jnp.transpose(x_nchw, (0, 2, 3, 1)).astype(jnp.bfloat16)   # NCHW -> NHWC
    for li in range(num_pools - 1):
        w_taps, bias = packed["convs"][li]
        x = conv3x3s2_lrelu(x, w_taps, bias)
    w_taps, bias = packed["convs"][num_pools - 1]
    w_lin, b_lin = packed["linear"]
    return conv3x3s2_lrelu_equallinear(x, w_taps, bias, w_lin, b_lin)


# --------------------------- reference (pure JAX) ---------------------------- #

def reference_forward(x_nchw, params, out_c, spatial):
    """Pure-JAX reference mirroring the kernels' mixed precision
    (bf16 operands, f32 accumulation / epilogue)."""
    num_pools = int(np.log2(spatial))
    x = x_nchw.astype(jnp.bfloat16)
    for li in range(num_pools):
        w, b = params["convs"][li]
        y = lax.conv_general_dilated(
            x, w.astype(jnp.bfloat16), window_strides=(2, 2),
            padding=((1, 1), (1, 1)),
            dimension_numbers=("NCHW", "OIHW", "NCHW"),
            preferred_element_type=jnp.float32)
        y = y + b.reshape(1, -1, 1, 1)
        y = jnp.where(y >= 0.0, y, 0.01 * y)
        x = y.astype(jnp.bfloat16)
    x = x.reshape(-1, out_c)
    w_lin, b_lin, scale, lr_mul = params["linear"]
    y = jnp.dot(x, ((w_lin * scale).T).astype(jnp.bfloat16),
                preferred_element_type=jnp.float32)
    return y + (b_lin * lr_mul)[None, :]


# ------------------------- deterministic params ------------------------------ #

def init_params(key, in_c, out_c, spatial):
    num_pools = int(np.log2(spatial))
    convs = []
    cin = in_c
    for _ in range(num_pools):
        key, kw, kb = jax.random.split(key, 3)
        w = jax.random.normal(kw, (out_c, cin, 3, 3), jnp.float32) * 0.1
        b = jax.random.normal(kb, (out_c,), jnp.float32) * 0.01
        convs.append((w, b))
        cin = out_c
    key, kl = jax.random.split(key)
    lr_mul = 1.0
    w_lin = jax.random.normal(kl, (out_c, out_c), jnp.float32) / lr_mul
    b_lin = jnp.zeros((out_c,), jnp.float32)
    scale = (1.0 / np.sqrt(out_c)) * lr_mul
    return {"convs": convs, "linear": (w_lin, b_lin, scale, lr_mul)}


# ----------------------------------- main ------------------------------------ #

if __name__ == "__main__":
    B, in_c, out_c, spatial = 2, 4, 32, 16
    key = jax.random.PRNGKey(0)
    key, kx = jax.random.split(key)
    x = jax.random.normal(kx, (B, in_c, spatial, spatial), jnp.float32)

    params = init_params(key, in_c, out_c, spatial)
    packed = prepack_params(params)                    # one-time weight prepack

    out = gradual_style_block_forward(x, packed, out_c, spatial)
    out = jax.block_until_ready(out)

    ref = jax.block_until_ready(reference_forward(x, params, out_c, spatial))
    assert out.shape == (B, out_c), out.shape
    np.testing.assert_allclose(np.asarray(out, dtype=np.float32),
                               np.asarray(ref, dtype=np.float32),
                               rtol=1e-2, atol=1e-2)
    print("KERNEL_OK")
</pallas_src>

<mosaic_0001>
module attributes {stable_mosaic.version = 11 : i64} {
  func.func @_conv_lrelu_kernel(%arg0: i32, %arg1: memref<1x9x2x9x8xbf16, #tpu.memory_space<vmem>>, %arg2: memref<9x4x32xbf16, #tpu.memory_space<vmem>>, %arg3: memref<1x32xf32, #tpu.memory_space<vmem>>, %arg4: memref<1x64x32xbf16, #tpu.memory_space<vmem>>, %arg5: memref<64x32xf32, #tpu.memory_space<vmem>>) attributes {dimension_semantics = [#tpu.dimension_semantics<parallel>], iteration_bounds = array<i64: 2>, scalar_prefetch = 0 : i64, scratch_operands = 1 : i64, tpu.core_type = #tpu.core_type<tc>, window_params = [{transform_indices = @transform_0, window_bounds = array<i64: 1, 9, 2, 9, 8>}, {pipeline_mode = #tpu.pipeline_mode<synchronous>, transform_indices = @transform_1, window_bounds = array<i64: 9, 4, 32>}, {pipeline_mode = #tpu.pipeline_mode<synchronous>, transform_indices = @transform_2, window_bounds = array<i64: 1, 32>}, {transform_indices = @transform_3, window_bounds = array<i64: 1, 64, 32>}]} {
    %c0 = arith.constant 0 : index
    %c0_0 = arith.constant 0 : index
    %c0_1 = arith.constant 0 : index
    %c0_2 = arith.constant 0 : index
    %c0_3 = arith.constant 0 : index
    %0 = vector.load %arg1[%c0, %c0_0, %c0_1, %c0_2, %c0_3] : memref<1x9x2x9x8xbf16, #tpu.memory_space<vmem>>, vector<1x8x1x8x4xbf16>
    %1 = vector.shape_cast %0 : vector<1x8x1x8x4xbf16> to vector<8x1x8x4xbf16>
    %2 = vector.shape_cast %1 : vector<8x1x8x4xbf16> to vector<64x4xbf16>
    %c0_4 = arith.constant 0 : index
    %c0_5 = arith.constant 0 : index
    %c0_6 = arith.constant 0 : index
    %3 = vector.load %arg2[%c0_4, %c0_5, %c0_6] : memref<9x4x32xbf16, #tpu.memory_space<vmem>>, vector<1x4x32xbf16>
    %4 = vector.shape_cast %3 : vector<1x4x32xbf16> to vector<4x32xbf16>
    %cst = arith.constant dense<0.000000e+00> : vector<64x32xf32>
    %5 = tpu.matmul %2, %4, %cst {dimension_numbers = #tpu.dot_dimension_numbers<[1], [0], [0], [1], [0, 0, 1, 1], [], []>} : vector<64x4xbf16>, vector<4x32xbf16>, vector<64x32xf32> -> vector<64x32xf32>
    %c0_7 = arith.constant 0 : index
    %c0_8 = arith.constant 0 : index
    %6 = vector.load %arg5[%c0_7, %c0_8] : memref<64x32xf32, #tpu.memory_space<vmem>>, vector<64x32xf32>
    tpu.vector_store %arg5[%c0_7, %c0_8], %5 {strides = array<i32>} : memref<64x32xf32, #tpu.memory_space<vmem>>, vector<64x32xf32>,
    %c0_9 = arith.constant 0 : index
    %c0_10 = arith.constant 0 : index
    %c0_11 = arith.constant 0 : index
    %c0_12 = arith.constant 0 : index
    %c4 = arith.constant 4 : index
    %7 = vector.load %arg1[%c0_9, %c0_10, %c0_11, %c0_12, %c4] : memref<1x9x2x9x8xbf16, #tpu.memory_space<vmem>>, vector<1x8x1x8x4xbf16>
    %8 = vector.shape_cast %7 : vector<1x8x1x8x4xbf16> to vector<8x1x8x4xbf16>
    %9 = vector.shape_cast %8 : vector<8x1x8x4xbf16> to vector<64x4xbf16>
    %c1 = arith.constant 1 : index
    %c0_13 = arith.constant 0 : index
    %c0_14 = arith.constant 0 : index
    %10 = vector.load %arg2[%c1, %c0_13, %c0_14] : memref<9x4x32xbf16, #tpu.memory_space<vmem>>, vector<1x4x32xbf16>
    %11 = vector.shape_cast %10 : vector<1x4x32xbf16> to vector<4x32xbf16>
    %cst_15 = arith.constant dense<0.000000e+00> : vector<64x32xf32>
    %12 = tpu.matmul %9, %11, %cst_15 {dimension_numbers = #tpu.dot_dimension_numbers<[1], [0], [0], [1], [0, 0, 1, 1], [], []>} : vector<64x4xbf16>, vector<4x32xbf16>, vector<64x32xf32> -> vector<64x32xf32>
    %c0_16 = arith.constant 0 : index
    %c0_17 = arith.constant 0 : index
    %13 = vector.load %arg5[%c0_16, %c0_17] : memref<64x32xf32, #tpu.memory_space<vmem>>, vector<64x32xf32>
    %14 = arith.addf %13, %12 : vector<64x32xf32>
    %c0_18 = arith.constant 0 : index
    %c0_19 = arith.constant 0 : index
    %15 = vector.load %arg5[%c0_18, %c0_19] : memref<64x32xf32, #tpu.memory_space<vmem>>, vector<64x32xf32>
    tpu.vector_store %arg5[%c0_18, %c0_19], %14 {strides = array<i32>} : memref<64x32xf32, #tpu.memory_space<vmem>>, vector<64x32xf32>,
    %c0_20 = arith.constant 0 : index
    %c0_21 = arith.constant 0 : index
    %c0_22 = arith.constant 0 : index
    %c1_23 = arith.constant 1 : index
    %c0_24 = arith.constant 0 : index
    %16 = vector.load %arg1[%c0_20, %c0_21, %c0_22, %c1_23, %c0_24] : memref<1x9x2x9x8xbf16, #tpu.memory_space<vmem>>, vector<1x8x1x8x4xbf16>
    %17 = vector.shape_cast %16 : vector<1x8x1x8x4xbf16> to vector<8x1x8x4xbf16>
    %18 = vector.shape_cast %17 : vector<8x1x8x4xbf16> to vector<64x4xbf16>
    %c2 = arith.constant 2 : index
    %c0_25 = arith.constant 0 : index
    %c0_26 = arith.constant 0 : index
    %19 = vector.load %arg2[%c2, %c0_25, %c0_26] : memref<9x4x32xbf16, #tpu.memory_space<vmem>>, vector<1x4x32xbf16>
    %20 = vector.shape_cast %19 : vector<1x4x32xbf16> to vector<4x32xbf16>
    %cst_27 = arith.constant dense<0.000000e+00> : vector<64x32xf32>
    %21 = tpu.matmul %18, %20, %cst_27 {dimension_numbers = #tpu.dot_dimension_numbers<[1], [0], [0], [1], [0, 0, 1, 1], [], []>} : vector<64x4xbf16>, vector<4x32xbf16>, vector<64x32xf32> -> vector<64x32xf32>
    %c0_28 = arith.constant 0 : index
    %c0_29 = arith.constant 0 : index
    %22 = vector.load %arg5[%c0_28, %c0_29] : memref<64x32xf32, #tpu.memory_space<vmem>>, vector<64x32xf32>
    %23 = arith.addf %22, %21 : vector<64x32xf32>
    %c0_30 = arith.constant 0 : index
    %c0_31 = arith.constant 0 : index
    %24 = vector.load %arg5[%c0_30, %c0_31] : memref<64x32xf32, #tpu.memory_space<vmem>>, vector<64x32xf32>
    tpu.vector_store %arg5[%c0_30, %c0_31], %23 {strides = array<i32>} : memref<64x32xf32, #tpu.memory_space<vmem>>, vector<64x32xf32>,
    %c0_32 = arith.constant 0 : index
    %c0_33 = arith.constant 0 : index
    %c1_34 = arith.constant 1 : index
    %c0_35 = arith.constant 0 : index
    %c0_36 = arith.constant 0 : index
    %25 = vector.load %arg1[%c0_32, %c0_33, %c1_34, %c0_35, %c0_36] : memref<1x9x2x9x8xbf16, #tpu.memory_space<vmem>>, vector<1x8x1x8x4xbf16>
    %26 = vector.shape_cast %25 : vector<1x8x1x8x4xbf16> to vector<8x1x8x4xbf16>
    %27 = vector.shape_cast %26 : vector<8x1x8x4xbf16> to vector<64x4xbf16>
    %c3 = arith.constant 3 : index
    %c0_37 = arith.constant 0 : index
    %c0_38 = arith.constant 0 : index
    %28 = vector.load %arg2[%c3, %c0_37, %c0_38] : memref<9x4x32xbf16, #tpu.memory_space<vmem>>, vector<1x4x32xbf16>
    %29 = vector.shape_cast %28 : vector<1x4x32xbf16> to vector<4x32xbf16>
    %cst_39 = arith.constant dense<0.000000e+00> : vector<64x32xf32>
    %30 = tpu.matmul %27, %29, %cst_39 {dimension_numbers = #tpu.dot_dimension_numbers<[1], [0], [0], [1], [0, 0, 1, 1], [], []>} : vector<64x4xbf16>, vector<4x32xbf16>, vector<64x32xf32> -> vector<64x32xf32>
    %c0_40 = arith.constant 0 : index
    %c0_41 = arith.constant 0 : index
    %31 = vector.load %arg5[%c0_40, %c0_41] : memref<64x32xf32, #tpu.memory_space<vmem>>, vector<64x32xf32>
    %32 = arith.addf %31, %30 : vector<64x32xf32>
    %c0_42 = arith.constant 0 : index
    %c0_43 = arith.constant 0 : index
    %33 = vector.load %arg5[%c0_42, %c0_43] : memref<64x32xf32, #tpu.memory_space<vmem>>, vector<64x32xf32>
    tpu.vector_store %arg5[%c0_42, %c0_43], %32 {strides = array<i32>} : memref<64x32xf32, #tpu.memory_space<vmem>>, vector<64x32xf32>,
    %c0_44 = arith.constant 0 : index
    %c0_45 = arith.constant 0 : index
    %c1_46 = arith.constant 1 : index
    %c0_47 = arith.constant 0 : index
    %c4_48 = arith.constant 4 : index
    %34 = vector.load %arg1[%c0_44, %c0_45, %c1_46, %c0_47, %c4_48] : memref<1x9x2x9x8xbf16, #tpu.memory_space<vmem>>, vector<1x8x1x8x4xbf16>
    %35 = vector.shape_cast %34 : vector<1x8x1x8x4xbf16> to vector<8x1x8x4xbf16>
    %36 = vector.shape_cast %35 : vector<8x1x8x4xbf16> to vector<64x4xbf16>
    %c4_49 = arith.constant 4 : index
    %c0_50 = arith.constant 0 : index
    %c0_51 = arith.constant 0 : index
    %37 = vector.load %arg2[%c4_49, %c0_50, %c0_51] : memref<9x4x32xbf16, #tpu.memory_space<vmem>>, vector<1x4x32xbf16>
    %38 = vector.shape_cast %37 : vector<1x4x32xbf16> to vector<4x32xbf16>
    %cst_52 = arith.constant dense<0.000000e+00> : vector<64x32xf32>
    %39 = tpu.matmul %36, %38, %cst_52 {dimension_numbers = #tpu.dot_dimension_numbers<[1], [0], [0], [1], [0, 0, 1, 1], [], []>} : vector<64x4xbf16>, vector<4x32xbf16>, vector<64x32xf32> -> vector<64x32xf32>
    %c0_53 = arith.constant 0 : index
    %c0_54 = arith.constant 0 : index
    %40 = vector.load %arg5[%c0_53, %c0_54] : memref<64x32xf32, #tpu.memory_space<vmem>>, vector<64x32xf32>
    %41 = arith.addf %40, %39 : vector<64x32xf32>
    %c0_55 = arith.constant 0 : index
    %c0_56 = arith.constant 0 : index
    %42 = vector.load %arg5[%c0_55, %c0_56] : memref<64x32xf32, #tpu.memory_space<vmem>>, vector<64x32xf32>
    tpu.vector_store %arg5[%c0_55, %c0_56], %41 {strides = array<i32>} : memref<64x32xf32, #tpu.memory_space<vmem>>, vector<64x32xf32>,
    %c0_57 = arith.constant 0 : index
    %c0_58 = arith.constant 0 : index
    %c1_59 = arith.constant 1 : index
    %c1_60 = arith.constant 1 : index
    %c0_61 = arith.constant 0 : index
    %43 = vector.load %arg1[%c0_57, %c0_58, %c1_59, %c1_60, %c0_61] : memref<1x9x2x9x8xbf16, #tpu.memory_space<vmem>>, vector<1x8x1x8x4xbf16>
    %44 = vector.shape_cast %43 : vector<1x8x1x8x4xbf16> to vector<8x1x8x4xbf16>
    %45 = vector.shape_cast %44 : vector<8x1x8x4xbf16> to vector<64x4xbf16>
    %c5 = arith.constant 5 : index
    %c0_62 = arith.constant 0 : index
    %c0_63 = arith.constant 0 : index
    %46 = vector.load %arg2[%c5, %c0_62, %c0_63] : memref<9x4x32xbf16, #tpu.memory_space<vmem>>, vector<1x4x32xbf16>
    %47 = vector.shape_cast %46 : vector<1x4x32xbf16> to vector<4x32xbf16>
    %cst_64 = arith.constant dense<0.000000e+00> : vector<64x32xf32>
    %48 = tpu.matmul %45, %47, %cst_64 {dimension_numbers = #tpu.dot_dimension_numbers<[1], [0], [0], [1], [0, 0, 1, 1], [], []>} : vector<64x4xbf16>, vector<4x32xbf16>, vector<64x32xf32> -> vector<64x32xf32>
    %c0_65 = arith.constant 0 : index
    %c0_66 = arith.constant 0 : index
    %49 = vector.load %arg5[%c0_65, %c0_66] : memref<64x32xf32, #tpu.memory_space<vmem>>, vector<64x32xf32>
    %50 = arith.addf %49, %48 : vector<64x32xf32>
    %c0_67 = arith.constant 0 : index
    %c0_68 = arith.constant 0 : index
    %51 = vector.load %arg5[%c0_67, %c0_68] : memref<64x32xf32, #tpu.memory_space<vmem>>, vector<64x32xf32>
    tpu.vector_store %arg5[%c0_67, %c0_68], %50 {strides = array<i32>} : memref<64x32xf32, #tpu.memory_space<vmem>>, vector<64x32xf32>,
    %c0_69 = arith.constant 0 : index
    %c1_70 = arith.constant 1 : index
    %c0_71 = arith.constant 0 : index
    %c0_72 = arith.constant 0 : index
    %c0_73 = arith.constant 0 : index
    %52 = vector.load %arg1[%c0_69, %c1_70, %c0_71, %c0_72, %c0_73] : memref<1x9x2x9x8xbf16, #tpu.memory_space<vmem>>, vector<1x8x1x8x4xbf16>
    %53 = vector.shape_cast %52 : vector<1x8x1x8x4xbf16> to vector<8x1x8x4xbf16>
    %54 = vector.shape_cast %53 : vector<8x1x8x4xbf16> to vector<64x4xbf16>
    %c6 = arith.constant 6 : index
    %c0_74 = arith.constant 0 : index
    %c0_75 = arith.constant 0 : index
    %55 = vector.load %arg2[%c6, %c0_74, %c0_75] : memref<9x4x32xbf16, #tpu.memory_space<vmem>>, vector<1x4x32xbf16>
    %56 = vector.shape_cast %55 : vector<1x4x32xbf16> to vector<4x32xbf16>
    %cst_76 = arith.constant dense<0.000000e+00> : vector<64x32xf32>
    %57 = tpu.matmul %54, %56, %cst_76 {dimension_numbers = #tpu.dot_dimension_numbers<[1], [0], [0], [1], [0, 0, 1, 1], [], []>} : vector<64x4xbf16>, vector<4x32xbf16>, vector<64x32xf32> -> vector<64x32xf32>
    %c0_77 = arith.constant 0 : index
    %c0_78 = arith.constant 0 : index
    %58 = vector.load %arg5[%c0_77, %c0_78] : memref<64x32xf32, #tpu.memory_space<vmem>>, vector<64x32xf32>
    %59 = arith.addf %58, %57 : vector<64x32xf32>
    %c0_79 = arith.constant 0 : index
    %c0_80 = arith.constant 0 : index
    %60 = vector.load %arg5[%c0_79, %c0_80] : memref<64x32xf32, #tpu.memory_space<vmem>>, vector<64x32xf32>
    tpu.vector_store %arg5[%c0_79, %c0_80], %59 {strides = array<i32>} : memref<64x32xf32, #tpu.memory_space<vmem>>, vector<64x32xf32>,
    %c0_81 = arith.constant 0 : index
    %c1_82 = arith.constant 1 : index
    %c0_83 = arith.constant 0 : index
    %c0_84 = arith.constant 0 : index
    %c4_85 = arith.constant 4 : index
    %61 = vector.load %arg1[%c0_81, %c1_82, %c0_83, %c0_84, %c4_85] : memref<1x9x2x9x8xbf16, #tpu.memory_space<vmem>>, vector<1x8x1x8x4xbf16>
    %62 = vector.shape_cast %61 : vector<1x8x1x8x4xbf16> to vector<8x1x8x4xbf16>
    %63 = vector.shape_cast %62 : vector<8x1x8x4xbf16> to vector<64x4xbf16>
    %c7 = arith.constant 7 : index
    %c0_86 = arith.constant 0 : index
    %c0_87 = arith.constant 0 : index
    %64 = vector.load %arg2[%c7, %c0_86, %c0_87] : memref<9x4x32xbf16, #tpu.memory_space<vmem>>, vector<1x4x32xbf16>
    %65 = vector.shape_cast %64 : vector<1x4x32xbf16> to vector<4x32xbf16>
    %cst_88 = arith.constant dense<0.000000e+00> : vector<64x32xf32>
    %66 = tpu.matmul %63, %65, %cst_88 {dimension_numbers = #tpu.dot_dimension_numbers<[1], [0], [0], [1], [0, 0, 1, 1], [], []>} : vector<64x4xbf16>, vector<4x32xbf16>, vector<64x32xf32> -> vector<64x32xf32>
    %c0_89 = arith.constant 0 : index
    %c0_90 = arith.constant 0 : index
    %67 = vector.load %arg5[%c0_89, %c0_90] : memref<64x32xf32, #tpu.memory_space<vmem>>, vector<64x32xf32>
    %68 = arith.addf %67, %66 : vector<64x32xf32>
    %c0_91 = arith.constant 0 : index
    %c0_92 = arith.constant 0 : index
    %69 = vector.load %arg5[%c0_91, %c0_92] : memref<64x32xf32, #tpu.memory_space<vmem>>, vector<64x32xf32>
    tpu.vector_store %arg5[%c0_91, %c0_92], %68 {strides = array<i32>} : memref<64x32xf32, #tpu.memory_space<vmem>>, vector<64x32xf32>,
    %c0_93 = arith.constant 0 : index
    %c1_94 = arith.constant 1 : index
    %c0_95 = arith.constant 0 : index
    %c1_96 = arith.constant 1 : index
    %c0_97 = arith.constant 0 : index
    %70 = vector.load %arg1[%c0_93, %c1_94, %c0_95, %c1_96, %c0_97] : memref<1x9x2x9x8xbf16, #tpu.memory_space<vmem>>, vector<1x8x1x8x4xbf16>
    %71 = vector.shape_cast %70 : vector<1x8x1x8x4xbf16> to vector<8x1x8x4xbf16>
    %72 = vector.shape_cast %71 : vector<8x1x8x4xbf16> to vector<64x4xbf16>
    %c8 = arith.constant 8 : index
    %c0_98 = arith.constant 0 : index
    %c0_99 = arith.constant 0 : index
    %73 = vector.load %arg2[%c8, %c0_98, %c0_99] : memref<9x4x32xbf16, #tpu.memory_space<vmem>>, vector<1x4x32xbf16>
    %74 = vector.shape_cast %73 : vector<1x4x32xbf16> to vector<4x32xbf16>
    %cst_100 = arith.constant dense<0.000000e+00> : vector<64x32xf32>
    %75 = tpu.matmul %72, %74, %cst_100 {dimension_numbers = #tpu.dot_dimension_numbers<[1], [0], [0], [1], [0, 0, 1, 1], [], []>} : vector<64x4xbf16>, vector<4x32xbf16>, vector<64x32xf32> -> vector<64x32xf32>
    %c0_101 = arith.constant 0 : index
    %c0_102 = arith.constant 0 : index
    %76 = vector.load %arg5[%c0_101, %c0_102] : memref<64x32xf32, #tpu.memory_space<vmem>>, vector<64x32xf32>
    %77 = arith.addf %76, %75 : vector<64x32xf32>
    %c0_103 = arith.constant 0 : index
    %c0_104 = arith.constant 0 : index
    %78 = vector.load %arg5[%c0_103, %c0_104] : memref<64x32xf32, #tpu.memory_space<vmem>>, vector<64x32xf32>
    tpu.vector_store %arg5[%c0_103, %c0_104], %77 {strides = array<i32>} : memref<64x32xf32, #tpu.memory_space<vmem>>, vector<64x32xf32>,
    %c0_105 = arith.constant 0 : index
    %c0_106 = arith.constant 0 : index
    %79 = vector.load %arg5[%c0_105, %c0_106] : memref<64x32xf32, #tpu.memory_space<vmem>>, vector<64x32xf32>
    %c0_107 = arith.constant 0 : index
    %c0_108 = arith.constant 0 : index
    %80 = vector.load %arg3[%c0_107, %c0_108] : memref<1x32xf32, #tpu.memory_space<vmem>>, vector<1x32xf32>
    %81 = vector.broadcast %80 : vector<1x32xf32> to vector<64x32xf32>
    %82 = arith.addf %79, %81 : vector<64x32xf32>
    %cst_109 = arith.constant 0.000000e+00 : f32
    %83 = vector.broadcast %cst_109 : f32 to vector<64x32xf32>
    %84 = arith.cmpf oge, %82, %83 : vector<64x32xf32>
    %cst_110 = arith.constant 0.00999999977 : f32
    %85 = vector.broadcast %cst_110 : f32 to vector<64x32xf32>
    %86 = arith.mulf %85, %82 : vector<64x32xf32>
    %87 = arith.select %84, %82, %86 : vector<64x32xi1>, vector<64x32xf32>
    %88 = arith.truncf %87 : vector<64x32xf32> to vector<64x32xbf16>
    %c0_111 = arith.constant 0 : index
    %c0_112 = arith.constant 0 : index
    %c0_113 = arith.constant 0 : index
    %89 = vector.load %arg4[%c0_111, %c0_112, %c0_113] : memref<1x64x32xbf16, #tpu.memory_space<vmem>>, vector<1x64x32xbf16>
    %90 = vector.shape_cast %89 : vector<1x64x32xbf16> to vector<64x32xbf16>
    %91 = vector.shape_cast %88 : vector<64x32xbf16> to vector<1x64x32xbf16>
    tpu.vector_store %arg4[%c0_111, %c0_112, %c0_113], %91 {strides = array<i32>} : memref<1x64x32xbf16, #tpu.memory_space<vmem>>, vector<1x64x32xbf16>,
    return
  }
  func.func @transform_0(%arg0: i32) -> (i32, i32, i32, i32, i32) {
    %c0_i32 = arith.constant 0 : i32
    %c0_i32_0 = arith.constant 0 : i32
    %c0_i32_1 = arith.constant 0 : i32
    %c0_i32_2 = arith.constant 0 : i32
    %c0_i32_3 = arith.constant 0 : i32
    return %arg0, %c0_i32, %c0_i32_0, %c0_i32_1, %c0_i32_2 : i32, i32, i32, i32, i32
  }
  func.func @transform_1(%arg0: i32) -> (i32, i32, i32) {
    %c0_i32 = arith.constant 0 : i32
    %c0_i32_0 = arith.constant 0 : i32
    %c0_i32_1 = arith.constant 0 : i32
    %c0_i32_2 = arith.constant 0 : i32
    return %c0_i32, %c0_i32_0, %c0_i32_1 : i32, i32, i32
  }
  func.func @transform_2(%arg0: i32) -> (i32, i32) {
    %c0_i32 = arith.constant 0 : i32
    %c0_i32_0 = arith.constant 0 : i32
    %c0_i32_1 = arith.constant 0 : i32
    return %c0_i32, %c0_i32_0 : i32, i32
  }
  func.func @transform_3(%arg0: i32) -> (i32, i32, i32) {
    %c0_i32 = arith.constant 0 : i32
    %c0_i32_0 = arith.constant 0 : i32
    %c0_i32_1 = arith.constant 0 : i32
    return %arg0, %c0_i32, %c0_i32_0 : i32, i32, i32
  }
}

module attributes {stable_mosaic.version = 11 : i64} {
  func.func @_conv_lrelu_kernel(%arg0: i32, %arg1: memref<1x5x2x9x64xbf16, #tpu.memory_space<vmem>>, %arg2: memref<9x32x32xbf16, #tpu.memory_space<vmem>>, %arg3: memref<1x32xf32, #tpu.memory_space<vmem>>, %arg4: memref<1x32x32xbf16, #tpu.memory_space<vmem>>, %arg5: memref<32x32xf32, #tpu.memory_space<vmem>>) attributes {dimension_semantics = [#tpu.dimension_semantics<parallel>], iteration_bounds = array<i64: 2>, scalar_prefetch = 0 : i64, scratch_operands = 1 : i64, tpu.core_type = #tpu.core_type<tc>, window_params = [{transform_indices = @transform_0, window_bounds = array<i64: 1, 5, 2, 9, 64>}, {pipeline_mode = #tpu.pipeline_mode<synchronous>, transform_indices = @transform_1, window_bounds = array<i64: 9, 32, 32>}, {pipeline_mode = #tpu.pipeline_mode<synchronous>, transform_indices = @transform_2, window_bounds = array<i64: 1, 32>}, {transform_indices = @transform_3, window_bounds = array<i64: 1, 32, 32>}]} {
    %c0 = arith.constant 0 : index
    %c0_0 = arith.constant 0 : index
    %c0_1 = arith.constant 0 : index
    %c0_2 = arith.constant 0 : index
    %c0_3 = arith.constant 0 : index
    %0 = vector.load %arg1[%c0, %c0_0, %c0_1, %c0_2, %c0_3] : memref<1x5x2x9x64xbf16, #tpu.memory_space<vmem>>, vector<1x4x1x8x32xbf16>
    %1 = vector.shape_cast %0 : vector<1x4x1x8x32xbf16> to vector<4x1x8x32xbf16>
    %2 = vector.shape_cast %1 : vector<4x1x8x32xbf16> to vector<32x32xbf16>
    %c0_4 = arith.constant 0 : index
    %c0_5 = arith.constant 0 : index
    %c0_6 = arith.constant 0 : index
    %3 = vector.load %arg2[%c0_4, %c0_5, %c0_6] : memref<9x32x32xbf16, #tpu.memory_space<vmem>>, vector<1x32x32xbf16>
    %4 = vector.shape_cast %3 : vector<1x32x32xbf16> to vector<32x32xbf16>
    %cst = arith.constant dense<0.000000e+00> : vector<32x32xf32>
    %5 = tpu.matmul %2, %4, %cst {dimension_numbers = #tpu.dot_dimension_numbers<[1], [0], [0], [1], [0, 0, 1, 1], [], []>} : vector<32x32xbf16>, vector<32x32xbf16>, vector<32x32xf32> -> vector<32x32xf32>
    %c0_7 = arith.constant 0 : index
    %c0_8 = arith.constant 0 : index
    %6 = vector.load %arg5[%c0_7, %c0_8] : memref<32x32xf32, #tpu.memory_space<vmem>>, vector<32x32xf32>
    tpu.vector_store %arg5[%c0_7, %c0_8], %5 {strides = array<i32>} : memref<32x32xf32, #tpu.memory_space<vmem>>, vector<32x32xf32>,
    %c0_9 = arith.constant 0 : index
    %c0_10 = arith.constant 0 : index
    %c0_11 = arith.constant 0 : index
    %c0_12 = arith.constant 0 : index
    %c32 = arith.constant 32 : index
    %7 = vector.load %arg1[%c0_9, %c0_10, %c0_11, %c0_12, %c32] : memref<1x5x2x9x64xbf16, #tpu.memory_space<vmem>>, vector<1x4x1x8x32xbf16>
    %8 = vector.shape_cast %7 : vector<1x4x1x8x32xbf16> to vector<4x1x8x32xbf16>
    %9 = vector.shape_cast %8 : vector<4x1x8x32xbf16> to vector<32x32xbf16>
    %c1 = arith.constant 1 : index
    %c0_13 = arith.constant 0 : index
    %c0_14 = arith.constant 0 : index
    %10 = vector.load %arg2[%c1, %c0_13, %c0_14] : memref<9x32x32xbf16, #tpu.memory_space<vmem>>, vector<1x32x32xbf16>
    %11 = vector.shape_cast %10 : vector<1x32x32xbf16> to vector<32x32xbf16>
    %cst_15 = arith.constant dense<0.000000e+00> : vector<32x32xf32>
    %12 = tpu.matmul %9, %11, %cst_15 {dimension_numbers = #tpu.dot_dimension_numbers<[1], [0], [0], [1], [0, 0, 1, 1], [], []>} : vector<32x32xbf16>, vector<32x32xbf16>, vector<32x32xf32> -> vector<32x32xf32>
    %c0_16 = arith.constant 0 : index
    %c0_17 = arith.constant 0 : index
    %13 = vector.load %arg5[%c0_16, %c0_17] : memref<32x32xf32, #tpu.memory_space<vmem>>, vector<32x32xf32>
    %14 = arith.addf %13, %12 : vector<32x32xf32>
    %c0_18 = arith.constant 0 : index
    %c0_19 = arith.constant 0 : index
    %15 = vector.load %arg5[%c0_18, %c0_19] : memref<32x32xf32, #tpu.memory_space<vmem>>, vector<32x32xf32>
    tpu.vector_store %arg5[%c0_18, %c0_19], %14 {strides = array<i32>} : memref<32x32xf32, #tpu.memory_space<vmem>>, vector<32x32xf32>,
    %c0_20 = arith.constant 0 : index
    %c0_21 = arith.constant 0 : index
    %c0_22 = arith.constant 0 : index
    %c1_23 = arith.constant 1 : index
    %c0_24 = arith.constant 0 : index
    %16 = vector.load %arg1[%c0_20, %c0_21, %c0_22, %c1_23, %c0_24] : memref<1x5x2x9x64xbf16, #tpu.memory_space<vmem>>, vector<1x4x1x8x32xbf16>
    %17 = vector.shape_cast %16 : vector<1x4x1x8x32xbf16> to vector<4x1x8x32xbf16>
    %18 = vector.shape_cast %17 : vector<4x1x8x32xbf16> to vector<32x32xbf16>
    %c2 = arith.constant 2 : index
    %c0_25 = arith.constant 0 : index
    %c0_26 = arith.constant 0 : index
    %19 = vector.load %arg2[%c2, %c0_25, %c0_26] : memref<9x32x32xbf16, #tpu.memory_space<vmem>>, vector<1x32x32xbf16>
    %20 = vector.shape_cast %19 : vector<1x32x32xbf16> to vector<32x32xbf16>
    %cst_27 = arith.constant dense<0.000000e+00> : vector<32x32xf32>
    %21 = tpu.matmul %18, %20, %cst_27 {dimension_numbers = #tpu.dot_dimension_numbers<[1], [0], [0], [1], [0, 0, 1, 1], [], []>} : vector<32x32xbf16>, vector<32x32xbf16>, vector<32x32xf32> -> vector<32x32xf32>
    %c0_28 = arith.constant 0 : index
    %c0_29 = arith.constant 0 : index
    %22 = vector.load %arg5[%c0_28, %c0_29] : memref<32x32xf32, #tpu.memory_space<vmem>>, vector<32x32xf32>
    %23 = arith.addf %22, %21 : vector<32x32xf32>
    %c0_30 = arith.constant 0 : index
    %c0_31 = arith.constant 0 : index
    %24 = vector.load %arg5[%c0_30, %c0_31] : memref<32x32xf32, #tpu.memory_space<vmem>>, vector<32x32xf32>
    tpu.vector_store %arg5[%c0_30, %c0_31], %23 {strides = array<i32>} : memref<32x32xf32, #tpu.memory_space<vmem>>, vector<32x32xf32>,
    %c0_32 = arith.constant 0 : index
    %c0_33 = arith.constant 0 : index
    %c1_34 = arith.constant 1 : index
    %c0_35 = arith.constant 0 : index
    %c0_36 = arith.constant 0 : index
    %25 = vector.load %arg1[%c0_32, %c0_33, %c1_34, %c0_35, %c0_36] : memref<1x5x2x9x64xbf16, #tpu.memory_space<vmem>>, vector<1x4x1x8x32xbf16>
    %26 = vector.shape_cast %25 : vector<1x4x1x8x32xbf16> to vector<4x1x8x32xbf16>
    %27 = vector.shape_cast %26 : vector<4x1x8x32xbf16> to vector<32x32xbf16>
    %c3 = arith.constant 3 : index
    %c0_37 = arith.constant 0 : index
    %c0_38 = arith.constant 0 : index
    %28 = vector.load %arg2[%c3, %c0_37, %c0_38] : memref<9x32x32xbf16, #tpu.memory_space<vmem>>, vector<1x32x32xbf16>
    %29 = vector.shape_cast %28 : vector<1x32x32xbf16> to vector<32x32xbf16>
    %cst_39 = arith.constant dense<0.000000e+00> : vector<32x32xf32>
    %30 = tpu.matmul %27, %29, %cst_39 {dimension_numbers = #tpu.dot_dimension_numbers<[1], [0], [0], [1], [0, 0, 1, 1], [], []>} : vector<32x32xbf16>, vector<32x32xbf16>, vector<32x32xf32> -> vector<32x32xf32>
    %c0_40 = arith.constant 0 : index
    %c0_41 = arith.constant 0 : index
    %31 = vector.load %arg5[%c0_40, %c0_41] : memref<32x32xf32, #tpu.memory_space<vmem>>, vector<32x32xf32>
    %32 = arith.addf %31, %30 : vector<32x32xf32>
    %c0_42 = arith.constant 0 : index
    %c0_43 = arith.constant 0 : index
    %33 = vector.load %arg5[%c0_42, %c0_43] : memref<32x32xf32, #tpu.memory_space<vmem>>, vector<32x32xf32>
    tpu.vector_store %arg5[%c0_42, %c0_43], %32 {strides = array<i32>} : memref<32x32xf32, #tpu.memory_space<vmem>>, vector<32x32xf32>,
    %c0_44 = arith.constant 0 : index
    %c0_45 = arith.constant 0 : index
    %c1_46 = arith.constant 1 : index
    %c0_47 = arith.constant 0 : index
    %c32_48 = arith.constant 32 : index
    %34 = vector.load %arg1[%c0_44, %c0_45, %c1_46, %c0_47, %c32_48] : memref<1x5x2x9x64xbf16, #tpu.memory_space<vmem>>, vector<1x4x1x8x32xbf16>
    %35 = vector.shape_cast %34 : vector<1x4x1x8x32xbf16> to vector<4x1x8x32xbf16>
    %36 = vector.shape_cast %35 : vector<4x1x8x32xbf16> to vector<32x32xbf16>
    %c4 = arith.constant 4 : index
    %c0_49 = arith.constant 0 : index
    %c0_50 = arith.constant 0 : index
    %37 = vector.load %arg2[%c4, %c0_49, %c0_50] : memref<9x32x32xbf16, #tpu.memory_space<vmem>>, vector<1x32x32xbf16>
    %38 = vector.shape_cast %37 : vector<1x32x32xbf16> to vector<32x32xbf16>
    %cst_51 = arith.constant dense<0.000000e+00> : vector<32x32xf32>
    %39 = tpu.matmul %36, %38, %cst_51 {dimension_numbers = #tpu.dot_dimension_numbers<[1], [0], [0], [1], [0, 0, 1, 1], [], []>} : vector<32x32xbf16>, vector<32x32xbf16>, vector<32x32xf32> -> vector<32x32xf32>
    %c0_52 = arith.constant 0 : index
    %c0_53 = arith.constant 0 : index
    %40 = vector.load %arg5[%c0_52, %c0_53] : memref<32x32xf32, #tpu.memory_space<vmem>>, vector<32x32xf32>
    %41 = arith.addf %40, %39 : vector<32x32xf32>
    %c0_54 = arith.constant 0 : index
    %c0_55 = arith.constant 0 : index
    %42 = vector.load %arg5[%c0_54, %c0_55] : memref<32x32xf32, #tpu.memory_space<vmem>>, vector<32x32xf32>
    tpu.vector_store %arg5[%c0_54, %c0_55], %41 {strides = array<i32>} : memref<32x32xf32, #tpu.memory_space<vmem>>, vector<32x32xf32>,
    %c0_56 = arith.constant 0 : index
    %c0_57 = arith.constant 0 : index
    %c1_58 = arith.constant 1 : index
    %c1_59 = arith.constant 1 : index
    %c0_60 = arith.constant 0 : index
    %43 = vector.load %arg1[%c0_56, %c0_57, %c1_58, %c1_59, %c0_60] : memref<1x5x2x9x64xbf16, #tpu.memory_space<vmem>>, vector<1x4x1x8x32xbf16>
    %44 = vector.shape_cast %43 : vector<1x4x1x8x32xbf16> to vector<4x1x8x32xbf16>
    %45 = vector.shape_cast %44 : vector<4x1x8x32xbf16> to vector<32x32xbf16>
    %c5 = arith.constant 5 : index
    %c0_61 = arith.constant 0 : index
    %c0_62 = arith.constant 0 : index
    %46 = vector.load %arg2[%c5, %c0_61, %c0_62] : memref<9x32x32xbf16, #tpu.memory_space<vmem>>, vector<1x32x32xbf16>
    %47 = vector.shape_cast %46 : vector<1x32x32xbf16> to vector<32x32xbf16>
    %cst_63 = arith.constant dense<0.000000e+00> : vector<32x32xf32>
    %48 = tpu.matmul %45, %47, %cst_63 {dimension_numbers = #tpu.dot_dimension_numbers<[1], [0], [0], [1], [0, 0, 1, 1], [], []>} : vector<32x32xbf16>, vector<32x32xbf16>, vector<32x32xf32> -> vector<32x32xf32>
    %c0_64 = arith.constant 0 : index
    %c0_65 = arith.constant 0 : index
    %49 = vector.load %arg5[%c0_64, %c0_65] : memref<32x32xf32, #tpu.memory_space<vmem>>, vector<32x32xf32>
    %50 = arith.addf %49, %48 : vector<32x32xf32>
    %c0_66 = arith.constant 0 : index
    %c0_67 = arith.constant 0 : index
    %51 = vector.load %arg5[%c0_66, %c0_67] : memref<32x32xf32, #tpu.memory_space<vmem>>, vector<32x32xf32>
    tpu.vector_store %arg5[%c0_66, %c0_67], %50 {strides = array<i32>} : memref<32x32xf32, #tpu.memory_space<vmem>>, vector<32x32xf32>,
    %c0_68 = arith.constant 0 : index
    %c1_69 = arith.constant 1 : index
    %c0_70 = arith.constant 0 : index
    %c0_71 = arith.constant 0 : index
    %c0_72 = arith.constant 0 : index
    %52 = vector.load %arg1[%c0_68, %c1_69, %c0_70, %c0_71, %c0_72] : memref<1x5x2x9x64xbf16, #tpu.memory_space<vmem>>, vector<1x4x1x8x32xbf16>
    %53 = vector.shape_cast %52 : vector<1x4x1x8x32xbf16> to vector<4x1x8x32xbf16>
    %54 = vector.shape_cast %53 : vector<4x1x8x32xbf16> to vector<32x32xbf16>
    %c6 = arith.constant 6 : index
    %c0_73 = arith.constant 0 : index
    %c0_74 = arith.constant 0 : index
    %55 = vector.load %arg2[%c6, %c0_73, %c0_74] : memref<9x32x32xbf16, #tpu.memory_space<vmem>>, vector<1x32x32xbf16>
    %56 = vector.shape_cast %55 : vector<1x32x32xbf16> to vector<32x32xbf16>
    %cst_75 = arith.constant dense<0.000000e+00> : vector<32x32xf32>
    %57 = tpu.matmul %54, %56, %cst_75 {dimension_numbers = #tpu.dot_dimension_numbers<[1], [0], [0], [1], [0, 0, 1, 1], [], []>} : vector<32x32xbf16>, vector<32x32xbf16>, vector<32x32xf32> -> vector<32x32xf32>
    %c0_76 = arith.constant 0 : index
    %c0_77 = arith.constant 0 : index
    %58 = vector.load %arg5[%c0_76, %c0_77] : memref<32x32xf32, #tpu.memory_space<vmem>>, vector<32x32xf32>
    %59 = arith.addf %58, %57 : vector<32x32xf32>
    %c0_78 = arith.constant 0 : index
    %c0_79 = arith.constant 0 : index
    %60 = vector.load %arg5[%c0_78, %c0_79] : memref<32x32xf32, #tpu.memory_space<vmem>>, vector<32x32xf32>
    tpu.vector_store %arg5[%c0_78, %c0_79], %59 {strides = array<i32>} : memref<32x32xf32, #tpu.memory_space<vmem>>, vector<32x32xf32>,
    %c0_80 = arith.constant 0 : index
    %c1_81 = arith.constant 1 : index
    %c0_82 = arith.constant 0 : index
    %c0_83 = arith.constant 0 : index
    %c32_84 = arith.constant 32 : index
    %61 = vector.load %arg1[%c0_80, %c1_81, %c0_82, %c0_83, %c32_84] : memref<1x5x2x9x64xbf16, #tpu.memory_space<vmem>>, vector<1x4x1x8x32xbf16>
    %62 = vector.shape_cast %61 : vector<1x4x1x8x32xbf16> to vector<4x1x8x32xbf16>
    %63 = vector.shape_cast %62 : vector<4x1x8x32xbf16> to vector<32x32xbf16>
    %c7 = arith.constant 7 : index
    %c0_85 = arith.constant 0 : index
    %c0_86 = arith.constant 0 : index
    %64 = vector.load %arg2[%c7, %c0_85, %c0_86] : memref<9x32x32xbf16, #tpu.memory_space<vmem>>, vector<1x32x32xbf16>
    %65 = vector.shape_cast %64 : vector<1x32x32xbf16> to vector<32x32xbf16>
    %cst_87 = arith.constant dense<0.000000e+00> : vector<32x32xf32>
    %66 = tpu.matmul %63, %65, %cst_87 {dimension_numbers = #tpu.dot_dimension_numbers<[1], [0], [0], [1], [0, 0, 1, 1], [], []>} : vector<32x32xbf16>, vector<32x32xbf16>, vector<32x32xf32> -> vector<32x32xf32>
    %c0_88 = arith.constant 0 : index
    %c0_89 = arith.constant 0 : index
    %67 = vector.load %arg5[%c0_88, %c0_89] : memref<32x32xf32, #tpu.memory_space<vmem>>, vector<32x32xf32>
    %68 = arith.addf %67, %66 : vector<32x32xf32>
    %c0_90 = arith.constant 0 : index
    %c0_91 = arith.constant 0 : index
    %69 = vector.load %arg5[%c0_90, %c0_91] : memref<32x32xf32, #tpu.memory_space<vmem>>, vector<32x32xf32>
    tpu.vector_store %arg5[%c0_90, %c0_91], %68 {strides = array<i32>} : memref<32x32xf32, #tpu.memory_space<vmem>>, vector<32x32xf32>,
    %c0_92 = arith.constant 0 : index
    %c1_93 = arith.constant 1 : index
    %c0_94 = arith.constant 0 : index
    %c1_95 = arith.constant 1 : index
    %c0_96 = arith.constant 0 : index
    %70 = vector.load %arg1[%c0_92, %c1_93, %c0_94, %c1_95, %c0_96] : memref<1x5x2x9x64xbf16, #tpu.memory_space<vmem>>, vector<1x4x1x8x32xbf16>
    %71 = vector.shape_cast %70 : vector<1x4x1x8x32xbf16> to vector<4x1x8x32xbf16>
    %72 = vector.shape_cast %71 : vector<4x1x8x32xbf16> to vector<32x32xbf16>
    %c8 = arith.constant 8 : index
    %c0_97 = arith.constant 0 : index
    %c0_98 = arith.constant 0 : index
    %73 = vector.load %arg2[%c8, %c0_97, %c0_98] : memref<9x32x32xbf16, #tpu.memory_space<vmem>>, vector<1x32x32xbf16>
    %74 = vector.shape_cast %73 : vector<1x32x32xbf16> to vector<32x32xbf16>
    %cst_99 = arith.constant dense<0.000000e+00> : vector<32x32xf32>
    %75 = tpu.matmul %72, %74, %cst_99 {dimension_numbers = #tpu.dot_dimension_numbers<[1], [0], [0], [1], [0, 0, 1, 1], [], []>} : vector<32x32xbf16>, vector<32x32xbf16>, vector<32x32xf32> -> vector<32x32xf32>
    %c0_100 = arith.constant 0 : index
    %c0_101 = arith.constant 0 : index
    %76 = vector.load %arg5[%c0_100, %c0_101] : memref<32x32xf32, #tpu.memory_space<vmem>>, vector<32x32xf32>
    %77 = arith.addf %76, %75 : vector<32x32xf32>
    %c0_102 = arith.constant 0 : index
    %c0_103 = arith.constant 0 : index
    %78 = vector.load %arg5[%c0_102, %c0_103] : memref<32x32xf32, #tpu.memory_space<vmem>>, vector<32x32xf32>
    tpu.vector_store %arg5[%c0_102, %c0_103], %77 {strides = array<i32>} : memref<32x32xf32, #tpu.memory_space<vmem>>, vector<32x32xf32>,
    %c0_104 = arith.constant 0 : index
    %c0_105 = arith.constant 0 : index
    %79 = vector.load %arg5[%c0_104, %c0_105] : memref<32x32xf32, #tpu.memory_space<vmem>>, vector<32x32xf32>
    %c0_106 = arith.constant 0 : index
    %c0_107 = arith.constant 0 : index
    %80 = vector.load %arg3[%c0_106, %c0_107] : memref<1x32xf32, #tpu.memory_space<vmem>>, vector<1x32xf32>
    %81 = vector.broadcast %80 : vector<1x32xf32> to vector<32x32xf32>
    %82 = arith.addf %79, %81 : vector<32x32xf32>
    %cst_108 = arith.constant 0.000000e+00 : f32
    %83 = vector.broadcast %cst_108 : f32 to vector<32x32xf32>
    %84 = arith.cmpf oge, %82, %83 : vector<32x32xf32>
    %cst_109 = arith.constant 0.00999999977 : f32
    %85 = vector.broadcast %cst_109 : f32 to vector<32x32xf32>
    %86 = arith.mulf %85, %82 : vector<32x32xf32>
    %87 = arith.select %84, %82, %86 : vector<32x32xi1>, vector<32x32xf32>
    %88 = arith.truncf %87 : vector<32x32xf32> to vector<32x32xbf16>
    %c0_110 = arith.constant 0 : index
    %c0_111 = arith.constant 0 : index
    %c0_112 = arith.constant 0 : index
    %89 = vector.load %arg4[%c0_110, %c0_111, %c0_112] : memref<1x32x32xbf16, #tpu.memory_space<vmem>>, vector<1x32x32xbf16>
    %90 = vector.shape_cast %89 : vector<1x32x32xbf16> to vector<32x32xbf16>
    %91 = vector.shape_cast %88 : vector<32x32xbf16> to vector<1x32x32xbf16>
    tpu.vector_store %arg4[%c0_110, %c0_111, %c0_112], %91 {strides = array<i32>} : memref<1x32x32xbf16, #tpu.memory_space<vmem>>, vector<1x32x32xbf16>,
    return
  }
  func.func @transform_0(%arg0: i32) -> (i32, i32, i32, i32, i32) {
    %c0_i32 = arith.constant 0 : i32
    %c0_i32_0 = arith.constant 0 : i32
    %c0_i32_1 = arith.constant 0 : i32
    %c0_i32_2 = arith.constant 0 : i32
    %c0_i32_3 = arith.constant 0 : i32
    return %arg0, %c0_i32, %c0_i32_0, %c0_i32_1, %c0_i32_2 : i32, i32, i32, i32, i32
  }
  func.func @transform_1(%arg0: i32) -> (i32, i32, i32) {
    %c0_i32 = arith.constant 0 : i32
    %c0_i32_0 = arith.constant 0 : i32
    %c0_i32_1 = arith.constant 0 : i32
    %c0_i32_2 = arith.constant 0 : i32
    return %c0_i32, %c0_i32_0, %c0_i32_1 : i32, i32, i32
  }
  func.func @transform_2(%arg0: i32) -> (i32, i32) {
    %c0_i32 = arith.constant 0 : i32
    %c0_i32_0 = arith.constant 0 : i32
    %c0_i32_1 = arith.constant 0 : i32
    return %c0_i32, %c0_i32_0 : i32, i32
  }
  func.func @transform_3(%arg0: i32) -> (i32, i32, i32) {
    %c0_i32 = arith.constant 0 : i32
    %c0_i32_0 = arith.constant 0 : i32
    %c0_i32_1 = arith.constant 0 : i32
    return %arg0, %c0_i32, %c0_i32_0 : i32, i32, i32
  }
}

module attributes {stable_mosaic.version = 11 : i64} {
  func.func @_conv_lrelu_kernel(%arg0: i32, %arg1: memref<1x3x2x9x64xbf16, #tpu.memory_space<vmem>>, %arg2: memref<9x32x32xbf16, #tpu.memory_space<vmem>>, %arg3: memref<1x32xf32, #tpu.memory_space<vmem>>, %arg4: memref<1x16x32xbf16, #tpu.memory_space<vmem>>, %arg5: memref<16x32xf32, #tpu.memory_space<vmem>>) attributes {dimension_semantics = [#tpu.dimension_semantics<parallel>], iteration_bounds = array<i64: 2>, scalar_prefetch = 0 : i64, scratch_operands = 1 : i64, tpu.core_type = #tpu.core_type<tc>, window_params = [{transform_indices = @transform_0, window_bounds = array<i64: 1, 3, 2, 9, 64>}, {pipeline_mode = #tpu.pipeline_mode<synchronous>, transform_indices = @transform_1, window_bounds = array<i64: 9, 32, 32>}, {pipeline_mode = #tpu.pipeline_mode<synchronous>, transform_indices = @transform_2, window_bounds = array<i64: 1, 32>}, {transform_indices = @transform_3, window_bounds = array<i64: 1, 16, 32>}]} {
    %c0 = arith.constant 0 : index
    %c0_0 = arith.constant 0 : index
    %c0_1 = arith.constant 0 : index
    %c0_2 = arith.constant 0 : index
    %c0_3 = arith.constant 0 : index
    %0 = vector.load %arg1[%c0, %c0_0, %c0_1, %c0_2, %c0_3] : memref<1x3x2x9x64xbf16, #tpu.memory_space<vmem>>, vector<1x2x1x8x32xbf16>
    %1 = vector.shape_cast %0 : vector<1x2x1x8x32xbf16> to vector<2x1x8x32xbf16>
    %2 = vector.shape_cast %1 : vector<2x1x8x32xbf16> to vector<16x32xbf16>
    %c0_4 = arith.constant 0 : index
    %c0_5 = arith.constant 0 : index
    %c0_6 = arith.constant 0 : index
    %3 = vector.load %arg2[%c0_4, %c0_5, %c0_6] : memref<9x32x32xbf16, #tpu.memory_space<vmem>>, vector<1x32x32xbf16>
    %4 = vector.shape_cast %3 : vector<1x32x32xbf16> to vector<32x32xbf16>
    %cst = arith.constant dense<0.000000e+00> : vector<16x32xf32>
    %5 = tpu.matmul %2, %4, %cst {dimension_numbers = #tpu.dot_dimension_numbers<[1], [0], [0], [1], [0, 0, 1, 1], [], []>} : vector<16x32xbf16>, vector<32x32xbf16>, vector<16x32xf32> -> vector<16x32xf32>
    %c0_7 = arith.constant 0 : index
    %c0_8 = arith.constant 0 : index
    %6 = vector.load %arg5[%c0_7, %c0_8] : memref<16x32xf32, #tpu.memory_space<vmem>>, vector<16x32xf32>
    tpu.vector_store %arg5[%c0_7, %c0_8], %5 {strides = array<i32>} : memref<16x32xf32, #tpu.memory_space<vmem>>, vector<16x32xf32>,
    %c0_9 = arith.constant 0 : index
    %c0_10 = arith.constant 0 : index
    %c0_11 = arith.constant 0 : index
    %c0_12 = arith.constant 0 : index
    %c32 = arith.constant 32 : index
    %7 = vector.load %arg1[%c0_9, %c0_10, %c0_11, %c0_12, %c32] : memref<1x3x2x9x64xbf16, #tpu.memory_space<vmem>>, vector<1x2x1x8x32xbf16>
    %8 = vector.shape_cast %7 : vector<1x2x1x8x32xbf16> to vector<2x1x8x32xbf16>
    %9 = vector.shape_cast %8 : vector<2x1x8x32xbf16> to vector<16x32xbf16>
    %c1 = arith.constant 1 : index
    %c0_13 = arith.constant 0 : index
    %c0_14 = arith.constant 0 : index
    %10 = vector.load %arg2[%c1, %c0_13, %c0_14] : memref<9x32x32xbf16, #tpu.memory_space<vmem>>, vector<1x32x32xbf16>
    %11 = vector.shape_cast %10 : vector<1x32x32xbf16> to vector<32x32xbf16>
    %cst_15 = arith.constant dense<0.000000e+00> : vector<16x32xf32>
    %12 = tpu.matmul %9, %11, %cst_15 {dimension_numbers = #tpu.dot_dimension_numbers<[1], [0], [0], [1], [0, 0, 1, 1], [], []>} : vector<16x32xbf16>, vector<32x32xbf16>, vector<16x32xf32> -> vector<16x32xf32>
    %c0_16 = arith.constant 0 : index
    %c0_17 = arith.constant 0 : index
    %13 = vector.load %arg5[%c0_16, %c0_17] : memref<16x32xf32, #tpu.memory_space<vmem>>, vector<16x32xf32>
    %14 = arith.addf %13, %12 : vector<16x32xf32>
    %c0_18 = arith.constant 0 : index
    %c0_19 = arith.constant 0 : index
    %15 = vector.load %arg5[%c0_18, %c0_19] : memref<16x32xf32, #tpu.memory_space<vmem>>, vector<16x32xf32>
    tpu.vector_store %arg5[%c0_18, %c0_19], %14 {strides = array<i32>} : memref<16x32xf32, #tpu.memory_space<vmem>>, vector<16x32xf32>,
    %c0_20 = arith.constant 0 : index
    %c0_21 = arith.constant 0 : index
    %c0_22 = arith.constant 0 : index
    %c1_23 = arith.constant 1 : index
    %c0_24 = arith.constant 0 : index
    %16 = vector.load %arg1[%c0_20, %c0_21, %c0_22, %c1_23, %c0_24] : memref<1x3x2x9x64xbf16, #tpu.memory_space<vmem>>, vector<1x2x1x8x32xbf16>
    %17 = vector.shape_cast %16 : vector<1x2x1x8x32xbf16> to vector<2x1x8x32xbf16>
    %18 = vector.shape_cast %17 : vector<2x1x8x32xbf16> to vector<16x32xbf16>
    %c2 = arith.constant 2 : index
    %c0_25 = arith.constant 0 : index
    %c0_26 = arith.constant 0 : index
    %19 = vector.load %arg2[%c2, %c0_25, %c0_26] : memref<9x32x32xbf16, #tpu.memory_space<vmem>>, vector<1x32x32xbf16>
    %20 = vector.shape_cast %19 : vector<1x32x32xbf16> to vector<32x32xbf16>
    %cst_27 = arith.constant dense<0.000000e+00> : vector<16x32xf32>
    %21 = tpu.matmul %18, %20, %cst_27 {dimension_numbers = #tpu.dot_dimension_numbers<[1], [0], [0], [1], [0, 0, 1, 1], [], []>} : vector<16x32xbf16>, vector<32x32xbf16>, vector<16x32xf32> -> vector<16x32xf32>
    %c0_28 = arith.constant 0 : index
    %c0_29 = arith.constant 0 : index
    %22 = vector.load %arg5[%c0_28, %c0_29] : memref<16x32xf32, #tpu.memory_space<vmem>>, vector<16x32xf32>
    %23 = arith.addf %22, %21 : vector<16x32xf32>
    %c0_30 = arith.constant 0 : index
    %c0_31 = arith.constant 0 : index
    %24 = vector.load %arg5[%c0_30, %c0_31] : memref<16x32xf32, #tpu.memory_space<vmem>>, vector<16x32xf32>
    tpu.vector_store %arg5[%c0_30, %c0_31], %23 {strides = array<i32>} : memref<16x32xf32, #tpu.memory_space<vmem>>, vector<16x32xf32>,
    %c0_32 = arith.constant 0 : index
    %c0_33 = arith.constant 0 : index
    %c1_34 = arith.constant 1 : index
    %c0_35 = arith.constant 0 : index
    %c0_36 = arith.constant 0 : index
    %25 = vector.load %arg1[%c0_32, %c0_33, %c1_34, %c0_35, %c0_36] : memref<1x3x2x9x64xbf16, #tpu.memory_space<vmem>>, vector<1x2x1x8x32xbf16>
    %26 = vector.shape_cast %25 : vector<1x2x1x8x32xbf16> to vector<2x1x8x32xbf16>
    %27 = vector.shape_cast %26 : vector<2x1x8x32xbf16> to vector<16x32xbf16>
    %c3 = arith.constant 3 : index
    %c0_37 = arith.constant 0 : index
    %c0_38 = arith.constant 0 : index
    %28 = vector.load %arg2[%c3, %c0_37, %c0_38] : memref<9x32x32xbf16, #tpu.memory_space<vmem>>, vector<1x32x32xbf16>
    %29 = vector.shape_cast %28 : vector<1x32x32xbf16> to vector<32x32xbf16>
    %cst_39 = arith.constant dense<0.000000e+00> : vector<16x32xf32>
    %30 = tpu.matmul %27, %29, %cst_39 {dimension_numbers = #tpu.dot_dimension_numbers<[1], [0], [0], [1], [0, 0, 1, 1], [], []>} : vector<16x32xbf16>, vector<32x32xbf16>, vector<16x32xf32> -> vector<16x32xf32>
    %c0_40 = arith.constant 0 : index
    %c0_41 = arith.constant 0 : index
    %31 = vector.load %arg5[%c0_40, %c0_41] : memref<16x32xf32, #tpu.memory_space<vmem>>, vector<16x32xf32>
    %32 = arith.addf %31, %30 : vector<16x32xf32>
    %c0_42 = arith.constant 0 : index
    %c0_43 = arith.constant 0 : index
    %33 = vector.load %arg5[%c0_42, %c0_43] : memref<16x32xf32, #tpu.memory_space<vmem>>, vector<16x32xf32>
    tpu.vector_store %arg5[%c0_42, %c0_43], %32 {strides = array<i32>} : memref<16x32xf32, #tpu.memory_space<vmem>>, vector<16x32xf32>,
    %c0_44 = arith.constant 0 : index
    %c0_45 = arith.constant 0 : index
    %c1_46 = arith.constant 1 : index
    %c0_47 = arith.constant 0 : index
    %c32_48 = arith.constant 32 : index
    %34 = vector.load %arg1[%c0_44, %c0_45, %c1_46, %c0_47, %c32_48] : memref<1x3x2x9x64xbf16, #tpu.memory_space<vmem>>, vector<1x2x1x8x32xbf16>
    %35 = vector.shape_cast %34 : vector<1x2x1x8x32xbf16> to vector<2x1x8x32xbf16>
    %36 = vector.shape_cast %35 : vector<2x1x8x32xbf16> to vector<16x32xbf16>
    %c4 = arith.constant 4 : index
    %c0_49 = arith.constant 0 : index
    %c0_50 = arith.constant 0 : index
    %37 = vector.load %arg2[%c4, %c0_49, %c0_50] : memref<9x32x32xbf16, #tpu.memory_space<vmem>>, vector<1x32x32xbf16>
    %38 = vector.shape_cast %37 : vector<1x32x32xbf16> to vector<32x32xbf16>
    %cst_51 = arith.constant dense<0.000000e+00> : vector<16x32xf32>
    %39 = tpu.matmul %36, %38, %cst_51 {dimension_numbers = #tpu.dot_dimension_numbers<[1], [0], [0], [1], [0, 0, 1, 1], [], []>} : vector<16x32xbf16>, vector<32x32xbf16>, vector<16x32xf32> -> vector<16x32xf32>
    %c0_52 = arith.constant 0 : index
    %c0_53 = arith.constant 0 : index
    %40 = vector.load %arg5[%c0_52, %c0_53] : memref<16x32xf32, #tpu.memory_space<vmem>>, vector<16x32xf32>
    %41 = arith.addf %40, %39 : vector<16x32xf32>
    %c0_54 = arith.constant 0 : index
    %c0_55 = arith.constant 0 : index
    %42 = vector.load %arg5[%c0_54, %c0_55] : memref<16x32xf32, #tpu.memory_space<vmem>>, vector<16x32xf32>
    tpu.vector_store %arg5[%c0_54, %c0_55], %41 {strides = array<i32>} : memref<16x32xf32, #tpu.memory_space<vmem>>, vector<16x32xf32>,
    %c0_56 = arith.constant 0 : index
    %c0_57 = arith.constant 0 : index
    %c1_58 = arith.constant 1 : index
    %c1_59 = arith.constant 1 : index
    %c0_60 = arith.constant 0 : index
    %43 = vector.load %arg1[%c0_56, %c0_57, %c1_58, %c1_59, %c0_60] : memref<1x3x2x9x64xbf16, #tpu.memory_space<vmem>>, vector<1x2x1x8x32xbf16>
    %44 = vector.shape_cast %43 : vector<1x2x1x8x32xbf16> to vector<2x1x8x32xbf16>
    %45 = vector.shape_cast %44 : vector<2x1x8x32xbf16> to vector<16x32xbf16>
    %c5 = arith.constant 5 : index
    %c0_61 = arith.constant 0 : index
    %c0_62 = arith.constant 0 : index
    %46 = vector.load %arg2[%c5, %c0_61, %c0_62] : memref<9x32x32xbf16, #tpu.memory_space<vmem>>, vector<1x32x32xbf16>
    %47 = vector.shape_cast %46 : vector<1x32x32xbf16> to vector<32x32xbf16>
    %cst_63 = arith.constant dense<0.000000e+00> : vector<16x32xf32>
    %48 = tpu.matmul %45, %47, %cst_63 {dimension_numbers = #tpu.dot_dimension_numbers<[1], [0], [0], [1], [0, 0, 1, 1], [], []>} : vector<16x32xbf16>, vector<32x32xbf16>, vector<16x32xf32> -> vector<16x32xf32>
    %c0_64 = arith.constant 0 : index
    %c0_65 = arith.constant 0 : index
    %49 = vector.load %arg5[%c0_64, %c0_65] : memref<16x32xf32, #tpu.memory_space<vmem>>, vector<16x32xf32>
    %50 = arith.addf %49, %48 : vector<16x32xf32>
    %c0_66 = arith.constant 0 : index
    %c0_67 = arith.constant 0 : index
    %51 = vector.load %arg5[%c0_66, %c0_67] : memref<16x32xf32, #tpu.memory_space<vmem>>, vector<16x32xf32>
    tpu.vector_store %arg5[%c0_66, %c0_67], %50 {strides = array<i32>} : memref<16x32xf32, #tpu.memory_space<vmem>>, vector<16x32xf32>,
    %c0_68 = arith.constant 0 : index
    %c1_69 = arith.constant 1 : index
    %c0_70 = arith.constant 0 : index
    %c0_71 = arith.constant 0 : index
    %c0_72 = arith.constant 0 : index
    %52 = vector.load %arg1[%c0_68, %c1_69, %c0_70, %c0_71, %c0_72] : memref<1x3x2x9x64xbf16, #tpu.memory_space<vmem>>, vector<1x2x1x8x32xbf16>
    %53 = vector.shape_cast %52 : vector<1x2x1x8x32xbf16> to vector<2x1x8x32xbf16>
    %54 = vector.shape_cast %53 : vector<2x1x8x32xbf16> to vector<16x32xbf16>
    %c6 = arith.constant 6 : index
    %c0_73 = arith.constant 0 : index
    %c0_74 = arith.constant 0 : index
    %55 = vector.load %arg2[%c6, %c0_73, %c0_74] : memref<9x32x32xbf16, #tpu.memory_space<vmem>>, vector<1x32x32xbf16>
    %56 = vector.shape_cast %55 : vector<1x32x32xbf16> to vector<32x32xbf16>
    %cst_75 = arith.constant dense<0.000000e+00> : vector<16x32xf32>
    %57 = tpu.matmul %54, %56, %cst_75 {dimension_numbers = #tpu.dot_dimension_numbers<[1], [0], [0], [1], [0, 0, 1, 1], [], []>} : vector<16x32xbf16>, vector<32x32xbf16>, vector<16x32xf32> -> vector<16x32xf32>
    %c0_76 = arith.constant 0 : index
    %c0_77 = arith.constant 0 : index
    %58 = vector.load %arg5[%c0_76, %c0_77] : memref<16x32xf32, #tpu.memory_space<vmem>>, vector<16x32xf32>
    %59 = arith.addf %58, %57 : vector<16x32xf32>
    %c0_78 = arith.constant 0 : index
    %c0_79 = arith.constant 0 : index
    %60 = vector.load %arg5[%c0_78, %c0_79] : memref<16x32xf32, #tpu.memory_space<vmem>>, vector<16x32xf32>
    tpu.vector_store %arg5[%c0_78, %c0_79], %59 {strides = array<i32>} : memref<16x32xf32, #tpu.memory_space<vmem>>, vector<16x32xf32>,
    %c0_80 = arith.constant 0 : index
    %c1_81 = arith.constant 1 : index
    %c0_82 = arith.constant 0 : index
    %c0_83 = arith.constant 0 : index
    %c32_84 = arith.constant 32 : index
    %61 = vector.load %arg1[%c0_80, %c1_81, %c0_82, %c0_83, %c32_84] : memref<1x3x2x9x64xbf16, #tpu.memory_space<vmem>>, vector<1x2x1x8x32xbf16>
    %62 = vector.shape_cast %61 : vector<1x2x1x8x32xbf16> to vector<2x1x8x32xbf16>
    %63 = vector.shape_cast %62 : vector<2x1x8x32xbf16> to vector<16x32xbf16>
    %c7 = arith.constant 7 : index
    %c0_85 = arith.constant 0 : index
    %c0_86 = arith.constant 0 : index
    %64 = vector.load %arg2[%c7, %c0_85, %c0_86] : memref<9x32x32xbf16, #tpu.memory_space<vmem>>, vector<1x32x32xbf16>
    %65 = vector.shape_cast %64 : vector<1x32x32xbf16> to vector<32x32xbf16>
    %cst_87 = arith.constant dense<0.000000e+00> : vector<16x32xf32>
    %66 = tpu.matmul %63, %65, %cst_87 {dimension_numbers = #tpu.dot_dimension_numbers<[1], [0], [0], [1], [0, 0, 1, 1], [], []>} : vector<16x32xbf16>, vector<32x32xbf16>, vector<16x32xf32> -> vector<16x32xf32>
    %c0_88 = arith.constant 0 : index
    %c0_89 = arith.constant 0 : index
    %67 = vector.load %arg5[%c0_88, %c0_89] : memref<16x32xf32, #tpu.memory_space<vmem>>, vector<16x32xf32>
    %68 = arith.addf %67, %66 : vector<16x32xf32>
    %c0_90 = arith.constant 0 : index
    %c0_91 = arith.constant 0 : index
    %69 = vector.load %arg5[%c0_90, %c0_91] : memref<16x32xf32, #tpu.memory_space<vmem>>, vector<16x32xf32>
    tpu.vector_store %arg5[%c0_90, %c0_91], %68 {strides = array<i32>} : memref<16x32xf32, #tpu.memory_space<vmem>>, vector<16x32xf32>,
    %c0_92 = arith.constant 0 : index
    %c1_93 = arith.constant 1 : index
    %c0_94 = arith.constant 0 : index
    %c1_95 = arith.constant 1 : index
    %c0_96 = arith.constant 0 : index
    %70 = vector.load %arg1[%c0_92, %c1_93, %c0_94, %c1_95, %c0_96] : memref<1x3x2x9x64xbf16, #tpu.memory_space<vmem>>, vector<1x2x1x8x32xbf16>
    %71 = vector.shape_cast %70 : vector<1x2x1x8x32xbf16> to vector<2x1x8x32xbf16>
    %72 = vector.shape_cast %71 : vector<2x1x8x32xbf16> to vector<16x32xbf16>
    %c8 = arith.constant 8 : index
    %c0_97 = arith.constant 0 : index
    %c0_98 = arith.constant 0 : index
    %73 = vector.load %arg2[%c8, %c0_97, %c0_98] : memref<9x32x32xbf16, #tpu.memory_space<vmem>>, vector<1x32x32xbf16>
    %74 = vector.shape_cast %73 : vector<1x32x32xbf16> to vector<32x32xbf16>
    %cst_99 = arith.constant dense<0.000000e+00> : vector<16x32xf32>
    %75 = tpu.matmul %72, %74, %cst_99 {dimension_numbers = #tpu.dot_dimension_numbers<[1], [0], [0], [1], [0, 0, 1, 1], [], []>} : vector<16x32xbf16>, vector<32x32xbf16>, vector<16x32xf32> -> vector<16x32xf32>
    %c0_100 = arith.constant 0 : index
    %c0_101 = arith.constant 0 : index
    %76 = vector.load %arg5[%c0_100, %c0_101] : memref<16x32xf32, #tpu.memory_space<vmem>>, vector<16x32xf32>
    %77 = arith.addf %76, %75 : vector<16x32xf32>
    %c0_102 = arith.constant 0 : index
    %c0_103 = arith.constant 0 : index
    %78 = vector.load %arg5[%c0_102, %c0_103] : memref<16x32xf32, #tpu.memory_space<vmem>>, vector<16x32xf32>
    tpu.vector_store %arg5[%c0_102, %c0_103], %77 {strides = array<i32>} : memref<16x32xf32, #tpu.memory_space<vmem>>, vector<16x32xf32>,
    %c0_104 = arith.constant 0 : index
    %c0_105 = arith.constant 0 : index
    %79 = vector.load %arg5[%c0_104, %c0_105] : memref<16x32xf32, #tpu.memory_space<vmem>>, vector<16x32xf32>
    %c0_106 = arith.constant 0 : index
    %c0_107 = arith.constant 0 : index
    %80 = vector.load %arg3[%c0_106, %c0_107] : memref<1x32xf32, #tpu.memory_space<vmem>>, vector<1x32xf32>
    %81 = vector.broadcast %80 : vector<1x32xf32> to vector<16x32xf32>
    %82 = arith.addf %79, %81 : vector<16x32xf32>
    %cst_108 = arith.constant 0.000000e+00 : f32
    %83 = vector.broadcast %cst_108 : f32 to vector<16x32xf32>
    %84 = arith.cmpf oge, %82, %83 : vector<16x32xf32>
    %cst_109 = arith.constant 0.00999999977 : f32
    %85 = vector.broadcast %cst_109 : f32 to vector<16x32xf32>
    %86 = arith.mulf %85, %82 : vector<16x32xf32>
    %87 = arith.select %84, %82, %86 : vector<16x32xi1>, vector<16x32xf32>
    %88 = arith.truncf %87 : vector<16x32xf32> to vector<16x32xbf16>
    %c0_110 = arith.constant 0 : index
    %c0_111 = arith.constant 0 : index
    %c0_112 = arith.constant 0 : index
    %89 = vector.load %arg4[%c0_110, %c0_111, %c0_112] : memref<1x16x32xbf16, #tpu.memory_space<vmem>>, vector<1x16x32xbf16>
    %90 = vector.shape_cast %89 : vector<1x16x32xbf16> to vector<16x32xbf16>
    %91 = vector.shape_cast %88 : vector<16x32xbf16> to vector<1x16x32xbf16>
    tpu.vector_store %arg4[%c0_110, %c0_111, %c0_112], %91 {strides = array<i32>} : memref<1x16x32xbf16, #tpu.memory_space<vmem>>, vector<1x16x32xbf16>,
    return
  }
  func.func @transform_0(%arg0: i32) -> (i32, i32, i32, i32, i32) {
    %c0_i32 = arith.constant 0 : i32
    %c0_i32_0 = arith.constant 0 : i32
    %c0_i32_1 = arith.constant 0 : i32
    %c0_i32_2 = arith.constant 0 : i32
    %c0_i32_3 = arith.constant 0 : i32
    return %arg0, %c0_i32, %c0_i32_0, %c0_i32_1, %c0_i32_2 : i32, i32, i32, i32, i32
  }
  func.func @transform_1(%arg0: i32) -> (i32, i32, i32) {
    %c0_i32 = arith.constant 0 : i32
    %c0_i32_0 = arith.constant 0 : i32
    %c0_i32_1 = arith.constant 0 : i32
    %c0_i32_2 = arith.constant 0 : i32
    return %c0_i32, %c0_i32_0, %c0_i32_1 : i32, i32, i32
  }
  func.func @transform_2(%arg0: i32) -> (i32, i32) {
    %c0_i32 = arith.constant 0 : i32
    %c0_i32_0 = arith.constant 0 : i32
    %c0_i32_1 = arith.constant 0 : i32
    return %c0_i32, %c0_i32_0 : i32, i32
  }
  func.func @transform_3(%arg0: i32) -> (i32, i32, i32) {
    %c0_i32 = arith.constant 0 : i32
    %c0_i32_0 = arith.constant 0 : i32
    %c0_i32_1 = arith.constant 0 : i32
    return %arg0, %c0_i32, %c0_i32_0 : i32, i32, i32
  }
}

module attributes {stable_mosaic.version = 11 : i64} {
  func.func @_conv_lrelu_linear_kernel(%arg0: i32, %arg1: memref<1x2x2x9x64xbf16, #tpu.memory_space<vmem>>, %arg2: memref<9x32x32xbf16, #tpu.memory_space<vmem>>, %arg3: memref<1x32xf32, #tpu.memory_space<vmem>>, %arg4: memref<32x32xbf16, #tpu.memory_space<vmem>>, %arg5: memref<1x32xf32, #tpu.memory_space<vmem>>, %arg6: memref<1x1x32xf32, #tpu.memory_space<vmem>>, %arg7: memref<8x32xf32, #tpu.memory_space<vmem>>) attributes {dimension_semantics = [#tpu.dimension_semantics<parallel>], iteration_bounds = array<i64: 2>, scalar_prefetch = 0 : i64, scratch_operands = 1 : i64, tpu.core_type = #tpu.core_type<tc>, window_params = [{transform_indices = @transform_0, window_bounds = array<i64: 1, 2, 2, 9, 64>}, {pipeline_mode = #tpu.pipeline_mode<synchronous>, transform_indices = @transform_1, window_bounds = array<i64: 9, 32, 32>}, {pipeline_mode = #tpu.pipeline_mode<synchronous>, transform_indices = @transform_2, window_bounds = array<i64: 1, 32>}, {pipeline_mode = #tpu.pipeline_mode<synchronous>, transform_indices = @transform_3, window_bounds = array<i64: 32, 32>}, {pipeline_mode = #tpu.pipeline_mode<synchronous>, transform_indices = @transform_4, window_bounds = array<i64: 1, 32>}, {transform_indices = @transform_5, window_bounds = array<i64: 1, 1, 32>}]} {
    %c0 = arith.constant 0 : index
    %c0_0 = arith.constant 0 : index
    %c0_1 = arith.constant 0 : index
    %c0_2 = arith.constant 0 : index
    %c0_3 = arith.constant 0 : index
    %0 = vector.load %arg1[%c0, %c0_0, %c0_1, %c0_2, %c0_3] : memref<1x2x2x9x64xbf16, #tpu.memory_space<vmem>>, vector<1x1x1x8x32xbf16>
    %1 = vector.shape_cast %0 : vector<1x1x1x8x32xbf16> to vector<1x1x8x32xbf16>
    %2 = vector.shape_cast %1 : vector<1x1x8x32xbf16> to vector<8x32xbf16>
    %c0_4 = arith.constant 0 : index
    %c0_5 = arith.constant 0 : index
    %c0_6 = arith.constant 0 : index
    %3 = vector.load %arg2[%c0_4, %c0_5, %c0_6] : memref<9x32x32xbf16, #tpu.memory_space<vmem>>, vector<1x32x32xbf16>
    %4 = vector.shape_cast %3 : vector<1x32x32xbf16> to vector<32x32xbf16>
    %cst = arith.constant dense<0.000000e+00> : vector<8x32xf32>
    %5 = tpu.matmul %2, %4, %cst {dimension_numbers = #tpu.dot_dimension_numbers<[1], [0], [0], [1], [0, 0, 1, 1], [], []>} : vector<8x32xbf16>, vector<32x32xbf16>, vector<8x32xf32> -> vector<8x32xf32>
    %c0_7 = arith.constant 0 : index
    %c0_8 = arith.constant 0 : index
    %6 = vector.load %arg7[%c0_7, %c0_8] : memref<8x32xf32, #tpu.memory_space<vmem>>, vector<8x32xf32>
    tpu.vector_store %arg7[%c0_7, %c0_8], %5 {strides = array<i32>} : memref<8x32xf32, #tpu.memory_space<vmem>>, vector<8x32xf32>,
    %c0_9 = arith.constant 0 : index
    %c0_10 = arith.constant 0 : index
    %c0_11 = arith.constant 0 : index
    %c0_12 = arith.constant 0 : index
    %c32 = arith.constant 32 : index
    %7 = vector.load %arg1[%c0_9, %c0_10, %c0_11, %c0_12, %c32] : memref<1x2x2x9x64xbf16, #tpu.memory_space<vmem>>, vector<1x1x1x8x32xbf16>
    %8 = vector.shape_cast %7 : vector<1x1x1x8x32xbf16> to vector<1x1x8x32xbf16>
    %9 = vector.shape_cast %8 : vector<1x1x8x32xbf16> to vector<8x32xbf16>
    %c1 = arith.constant 1 : index
    %c0_13 = arith.constant 0 : index
    %c0_14 = arith.constant 0 : index
    %10 = vector.load %arg2[%c1, %c0_13, %c0_14] : memref<9x32x32xbf16, #tpu.memory_space<vmem>>, vector<1x32x32xbf16>
    %11 = vector.shape_cast %10 : vector<1x32x32xbf16> to vector<32x32xbf16>
    %cst_15 = arith.constant dense<0.000000e+00> : vector<8x32xf32>
    %12 = tpu.matmul %9, %11, %cst_15 {dimension_numbers = #tpu.dot_dimension_numbers<[1], [0], [0], [1], [0, 0, 1, 1], [], []>} : vector<8x32xbf16>, vector<32x32xbf16>, vector<8x32xf32> -> vector<8x32xf32>
    %c0_16 = arith.constant 0 : index
    %c0_17 = arith.constant 0 : index
    %13 = vector.load %arg7[%c0_16, %c0_17] : memref<8x32xf32, #tpu.memory_space<vmem>>, vector<8x32xf32>
    %14 = arith.addf %13, %12 : vector<8x32xf32>
    %c0_18 = arith.constant 0 : index
    %c0_19 = arith.constant 0 : index
    %15 = vector.load %arg7[%c0_18, %c0_19] : memref<8x32xf32, #tpu.memory_space<vmem>>, vector<8x32xf32>
    tpu.vector_store %arg7[%c0_18, %c0_19], %14 {strides = array<i32>} : memref<8x32xf32, #tpu.memory_space<vmem>>, vector<8x32xf32>,
    %c0_20 = arith.constant 0 : index
    %c0_21 = arith.constant 0 : index
    %c0_22 = arith.constant 0 : index
    %c1_23 = arith.constant 1 : index
    %c0_24 = arith.constant 0 : index
    %16 = vector.load %arg1[%c0_20, %c0_21, %c0_22, %c1_23, %c0_24] : memref<1x2x2x9x64xbf16, #tpu.memory_space<vmem>>, vector<1x1x1x8x32xbf16>
    %17 = vector.shape_cast %16 : vector<1x1x1x8x32xbf16> to vector<1x1x8x32xbf16>
    %18 = vector.shape_cast %17 : vector<1x1x8x32xbf16> to vector<8x32xbf16>
    %c2 = arith.constant 2 : index
    %c0_25 = arith.constant 0 : index
    %c0_26 = arith.constant 0 : index
    %19 = vector.load %arg2[%c2, %c0_25, %c0_26] : memref<9x32x32xbf16, #tpu.memory_space<vmem>>, vector<1x32x32xbf16>
    %20 = vector.shape_cast %19 : vector<1x32x32xbf16> to vector<32x32xbf16>
    %cst_27 = arith.constant dense<0.000000e+00> : vector<8x32xf32>
    %21 = tpu.matmul %18, %20, %cst_27 {dimension_numbers = #tpu.dot_dimension_numbers<[1], [0], [0], [1], [0, 0, 1, 1], [], []>} : vector<8x32xbf16>, vector<32x32xbf16>, vector<8x32xf32> -> vector<8x32xf32>
    %c0_28 = arith.constant 0 : index
    %c0_29 = arith.constant 0 : index
    %22 = vector.load %arg7[%c0_28, %c0_29] : memref<8x32xf32, #tpu.memory_space<vmem>>, vector<8x32xf32>
    %23 = arith.addf %22, %21 : vector<8x32xf32>
    %c0_30 = arith.constant 0 : index
    %c0_31 = arith.constant 0 : index
    %24 = vector.load %arg7[%c0_30, %c0_31] : memref<8x32xf32, #tpu.memory_space<vmem>>, vector<8x32xf32>
    tpu.vector_store %arg7[%c0_30, %c0_31], %23 {strides = array<i32>} : memref<8x32xf32, #tpu.memory_space<vmem>>, vector<8x32xf32>,
    %c0_32 = arith.constant 0 : index
    %c0_33 = arith.constant 0 : index
    %c1_34 = arith.constant 1 : index
    %c0_35 = arith.constant 0 : index
    %c0_36 = arith.constant 0 : index
    %25 = vector.load %arg1[%c0_32, %c0_33, %c1_34, %c0_35, %c0_36] : memref<1x2x2x9x64xbf16, #tpu.memory_space<vmem>>, vector<1x1x1x8x32xbf16>
    %26 = vector.shape_cast %25 : vector<1x1x1x8x32xbf16> to vector<1x1x8x32xbf16>
    %27 = vector.shape_cast %26 : vector<1x1x8x32xbf16> to vector<8x32xbf16>
    %c3 = arith.constant 3 : index
    %c0_37 = arith.constant 0 : index
    %c0_38 = arith.constant 0 : index
    %28 = vector.load %arg2[%c3, %c0_37, %c0_38] : memref<9x32x32xbf16, #tpu.memory_space<vmem>>, vector<1x32x32xbf16>
    %29 = vector.shape_cast %28 : vector<1x32x32xbf16> to vector<32x32xbf16>
    %cst_39 = arith.constant dense<0.000000e+00> : vector<8x32xf32>
    %30 = tpu.matmul %27, %29, %cst_39 {dimension_numbers = #tpu.dot_dimension_numbers<[1], [0], [0], [1], [0, 0, 1, 1], [], []>} : vector<8x32xbf16>, vector<32x32xbf16>, vector<8x32xf32> -> vector<8x32xf32>
    %c0_40 = arith.constant 0 : index
    %c0_41 = arith.constant 0 : index
    %31 = vector.load %arg7[%c0_40, %c0_41] : memref<8x32xf32, #tpu.memory_space<vmem>>, vector<8x32xf32>
    %32 = arith.addf %31, %30 : vector<8x32xf32>
    %c0_42 = arith.constant 0 : index
    %c0_43 = arith.constant 0 : index
    %33 = vector.load %arg7[%c0_42, %c0_43] : memref<8x32xf32, #tpu.memory_space<vmem>>, vector<8x32xf32>
    tpu.vector_store %arg7[%c0_42, %c0_43], %32 {strides = array<i32>} : memref<8x32xf32, #tpu.memory_space<vmem>>, vector<8x32xf32>,
    %c0_44 = arith.constant 0 : index
    %c0_45 = arith.constant 0 : index
    %c1_46 = arith.constant 1 : index
    %c0_47 = arith.constant 0 : index
    %c32_48 = arith.constant 32 : index
    %34 = vector.load %arg1[%c0_44, %c0_45, %c1_46, %c0_47, %c32_48] : memref<1x2x2x9x64xbf16, #tpu.memory_space<vmem>>, vector<1x1x1x8x32xbf16>
    %35 = vector.shape_cast %34 : vector<1x1x1x8x32xbf16> to vector<1x1x8x32xbf16>
    %36 = vector.shape_cast %35 : vector<1x1x8x32xbf16> to vector<8x32xbf16>
    %c4 = arith.constant 4 : index
    %c0_49 = arith.constant 0 : index
    %c0_50 = arith.constant 0 : index
    %37 = vector.load %arg2[%c4, %c0_49, %c0_50] : memref<9x32x32xbf16, #tpu.memory_space<vmem>>, vector<1x32x32xbf16>
    %38 = vector.shape_cast %37 : vector<1x32x32xbf16> to vector<32x32xbf16>
    %cst_51 = arith.constant dense<0.000000e+00> : vector<8x32xf32>
    %39 = tpu.matmul %36, %38, %cst_51 {dimension_numbers = #tpu.dot_dimension_numbers<[1], [0], [0], [1], [0, 0, 1, 1], [], []>} : vector<8x32xbf16>, vector<32x32xbf16>, vector<8x32xf32> -> vector<8x32xf32>
    %c0_52 = arith.constant 0 : index
    %c0_53 = arith.constant 0 : index
    %40 = vector.load %arg7[%c0_52, %c0_53] : memref<8x32xf32, #tpu.memory_space<vmem>>, vector<8x32xf32>
    %41 = arith.addf %40, %39 : vector<8x32xf32>
    %c0_54 = arith.constant 0 : index
    %c0_55 = arith.constant 0 : index
    %42 = vector.load %arg7[%c0_54, %c0_55] : memref<8x32xf32, #tpu.memory_space<vmem>>, vector<8x32xf32>
    tpu.vector_store %arg7[%c0_54, %c0_55], %41 {strides = array<i32>} : memref<8x32xf32, #tpu.memory_space<vmem>>, vector<8x32xf32>,
    %c0_56 = arith.constant 0 : index
    %c0_57 = arith.constant 0 : index
    %c1_58 = arith.constant 1 : index
    %c1_59 = arith.constant 1 : index
    %c0_60 = arith.constant 0 : index
    %43 = vector.load %arg1[%c0_56, %c0_57, %c1_58, %c1_59, %c0_60] : memref<1x2x2x9x64xbf16, #tpu.memory_space<vmem>>, vector<1x1x1x8x32xbf16>
    %44 = vector.shape_cast %43 : vector<1x1x1x8x32xbf16> to vector<1x1x8x32xbf16>
    %45 = vector.shape_cast %44 : vector<1x1x8x32xbf16> to vector<8x32xbf16>
    %c5 = arith.constant 5 : index
    %c0_61 = arith.constant 0 : index
    %c0_62 = arith.constant 0 : index
    %46 = vector.load %arg2[%c5, %c0_61, %c0_62] : memref<9x32x32xbf16, #tpu.memory_space<vmem>>, vector<1x32x32xbf16>
    %47 = vector.shape_cast %46 : vector<1x32x32xbf16> to vector<32x32xbf16>
    %cst_63 = arith.constant dense<0.000000e+00> : vector<8x32xf32>
    %48 = tpu.matmul %45, %47, %cst_63 {dimension_numbers = #tpu.dot_dimension_numbers<[1], [0], [0], [1], [0, 0, 1, 1], [], []>} : vector<8x32xbf16>, vector<32x32xbf16>, vector<8x32xf32> -> vector<8x32xf32>
    %c0_64 = arith.constant 0 : index
    %c0_65 = arith.constant 0 : index
    %49 = vector.load %arg7[%c0_64, %c0_65] : memref<8x32xf32, #tpu.memory_space<vmem>>, vector<8x32xf32>
    %50 = arith.addf %49, %48 : vector<8x32xf32>
    %c0_66 = arith.constant 0 : index
    %c0_67 = arith.constant 0 : index
    %51 = vector.load %arg7[%c0_66, %c0_67] : memref<8x32xf32, #tpu.memory_space<vmem>>, vector<8x32xf32>
    tpu.vector_store %arg7[%c0_66, %c0_67], %50 {strides = array<i32>} : memref<8x32xf32, #tpu.memory_space<vmem>>, vector<8x32xf32>,
    %c0_68 = arith.constant 0 : index
    %c1_69 = arith.constant 1 : index
    %c0_70 = arith.constant 0 : index
    %c0_71 = arith.constant 0 : index
    %c0_72 = arith.constant 0 : index
    %52 = vector.load %arg1[%c0_68, %c1_69, %c0_70, %c0_71, %c0_72] : memref<1x2x2x9x64xbf16, #tpu.memory_space<vmem>>, vector<1x1x1x8x32xbf16>
    %53 = vector.shape_cast %52 : vector<1x1x1x8x32xbf16> to vector<1x1x8x32xbf16>
    %54 = vector.shape_cast %53 : vector<1x1x8x32xbf16> to vector<8x32xbf16>
    %c6 = arith.constant 6 : index
    %c0_73 = arith.constant 0 : index
    %c0_74 = arith.constant 0 : index
    %55 = vector.load %arg2[%c6, %c0_73, %c0_74] : memref<9x32x32xbf16, #tpu.memory_space<vmem>>, vector<1x32x32xbf16>
    %56 = vector.shape_cast %55 : vector<1x32x32xbf16> to vector<32x32xbf16>
    %cst_75 = arith.constant dense<0.000000e+00> : vector<8x32xf32>
    %57 = tpu.matmul %54, %56, %cst_75 {dimension_numbers = #tpu.dot_dimension_numbers<[1], [0], [0], [1], [0, 0, 1, 1], [], []>} : vector<8x32xbf16>, vector<32x32xbf16>, vector<8x32xf32> -> vector<8x32xf32>
    %c0_76 = arith.constant 0 : index
    %c0_77 = arith.constant 0 : index
    %58 = vector.load %arg7[%c0_76, %c0_77] : memref<8x32xf32, #tpu.memory_space<vmem>>, vector<8x32xf32>
    %59 = arith.addf %58, %57 : vector<8x32xf32>
    %c0_78 = arith.constant 0 : index
    %c0_79 = arith.constant 0 : index
    %60 = vector.load %arg7[%c0_78, %c0_79] : memref<8x32xf32, #tpu.memory_space<vmem>>, vector<8x32xf32>
    tpu.vector_store %arg7[%c0_78, %c0_79], %59 {strides = array<i32>} : memref<8x32xf32, #tpu.memory_space<vmem>>, vector<8x32xf32>,
    %c0_80 = arith.constant 0 : index
    %c1_81 = arith.constant 1 : index
    %c0_82 = arith.constant 0 : index
    %c0_83 = arith.constant 0 : index
    %c32_84 = arith.constant 32 : index
    %61 = vector.load %arg1[%c0_80, %c1_81, %c0_82, %c0_83, %c32_84] : memref<1x2x2x9x64xbf16, #tpu.memory_space<vmem>>, vector<1x1x1x8x32xbf16>
    %62 = vector.shape_cast %61 : vector<1x1x1x8x32xbf16> to vector<1x1x8x32xbf16>
    %63 = vector.shape_cast %62 : vector<1x1x8x32xbf16> to vector<8x32xbf16>
    %c7 = arith.constant 7 : index
    %c0_85 = arith.constant 0 : index
    %c0_86 = arith.constant 0 : index
    %64 = vector.load %arg2[%c7, %c0_85, %c0_86] : memref<9x32x32xbf16, #tpu.memory_space<vmem>>, vector<1x32x32xbf16>
    %65 = vector.shape_cast %64 : vector<1x32x32xbf16> to vector<32x32xbf16>
    %cst_87 = arith.constant dense<0.000000e+00> : vector<8x32xf32>
    %66 = tpu.matmul %63, %65, %cst_87 {dimension_numbers = #tpu.dot_dimension_numbers<[1], [0], [0], [1], [0, 0, 1, 1], [], []>} : vector<8x32xbf16>, vector<32x32xbf16>, vector<8x32xf32> -> vector<8x32xf32>
    %c0_88 = arith.constant 0 : index
    %c0_89 = arith.constant 0 : index
    %67 = vector.load %arg7[%c0_88, %c0_89] : memref<8x32xf32, #tpu.memory_space<vmem>>, vector<8x32xf32>
    %68 = arith.addf %67, %66 : vector<8x32xf32>
    %c0_90 = arith.constant 0 : index
    %c0_91 = arith.constant 0 : index
    %69 = vector.load %arg7[%c0_90, %c0_91] : memref<8x32xf32, #tpu.memory_space<vmem>>, vector<8x32xf32>
    tpu.vector_store %arg7[%c0_90, %c0_91], %68 {strides = array<i32>} : memref<8x32xf32, #tpu.memory_space<vmem>>, vector<8x32xf32>,
    %c0_92 = arith.constant 0 : index
    %c1_93 = arith.constant 1 : index
    %c0_94 = arith.constant 0 : index
    %c1_95 = arith.constant 1 : index
    %c0_96 = arith.constant 0 : index
    %70 = vector.load %arg1[%c0_92, %c1_93, %c0_94, %c1_95, %c0_96] : memref<1x2x2x9x64xbf16, #tpu.memory_space<vmem>>, vector<1x1x1x8x32xbf16>
    %71 = vector.shape_cast %70 : vector<1x1x1x8x32xbf16> to vector<1x1x8x32xbf16>
    %72 = vector.shape_cast %71 : vector<1x1x8x32xbf16> to vector<8x32xbf16>
    %c8 = arith.constant 8 : index
    %c0_97 = arith.constant 0 : index
    %c0_98 = arith.constant 0 : index
    %73 = vector.load %arg2[%c8, %c0_97, %c0_98] : memref<9x32x32xbf16, #tpu.memory_space<vmem>>, vector<1x32x32xbf16>
    %74 = vector.shape_cast %73 : vector<1x32x32xbf16> to vector<32x32xbf16>
    %cst_99 = arith.constant dense<0.000000e+00> : vector<8x32xf32>
    %75 = tpu.matmul %72, %74, %cst_99 {dimension_numbers = #tpu.dot_dimension_numbers<[1], [0], [0], [1], [0, 0, 1, 1], [], []>} : vector<8x32xbf16>, vector<32x32xbf16>, vector<8x32xf32> -> vector<8x32xf32>
    %c0_100 = arith.constant 0 : index
    %c0_101 = arith.constant 0 : index
    %76 = vector.load %arg7[%c0_100, %c0_101] : memref<8x32xf32, #tpu.memory_space<vmem>>, vector<8x32xf32>
    %77 = arith.addf %76, %75 : vector<8x32xf32>
    %c0_102 = arith.constant 0 : index
    %c0_103 = arith.constant 0 : index
    %78 = vector.load %arg7[%c0_102, %c0_103] : memref<8x32xf32, #tpu.memory_space<vmem>>, vector<8x32xf32>
    tpu.vector_store %arg7[%c0_102, %c0_103], %77 {strides = array<i32>} : memref<8x32xf32, #tpu.memory_space<vmem>>, vector<8x32xf32>,
    %c0_104 = arith.constant 0 : index
    %c0_105 = arith.constant 0 : index
    %79 = vector.load %arg7[%c0_104, %c0_105] : memref<8x32xf32, #tpu.memory_space<vmem>>, vector<8x32xf32>
    %c0_106 = arith.constant 0 : index
    %c0_107 = arith.constant 0 : index
    %80 = vector.load %arg3[%c0_106, %c0_107] : memref<1x32xf32, #tpu.memory_space<vmem>>, vector<1x32xf32>
    %81 = vector.broadcast %80 : vector<1x32xf32> to vector<8x32xf32>
    %82 = arith.addf %79, %81 : vector<8x32xf32>
    %cst_108 = arith.constant 0.000000e+00 : f32
    %83 = vector.broadcast %cst_108 : f32 to vector<8x32xf32>
    %84 = arith.cmpf oge, %82, %83 : vector<8x32xf32>
    %cst_109 = arith.constant 0.00999999977 : f32
    %85 = vector.broadcast %cst_109 : f32 to vector<8x32xf32>
    %86 = arith.mulf %85, %82 : vector<8x32xf32>
    %87 = arith.select %84, %82, %86 : vector<8x32xi1>, vector<8x32xf32>
    %88 = vector.extract_strided_slice %87 {offsets = [0, 0], sizes = [1, 32], strides = [1, 1]} : vector<8x32xf32> to vector<1x32xf32>
    %89 = arith.truncf %88 : vector<1x32xf32> to vector<1x32xbf16>
    %c0_110 = arith.constant 0 : index
    %c0_111 = arith.constant 0 : index
    %90 = vector.load %arg4[%c0_110, %c0_111] : memref<32x32xbf16, #tpu.memory_space<vmem>>, vector<32x32xbf16>
    %cst_112 = arith.constant dense<0.000000e+00> : vector<1x32xf32>
    %91 = tpu.matmul %89, %90, %cst_112 {dimension_numbers = #tpu.dot_dimension_numbers<[1], [0], [0], [1], [0, 0, 1, 1], [], []>} : vector<1x32xbf16>, vector<32x32xbf16>, vector<1x32xf32> -> vector<1x32xf32>
    %c0_113 = arith.constant 0 : index
    %c0_114 = arith.constant 0 : index
    %92 = vector.load %arg5[%c0_113, %c0_114] : memref<1x32xf32, #tpu.memory_space<vmem>>, vector<1x32xf32>
    %93 = arith.addf %91, %92 : vector<1x32xf32>
    %c0_115 = arith.constant 0 : index
    %c0_116 = arith.constant 0 : index
    %c0_117 = arith.constant 0 : index
    %94 = vector.load %arg6[%c0_115, %c0_116, %c0_117] : memref<1x1x32xf32, #tpu.memory_space<vmem>>, vector<1x1x32xf32>
    %95 = vector.shape_cast %94 : vector<1x1x32xf32> to vector<1x32xf32>
    %96 = vector.shape_cast %93 : vector<1x32xf32> to vector<1x1x32xf32>
    tpu.vector_store %arg6[%c0_115, %c0_116, %c0_117], %96 {strides = array<i32>} : memref<1x1x32xf32, #tpu.memory_space<vmem>>, vector<1x1x32xf32>,
    return
  }
  func.func @transform_0(%arg0: i32) -> (i32, i32, i32, i32, i32) {
    %c0_i32 = arith.constant 0 : i32
    %c0_i32_0 = arith.constant 0 : i32
    %c0_i32_1 = arith.constant 0 : i32
    %c0_i32_2 = arith.constant 0 : i32
    %c0_i32_3 = arith.constant 0 : i32
    return %arg0, %c0_i32, %c0_i32_0, %c0_i32_1, %c0_i32_2 : i32, i32, i32, i32, i32
  }
  func.func @transform_1(%arg0: i32) -> (i32, i32, i32) {
    %c0_i32 = arith.constant 0 : i32
    %c0_i32_0 = arith.constant 0 : i32
    %c0_i32_1 = arith.constant 0 : i32
    %c0_i32_2 = arith.constant 0 : i32
    return %c0_i32, %c0_i32_0, %c0_i32_1 : i32, i32, i32
  }
  func.func @transform_2(%arg0: i32) -> (i32, i32) {
    %c0_i32 = arith.constant 0 : i32
    %c0_i32_0 = arith.constant 0 : i32
    %c0_i32_1 = arith.constant 0 : i32
    return %c0_i32, %c0_i32_0 : i32, i32
  }
  func.func @transform_3(%arg0: i32) -> (i32, i32) {
    %c0_i32 = arith.constant 0 : i32
    %c0_i32_0 = arith.constant 0 : i32
    %c0_i32_1 = arith.constant 0 : i32
    return %c0_i32, %c0_i32_0 : i32, i32
  }
  func.func @transform_4(%arg0: i32) -> (i32, i32) {
    %c0_i32 = arith.constant 0 : i32
    %c0_i32_0 = arith.constant 0 : i32
    %c0_i32_1 = arith.constant 0 : i32
    return %c0_i32, %c0_i32_0 : i32, i32
  }
  func.func @transform_5(%arg0: i32) -> (i32, i32, i32) {
    %c0_i32 = arith.constant 0 : i32
    %c0_i32_0 = arith.constant 0 : i32
    %c0_i32_1 = arith.constant 0 : i32
    return %arg0, %c0_i32, %c0_i32_0 : i32, i32, i32
  }
}

</mosaic_0001>

<bundles_post_ra>
// kernel: gradual_style_block_forward.5
= control target key start
LH: loop header
LB: loop body
LE: loop exit
PB: predicated region body
PF: predicated region fallthrough
CT: control target
= control target key end

     0   :  { %s1334_s12 = smov 0   ;;  %s1561_s0 = inlined_call_operand.vmem [shape: bf16[2,5,2,9,64], index: 0, kind: input, shape index: {}]   ;;  %s1562_s1 = inlined_call_operand.vmem [shape: bf16[9,32,32], index: 1, kind: input, shape index: {}]   ;;  %s1563_s2 = inlined_call_operand.vmem [shape: f32[1,32], index: 2, kind: input, shape index: {}]   ;;  %s1564_s3 = inlined_call_operand.vmem [shape: bf16[2,32,32], index: 3, kind: output, shape index: {}]  }
   0x1 LB: > { %s1049_s13 = sadd.s32 4294967295, %s1311_s12   ;;  %p1053_p0 = scmp.ge.s32.totalorder %s1311_s12, 1  ;;  %s1311_s12 = sphi %s1334_s12, %s13_s12  }
   0x2   : > { %p137_p1 = scmp.lt.s32.totalorder %s1311_s12, 3 }
   0x4   : > { %p138_p2 = pnand %p1053_p0, %p137_p1 }
   0x5   : > { %p161_p3 = scmp.lt.s32.totalorder (!%p138_p2), %s1049_s13, 1  ;;  %s1313_s5 = smov (!%p138_p2), 96  }
   0x6   : > { %141 = sbr.rel (%p138_p2) target bundleno = 371 (0x173), region = 32 }
   0xb   : > { %v1265_v0 = vld [vmem:[%s1562_s1 + $0x8] sm:$0xff]  ;;  %s1568_s13 = smov (!%p161_p3, %s1049_s13), 1  ;;  %v1264_v2 = vld [vmem:[%s1562_s1] sm:$0xff]  ;;  %v1275_v3 = vld [vmem:[%s1562_s1 + $0x38] sm:$0xff]  ;;  %vm202_vm0 = vcmask 261120   ;;  %vm989_vm5 = vcmask 257024  }
   0xc   : > { %v1271_v1 = vld [vmem:[%s1562_s1 + $0x28] sm:$0xff]  ;;  %1292 = vmatpush.bf16.msra.mxu1 %v1265_v0  ;;  %215 = vmatpush.bf16.msra.mxu0 %v1265_v0  ;;  %v1269_v4 = vld [vmem:[%s1562_s1 + $0x18] sm:$0xff]  ;;  %v1270_v5 = vld [vmem:[%s1562_s1 + $0x20] sm:$0xff]  ;;  %s1294_s26 = smul.u32 80, %s1568_s13  ;;  %vm312_vm1 = vsmask.f32 3328 }
   0xd   : > { %406 = vmatpush.bf16.msra.mxu2 %v1271_v1  ;;  %475 = vmatpush.bf16.msra.mxu3 %v1275_v3  ;;  %v1268_v8 = vld [vmem:[%s1562_s1 + $0x10] sm:$0xff]  ;;  %vm313_vm2 = vsmask.f32 7440  ;;  %v1281_v3 = vld [vmem:[%s1562_s1 + $0x58] sm:$0xff] }
   0xe   : > { %s1366_s29 = scalar_lea.vmem %s1561_s0, %s1294_s26  ;;  %vm1398_vm3 = vmor %vm312_vm1, %vm313_vm2  ;;  %v1274_v63 = vld [vmem:[%s1562_s1 + $0x30] sm:$0xff] }
   0xf   : > { %v1081_v6 = vld [vmem:[%s1366_s29] sm:$0xf]  ;;  %v1266_v7 = vld [vmem:[%s1366_s29 + $0xc] sm:$0xf0]  ;;  %v1147_v10 = vld [vmem:[%s1366_s29 + $0x8] sm:$0xf] }
  0x10   : > { %1293 = vmatpush.bf16.msra.mxu1 %v1264_v2  ;;  %216 = vmatpush.bf16.msra.mxu0 %v1264_v2  ;;  %v1082_v9 = vor.u32 %v1266_v7, %v1081_v6  ;;  %v1276_v11 = vld [vmem:[%s1366_s29 + $0x14] sm:$0xf0]  ;;  %v1085_v12 = vld [vmem:[%s1366_s29 + $0x20] sm:$0xf]  ;;  %v1267_v13 = vld [vmem:[%s1366_s29 + $0x2c] sm:$0xf0] }
  0x11   : > { %407 = vmatpush.bf16.msra.mxu2 %v1270_v5  ;;  %v1148_v14 = vor.u32 %v1276_v11, %v1147_v10  ;;  %v1221_v15 = vld [vmem:[%s1366_s29 + $0x10] sm:$0xf]  ;;  %v1151_v16 = vld [vmem:[%s1366_s29 + $0x28] sm:$0xf]  ;;  %v1277_v17 = vld [vmem:[%s1366_s29 + $0x34] sm:$0xf0]  ;;  %v1086_v28 = vor.u32 %v1267_v13, %v1085_v12  ;;  %476 = vmatpush.bf16.msra.mxu3 %v1274_v63 }
  0x12   : > { %251 = vrot.lane.b32.xlu0 %v1082_v9, %s1313_s5  ;;  %v1286_v18 = vld [vmem:[%s1366_s29 + $0x1c] sm:$0xf0]  ;;  %v1263_v21 = vld [vmem:[%s1366_s29 + $0x2c] sm:$0xf0]  ;;  %v305_v27 = vld [vmem:[%s1366_s29 + $0x4] sm:$0x1]  ;;  %v1152_v39 = vor.u32 %v1277_v17, %v1151_v16 }
  0x13   : > { %519 = vrot.lane.b32.xlu1 %v1148_v14, %s1313_s5  ;;  %v1222_v19 = vor.u32 %v1286_v18, %v1221_v15  ;;  %v1063_v20 = vld [vmem:[%s1366_s29 + $0x20] sm:$0xf]  ;;  %v1225_v23 = vld [vmem:[%s1366_s29 + $0x30] sm:$0xf]  ;;  %v307_v31 = vld [vmem:[%s1366_s29 + $0x14] sm:$0x1] }
  0x14   : > { %279 = vmatpush.bf16.msrb.mxu1 %v1269_v4  ;;  %v1059_v22 = vld [vmem:[%s1366_s29] sm:$0xf]  ;;  %v1064_v24 = vor.u32 %v1263_v21, %v1063_v20  ;;  %v1262_v25 = vld [vmem:[%s1366_s29 + $0xc] sm:$0xf0]  ;;  %v325_v35 = vshll.u32 %v305_v27, 16  ;;  %v339_v38 = vshll.u32 %v307_v31, 16 }
  0x15   : > { %v304_v26 = vld [vmem:[%s1366_s29] sm:$0xf]  ;;  %784 = vrot.lane.b32.xlu2 %v1222_v19, %s1313_s5  ;;  %v1060_v29 = vor.u32 %v1262_v25, %v1059_v22  ;;  %v306_v30 = vld [vmem:[%s1366_s29 + $0x10] sm:$0xf]  ;;  %v1121_v0 = vld [vmem:[%s1366_s29 + $0x8] sm:$0xf] }
  0x16   : > { %v316_v32 = vshrl.u32 %v304_v26, 16  ;;  %v319_v33 = vshll.u32 %v304_v26, 16  ;;  %v1287_v34 = vld [vmem:[%s1366_s29 + $0x3c] sm:$0xf0]  ;;  %1074 = vmatmul.msk.bf16.vlgmr.msra.gmra.mxu1 %vm202_vm0, %v1064_v24  ;;  %v330_v36 = vshrl.u32 %v306_v30, 16  ;;  %v333_v37 = vshll.u32 %v306_v30, 16 }
  0x17   : > { %1073 = vmatmul.msk.bf16.vlgmr.msra.gmra.mxu0 %vm202_vm0, %v1060_v29  ;;  %v1226_v44 = vor.u32 %v1287_v34, %v1225_v23  ;;  %v327_v46 = vrot.slane %v325_v35, 5  ;;  %v341_v49 = vrot.slane %v339_v38, 5  ;;  %v308_v57 = vld [vmem:[%s1366_s29 + $0x20] sm:$0xf]  ;;  %v310_v58 = vld [vmem:[%s1366_s29 + $0x30] sm:$0xf] }
  0x18   : > { %280 = vmatpush.bf16.msrb.mxu1 %v1268_v8  ;;  %v318_v40 = vrot.slane %v316_v32, 4  ;;  %v321_v41 = vrot.slane %v319_v33, 5  ;;  %v332_v42 = vrot.slane %v330_v36, 4  ;;  %v335_v43 = vrot.slane %v333_v37, 5  ;;  %v1272_v1 = vld [vmem:[%s1366_s29 + $0x14] sm:$0xf0] }
  0x19   : > { %v344_v59 = vshrl.u32 %v308_v57, 16  ;;  %v347_v60 = vshll.u32 %v308_v57, 16  ;;  %v358_v61 = vshrl.u32 %v310_v58, 16  ;;  %v361_v62 = vshll.u32 %v310_v58, 16  ;;  %v309_v4 = vld [vmem:[%s1366_s29 + $0x24] sm:$0x1] }
  0x1a   : > { %v322_v45 = vor.u32 %v321_v41, %v318_v40  ;;  %253 = vrot.lane.b32.xlu0 %v1086_v28, %s1313_s5  ;;  %v336_v48 = vor.u32 %v335_v43, %v332_v42  ;;  %v1122_v2 = vor.u32 %v1272_v1, %v1121_v0  ;;  %v311_v5 = vld [vmem:[%s1366_s29 + $0x34] sm:$0x1]  ;;  %v353_v8 = vshll.u32 %v309_v4, 16  ;;  %v1285_v11 = vld [vmem:[%s1562_s1 + $0x68] sm:$0xff]  ;;  %v1278_v25 = vld [vmem:[%s1562_s1 + $0x40] sm:$0xff] }
  0x1b   : > { %521 = vrot.lane.b32.xlu1 %v1152_v39, %s1313_s5  ;;  %v346_v6 = vrot.slane %v344_v59, 4  ;;  %v349_v7 = vrot.slane %v347_v60, 5  ;;  %v360_v9 = vrot.slane %v358_v61, 4  ;;  %v363_v10 = vrot.slane %v361_v62, 5  ;;  %v1279_v12 = vld [vmem:[%s1562_s1 + $0x48] sm:$0xff]  ;;  %740 = vmatpush.bf16.msrb.mxu2 %v1285_v11  ;;  %v1289_v29 = vld [vmem:[%s1562_s1 + $0x78] sm:$0xff] }
  0x1c   : > { %v323_v50 = vrot.slane %v322_v45, 4  ;;  %v337_v51 = vrot.slane %v336_v48, 4  ;;  %671 = vmatpush.bf16.msra.mxu1 %v1281_v3  ;;  %v367_v13 = vshll.u32 %v311_v5, 16  ;;  %v355_v15 = vrot.slane %v353_v8, 5  ;;  %547 = vmatpush.bf16.msrb.mxu0 %v1279_v12  ;;  %v1125_v26 = vld [vmem:[%s1366_s29 + $0x28] sm:$0xf] }
  0x1d   : > { %786 = vrot.lane.b32.xlu2 %v1226_v44, %s1313_s5  ;;  %v350_v14 = vor.u32 %v349_v7, %v346_v6  ;;  %v364_v16 = vor.u32 %v363_v10, %v360_v9  ;;  %1135 = vmatmul.msk.bf16.vlgmr.msra.gmra.mxu3 %vm202_vm0, %v1122_v2  ;;  %v1273_v27 = vld [vmem:[%s1366_s29 + $0x34] sm:$0xf0]  ;;  %v1280_v30 = vld [vmem:[%s1562_s1 + $0x50] sm:$0xff]  ;;  %v1284_v31 = vld [vmem:[%s1562_s1 + $0x60] sm:$0xff]  ;;  %s1261_s5 = sshll.u32 %s1568_s13, 4 }
  0x1e   : > { %v328_v52 = vsel %vm1398_vm3, %v323_v50, %v327_v46  ;;  %v342_v53 = vsel %vm1398_vm3, %v337_v51, %v341_v49  ;;  %v369_v17 = vrot.slane %v367_v13, 5  ;;  %v1126_v28 = vor.u32 %v1273_v27, %v1125_v26  ;;  %812 = vmatpush.bf16.msrb.mxu3 %v1289_v29  ;;  %v1163_v32 = vld [vmem:[%s1366_s29 + $0x8] sm:$0xf]  ;;  %v1165_v33 = vld [vmem:[%s1366_s29 + $0x18] sm:$0xf]  ;;  %v1288_v39 = vld [vmem:[%s1562_s1 + $0x70] sm:$0xff]  ;;  %s1545_s8 = scalar_lea.vmem %s1564_s3, %s1261_s5 }
  0x1f   : > { %v376_v54 = vunpack.c.l.b16 %v328_v52  ;;  %v377_v55 = vunpack.c.l.b16 %v342_v53  ;;  %v351_v18 = vrot.slane %v350_v14, 4  ;;  %v365_v19 = vrot.slane %v364_v16, 4  ;;  %741 = vmatpush.bf16.msrb.mxu2 %v1284_v31  ;;  %v1195_v37 = vld [vmem:[%s1366_s29 + $0x10] sm:$0xf]  ;;  %v1282_v38 = vld [vmem:[%s1366_s29 + $0x1c] sm:$0xf0] }
  0x20   : > { %548 = vmatpush.bf16.msrb.mxu0 %v1278_v25  ;;  %672 = vmatpush.bf16.msra.mxu1 %v1280_v30  ;;  %v581_v36 = vshrl.u32 %v1163_v32, 16  ;;  %v584_v40 = vshll.u32 %v1163_v32, 16  ;;  %v595_v41 = vshrl.u32 %v1165_v33, 16  ;;  %v598_v42 = vshll.u32 %v1165_v33, 16  ;;  %v1291_v44 = vld [vmem:[%s1562_s1 + $0x88] sm:$0xff]  ;;  %v1290_v3 = vld [vmem:[%s1562_s1 + $0x80] sm:$0xff] }
  0x21   : > { %v380_v56 = vpack.c.b16 %v377_v55, %v376_v54  ;;  %v356_v20 = vsel %vm1398_vm3, %v351_v18, %v355_v15  ;;  %v370_v21 = vsel %vm1398_vm3, %v365_v19, %v369_v17  ;;  %v1196_v43 = vor.u32 %v1282_v38, %v1195_v37  ;;  %v1164_v51 = vld [vmem:[%s1366_s29 + $0xc] sm:$0x1]  ;;  %v1166_v52 = vld [vmem:[%s1366_s29 + $0x1c] sm:$0x1]  ;;  %v1167_v63 = vld [vmem:[%s1366_s29 + $0x28] sm:$0xf] }
  0x22   : > { %v378_v22 = vunpack.c.l.b16 %v356_v20  ;;  %v379_v23 = vunpack.c.l.b16 %v370_v21  ;;  %813 = vmatpush.bf16.msrb.mxu3 %v1288_v39  ;;  %v583_v46 = vrot.slane %v581_v36, 4  ;;  %v586_v48 = vrot.slane %v584_v40, 5  ;;  %v1169_v0 = vld [vmem:[%s1366_s29 + $0x38] sm:$0xf]  ;;  %v1199_v1 = vld [vmem:[%s1366_s29 + $0x30] sm:$0xf] }
  0x23   : > { %1109 = vmatmul.msk.bf16.vlgmr.msra.gmra.mxu2 %vm202_vm0, %v380_v56  ;;  %v597_v49 = vrot.slane %v595_v41, 4  ;;  %v600_v50 = vrot.slane %v598_v42, 5  ;;  %v590_v54 = vshll.u32 %v1164_v51, 16  ;;  %v604_v56 = vshll.u32 %v1166_v52, 16  ;;  %v1283_v2 = vld [vmem:[%s1366_s29 + $0x3c] sm:$0xf0] }
  0x24   : > { %v381_v24 = vpack.c.b16 %v379_v23, %v378_v22  ;;  %936 = vmatpush.bf16.msra.mxu0 %v1291_v44  ;;  %v587_v53 = vor.u32 %v586_v48, %v583_v46  ;;  %v1200_v6 = vor.u32 %v1283_v2, %v1199_v1  ;;  %v1237_v7 = vld [vmem:[%s1366_s29 + $0x10] sm:$0xf]  ;;  %v1238_v8 = vld [vmem:[%s1366_s29 + $0x14] sm:$0x1]  ;;  %v1239_v9 = vld [vmem:[%s1366_s29 + $0x20] sm:$0xf] }
  0x25   : > { %v601_v55 = vor.u32 %v600_v50, %v597_v49  ;;  %v592_v59 = vrot.slane %v590_v54, 5  ;;  %v606_v61 = vrot.slane %v604_v56, 5  ;;  %v1240_v13 = vld [vmem:[%s1366_s29 + $0x24] sm:$0x1]  ;;  %v846_v14 = vshrl.u32 %v1237_v7, 16 }
  0x26   : > { %v588_v58 = vrot.slane %v587_v53, 4  ;;  %v849_v15 = vshll.u32 %v1237_v7, 16  ;;  %v855_v16 = vshll.u32 %v1238_v8, 16  ;;  %v860_v17 = vshrl.u32 %v1239_v9, 16  ;;  %v1241_v22 = vld [vmem:[%s1366_s29 + $0x30] sm:$0xf] }
  0x27   : > { %v602_v60 = vrot.slane %v601_v55, 4  ;;  %v609_v18 = vshrl.u32 %v1167_v63, 16  ;;  %v612_v19 = vshll.u32 %v1167_v63, 16  ;;  %v863_v20 = vshll.u32 %v1239_v9, 16  ;;  %v1243_v27 = vld [vmem:[%s1366_s29 + $0x40] sm:$0xf] }
  0x28   : > { %v593_v4 = vsel %vm1398_vm3, %v588_v58, %v592_v59  ;;  %937 = vmatpush.bf16.msra.mxu0 %v1290_v3  ;;  %v869_v21 = vshll.u32 %v1240_v13, 16  ;;  %v623_v23 = vshrl.u32 %v1169_v0, 16  ;;  %v851_v25 = vrot.slane %v849_v15, 5  ;;  %v1168_v40 = vld [vmem:[%s1366_s29 + $0x2c] sm:$0x1] }
  0x29   : > { %v607_v5 = vsel %vm1398_vm3, %v602_v60, %v606_v61  ;;  %v862_v26 = vrot.slane %v860_v17, 4  ;;  %v857_v29 = vrot.slane %v855_v16, 5  ;;  %v865_v30 = vrot.slane %v863_v20, 5  ;;  %v1170_v44 = vld [vmem:[%s1366_s29 + $0x3c] sm:$0x1] }
  0x2a   : > { %v874_v31 = vshrl.u32 %v1241_v22, 16  ;;  %v877_v33 = vshll.u32 %v1241_v22, 16  ;;  %v641_v36 = vunpack.c.l.b16 %v593_v4  ;;  %v871_v38 = vrot.slane %v869_v21, 5  ;;  %v1242_v53 = vld [vmem:[%s1366_s29 + $0x34] sm:$0x1] }
  0x2b   : > { %v866_v37 = vor.u32 %v865_v30, %v862_v26  ;;  %v642_v39 = vunpack.c.l.b16 %v607_v5  ;;  %v611_v41 = vrot.slane %v609_v18, 4  ;;  %v614_v42 = vrot.slane %v612_v19, 5  ;;  %v1244_v59 = vld [vmem:[%s1366_s29 + $0x44] sm:$0x1] }
  0x2c   : > { %v876_v49 = vrot.slane %v874_v31, 4  ;;  %v879_v54 = vrot.slane %v877_v33, 5  ;;  %v618_v61 = vshll.u32 %v1168_v40, 16  ;;  %v632_v1 = vshll.u32 %v1170_v44, 16 }
  0x2d   : > { %1136 = vmatmul.msk.bf16.gmra.mxu3 %vm202_vm0, %v1126_v28  ;;  %v626_v28 = vshll.u32 %v1169_v0, 16  ;;  %v867_v48 = vrot.slane %v866_v37, 4  ;;  %v645_v60 = vpack.c.b16 %v642_v39, %v641_v36  ;;  %v615_v63 = vor.u32 %v614_v42, %v611_v41 }
  0x2e   : > { %v883_v2 = vshll.u32 %v1242_v53, 16  ;;  %v880_v4 = vor.u32 %v879_v54, %v876_v49  ;;  %v620_v8 = vrot.slane %v618_v61, 5 }
  0x2f   : > { %v628_v46 = vrot.slane %v626_v28, 5  ;;  %v616_v7 = vrot.slane %v615_v63, 4 }
  0x31   : > { %v621_v15 = vsel %vm1398_vm3, %v616_v7, %v620_v8 }
  0x32   : > { %v643_v19 = vunpack.c.l.b16 %v621_v15 }
  0x33   : > { %1110 = vmatmul.msk.bf16.gmra.mxu2 %vm202_vm0, %v381_v24  ;;  %v848_v24 = vrot.slane %v846_v14, 4 }
  0x35   : > { %v852_v32 = vor.u32 %v851_v25, %v848_v24 }
  0x43   : > { %1209 = vmatmul.msk.bf16.vlgmr.msrb.gmra.mxu2 %vm202_vm0, %v1196_v43  ;;  %v853_v43 = vrot.slane %v852_v32, 4 }
  0x45   : > { %v858_v52 = vsel %vm1398_vm3, %v853_v43, %v857_v29 }
  0x46   : > { %v906_v58 = vunpack.c.l.b16 %v858_v52 }
  0x53   : > { %1210 = vmatmul.msk.bf16.gmra.mxu2 %vm202_vm0, %v1200_v6  ;;  %v897_v6 = vshll.u32 %v1244_v59, 16 }
  0x55   : > { %v899_v14 = vrot.slane %v897_v6, 5 }
  0x6f   : > { %v785_v45 = vpop.permute.xlu2 %784 }
  0x70   : > { %1235 = vmatmul.msk.bf16.vlgmr.msrb.gmra.mxu3 %vm202_vm0, %v785_v45  ;;  %v625_v45 = vrot.slane %v623_v23, 4 }
  0x72   : > { %v629_v0 = vor.u32 %v628_v46, %v625_v45 }
  0x74   : > { %v630_v9 = vrot.slane %v629_v0, 4 }
  0x77   : > { %v787_v12 = vpop.permute.xlu2 %786 }
  0x80   : > { %1236 = vmatmul.msk.bf16.gmra.mxu3 %vm202_vm0, %v787_v12  ;;  %v885_v12 = vrot.slane %v883_v2, 5 }
  0x84   : > { %v252_v34 = vpop.permute.xlu0 %251 }
  0x85   : > { %1095 = vmatmul.msk.bf16.vlgmr.msrb.gmra.mxu1 %vm202_vm0, %v252_v34  ;;  %v520_v35 = vpop.permute.xlu1 %519  ;;  %v888_v34 = vshrl.u32 %v1243_v27, 16 }
  0x86   : > { %1161 = vmatmul.msk.bf16.vlgmr.msrb.gmra.mxu0 %vm202_vm0, %v520_v35  ;;  %v891_v35 = vshll.u32 %v1243_v27, 16 }
  0x87   : > { %v890_v55 = vrot.slane %v888_v34, 4 }
  0x88   : > { %v893_v56 = vrot.slane %v891_v35, 5 }
  0x8a   : > { %v894_v5 = vor.u32 %v893_v56, %v890_v55 }
  0x8c   : > { %v254_v57 = vpop.permute.xlu0 %253  ;;  %v895_v13 = vrot.slane %v894_v5, 4 }
  0x8d   : > { %v522_v62 = vpop.permute.xlu1 %521 }
  0x8e   : > { %v900_v18 = vsel %vm1398_vm3, %v895_v13, %v899_v14 }
  0x8f   : > { %v909_v22 = vunpack.c.l.b16 %v900_v18 }
  0x93   : > { %v223_v10 = vpop.f32.mrf.mxu1 }
  0x94   : > { %v218_v11 = vpop.f32.mrf.mxu0  ;;  %230 = vst.msk [vmem:[#allocation2 + $0x10] sm:$0xff] %vm202_vm0, %v223_v10  ;;  %v634_v10 = vrot.slane %v632_v1, 5 }
  0x95   : > { %1096 = vmatmul.msk.bf16.gmra.mxu1 %vm202_vm0, %v254_v57  ;;  %228 = vst.msk [vmem:[#allocation2] sm:$0xff] %vm202_vm0, %v218_v11  ;;  %v872_v57 = vsel %vm1398_vm3, %v867_v48, %v871_v38  ;;  %v881_v11 = vrot.slane %v880_v4, 4 }
  0x96   : > { %1162 = vmatmul.msk.bf16.gmra.mxu0 %vm202_vm0, %v522_v62  ;;  %v907_v62 = vunpack.c.l.b16 %v872_v57  ;;  %v635_v16 = vsel %vm1398_vm3, %v630_v9, %v634_v10 }
  0x97   : > { %v886_v17 = vsel %vm1398_vm3, %v881_v11, %v885_v12  ;;  %v644_v20 = vunpack.c.l.b16 %v635_v16 }
  0x98   : > { %v910_v3 = vpack.c.b16 %v907_v62, %v906_v58  ;;  %v908_v21 = vunpack.c.l.b16 %v886_v17 }
  0x99   : > { %v646_v23 = vpack.c.b16 %v644_v20, %v643_v19 }
  0x9a   : > { %v911_v24 = vpack.c.b16 %v909_v22, %v908_v21 }
  0x9b   : > { %v225_v50 = vpop.f32.mrf.mxu1  ;;  %v294_v36 = vld [vmem:[#allocation2 + $0x10] sm:$0xff] }
  0x9c   : > { %v220_v51 = vpop.f32.mrf.mxu0  ;;  %231 = vst.msk [vmem:[#allocation2 + $0x18] sm:$0xff] %vm202_vm0, %v225_v50  ;;  %v292_v25 = vld [vmem:[#allocation2] sm:$0xff] }
  0x9d   : > { %229 = vst.msk [vmem:[#allocation2 + $0x8] sm:$0xff] %vm202_vm0, %v220_v51 }
  0xa0   : > { %v478_v34 = vpop.f32.mrf.mxu3 }
  0xa3   : > { %v295_v46 = vld [vmem:[#allocation2 + $0x18] sm:$0xff] }
  0xa4   : > { %v293_v29 = vld [vmem:[#allocation2 + $0x8] sm:$0xff] }
  0xa5   : > { %1183 = vmatmul.msk.bf16.vlgmr.msra.gmra.mxu1 %vm202_vm0, %v645_v60 }
  0xa6   : > { %1257 = vmatmul.msk.bf16.vlgmr.msra.gmra.mxu0 %vm202_vm0, %v910_v3  ;;  %v409_v28 = vpop.f32.mrf.mxu2 }
  0xa8   : > { %v480_v43 = vpop.f32.mrf.mxu3 }
  0xae   : > { %v411_v33 = vpop.f32.mrf.mxu2 }
  0xb0   : > { %v483_v56 = vpop.f32.mrf.mxu3 }
  0xb5   : > { %1184 = vmatmul.msk.bf16.gmra.mxu1 %vm202_vm0, %v646_v23 }
  0xb6   : > { %1258 = vmatmul.msk.bf16.gmra.mxu0 %vm202_vm0, %v911_v24  ;;  %v414_v42 = vpop.f32.mrf.mxu2 }
  0xb8   : > { %v485_v3 = vpop.f32.mrf.mxu3 }
  0xbe   : > { %v416_v55 = vpop.f32.mrf.mxu2 }
  0xc6   : > { %v743_v4 = vpop.f32.mrf.mxu2 }
  0xce   : > { %v745_v15 = vpop.f32.mrf.mxu2 }
  0xf3   : > { %v815_v16 = vpop.f32.mrf.mxu3 }
 0x102   : > { %v282_v26 = vpop.f32.mrf.mxu1 }
 0x103   : > { %v296_v27 = vadd.f32 %v292_v25, %v282_v26  ;;  %v550_v44 = vpop.f32.mrf.mxu0 }
 0x105   : > { %300 = vst.msk [vmem:[#allocation2] sm:$0xff] %vm202_vm0, %v296_v27  ;;  %v748_v27 = vpop.f32.mrf.mxu2 }
 0x10a   : > { %v284_v30 = vpop.f32.mrf.mxu1 }
 0x10b   : > { %v297_v47 = vadd.f32 %v293_v29, %v284_v30  ;;  %v552_v58 = vpop.f32.mrf.mxu0 }
 0x10c   : > { %v419_v31 = vld [vmem:[#allocation2] sm:$0xff] }
 0x10d   : > { %v423_v32 = vadd.f32 %v419_v31, %v409_v28  ;;  %301 = vst.msk [vmem:[#allocation2 + $0x8] sm:$0xff] %vm202_vm0, %v297_v47  ;;  %v817_v28 = vpop.f32.mrf.mxu3 }
 0x10f   : > { %427 = vst.msk [vmem:[#allocation2] sm:$0xff] %vm202_vm0, %v423_v32 }
 0x112   : > { %v287_v35 = vpop.f32.mrf.mxu1 }
 0x113   : > { %v298_v37 = vadd.f32 %v294_v36, %v287_v35  ;;  %v555_v6 = vpop.f32.mrf.mxu0 }
 0x114   : > { %v420_v38 = vld [vmem:[#allocation2 + $0x8] sm:$0xff] }
 0x115   : > { %v424_v39 = vadd.f32 %v420_v38, %v411_v33  ;;  %302 = vst.msk [vmem:[#allocation2 + $0x10] sm:$0xff] %vm202_vm0, %v298_v37  ;;  %v750_v38 = vpop.f32.mrf.mxu2 }
 0x116   : > { %v488_v40 = vld [vmem:[#allocation2] sm:$0xff] }
 0x117   : > { %428 = vst.msk [vmem:[#allocation2 + $0x8] sm:$0xff] %vm202_vm0, %v424_v39  ;;  %v492_v41 = vadd.f32 %v488_v40, %v478_v34  ;;  %v820_v40 = vpop.f32.mrf.mxu3 }
 0x119   : > { %496 = vst.msk [vmem:[#allocation2] sm:$0xff] %vm202_vm0, %v492_v41 }
 0x11a   : > { %v289_v45 = vpop.f32.mrf.mxu1 }
 0x11b   : > { %v299_v48 = vadd.f32 %v295_v46, %v289_v45  ;;  %v557_v17 = vpop.f32.mrf.mxu0 }
 0x11c   : > { %v421_v49 = vld [vmem:[#allocation2 + $0x10] sm:$0xff] }
 0x11d   : > { %v425_v50 = vadd.f32 %v421_v49, %v414_v42  ;;  %303 = vst.msk [vmem:[#allocation2 + $0x18] sm:$0xff] %vm202_vm0, %v299_v48 }
 0x11e   : > { %v489_v51 = vld [vmem:[#allocation2 + $0x8] sm:$0xff] }
 0x11f   : > { %429 = vst.msk [vmem:[#allocation2 + $0x10] sm:$0xff] %vm202_vm0, %v425_v50  ;;  %v493_v52 = vadd.f32 %v489_v51, %v480_v43 }
 0x120   : > { %v560_v53 = vld [vmem:[#allocation2] sm:$0xff] }
 0x121   : > { %497 = vst.msk [vmem:[#allocation2 + $0x8] sm:$0xff] %vm202_vm0, %v493_v52  ;;  %v564_v54 = vadd.f32 %v560_v53, %v550_v44  ;;  %v1304_v44 = vld [vmem:[%s1563_s2] ss:$0 sm:$0xff]  ;;  %v822_v52 = vpop.f32.mrf.mxu3 }
 0x122   : > { %v674_v59 = vpop.f32.mrf.mxu1 }
 0x123   : > { %568 = vst.msk [vmem:[#allocation2] sm:$0xff] %vm202_vm0, %v564_v54  ;;  %v939_v47 = vpop.f32.mrf.mxu0 }
 0x124   : > { %v422_v57 = vld [vmem:[#allocation2 + $0x18] sm:$0xff] }
 0x125   : > { %v426_v60 = vadd.f32 %v422_v57, %v416_v55 }
 0x126   : > { %v490_v61 = vld [vmem:[#allocation2 + $0x10] sm:$0xff] }
 0x127   : > { %430 = vst.msk [vmem:[#allocation2 + $0x18] sm:$0xff] %vm202_vm0, %v426_v60  ;;  %v494_v62 = vadd.f32 %v490_v61, %v483_v56 }
 0x128   : > { %v561_v63 = vld [vmem:[#allocation2 + $0x8] sm:$0xff] }
 0x129   : > { %498 = vst.msk [vmem:[#allocation2 + $0x10] sm:$0xff] %vm202_vm0, %v494_v62  ;;  %v565_v0 = vadd.f32 %v561_v63, %v552_v58 }
 0x12a   : > { %v684_v1 = vld [vmem:[#allocation2] sm:$0xff]  ;;  %v676_v7 = vpop.f32.mrf.mxu1 }
 0x12b   : > { %569 = vst.msk [vmem:[#allocation2 + $0x8] sm:$0xff] %vm202_vm0, %v565_v0  ;;  %v688_v2 = vadd.f32 %v684_v1, %v674_v59  ;;  %v941_v41 = vpop.f32.mrf.mxu0 }
 0x12d   : > { %692 = vst.msk [vmem:[#allocation2] sm:$0xff] %vm202_vm0, %v688_v2 }
 0x12e   : > { %v491_v5 = vld [vmem:[#allocation2 + $0x18] sm:$0xff] }
 0x12f   : > { %v495_v8 = vadd.f32 %v491_v5, %v485_v3 }
 0x130   : > { %v562_v9 = vld [vmem:[#allocation2 + $0x10] sm:$0xff] }
 0x131   : > { %499 = vst.msk [vmem:[#allocation2 + $0x18] sm:$0xff] %vm202_vm0, %v495_v8  ;;  %v566_v10 = vadd.f32 %v562_v9, %v555_v6 }
 0x132   : > { %v685_v11 = vld [vmem:[#allocation2 + $0x8] sm:$0xff]  ;;  %v679_v19 = vpop.f32.mrf.mxu1 }
 0x133   : > { %570 = vst.msk [vmem:[#allocation2 + $0x10] sm:$0xff] %vm202_vm0, %v566_v10  ;;  %v689_v12 = vadd.f32 %v685_v11, %v676_v7  ;;  %v944_v54 = vpop.f32.mrf.mxu0 }
 0x134   : > { %v753_v13 = vld [vmem:[#allocation2] sm:$0xff] }
 0x135   : > { %693 = vst.msk [vmem:[#allocation2 + $0x8] sm:$0xff] %vm202_vm0, %v689_v12  ;;  %v757_v14 = vadd.f32 %v753_v13, %v743_v4 }
 0x137   : > { %761 = vst.msk [vmem:[#allocation2] sm:$0xff] %vm202_vm0, %v757_v14 }
 0x138   : > { %v563_v18 = vld [vmem:[#allocation2 + $0x18] sm:$0xff] }
 0x139   : > { %v567_v20 = vadd.f32 %v563_v18, %v557_v17 }
 0x13a   : > { %v686_v21 = vld [vmem:[#allocation2 + $0x10] sm:$0xff]  ;;  %v681_v29 = vpop.f32.mrf.mxu1 }
 0x13b   : > { %571 = vst.msk [vmem:[#allocation2 + $0x18] sm:$0xff] %vm202_vm0, %v567_v20  ;;  %v690_v22 = vadd.f32 %v686_v21, %v679_v19  ;;  %v946_v1 = vpop.f32.mrf.mxu0 }
 0x13c   : > { %v754_v23 = vld [vmem:[#allocation2 + $0x8] sm:$0xff] }
 0x13d   : > { %694 = vst.msk [vmem:[#allocation2 + $0x10] sm:$0xff] %vm202_vm0, %v690_v22  ;;  %v758_v24 = vadd.f32 %v754_v23, %v745_v15 }
 0x13e   : > { %v825_v25 = vld [vmem:[#allocation2] sm:$0xff] }
 0x13f   : > { %762 = vst.msk [vmem:[#allocation2 + $0x8] sm:$0xff] %vm202_vm0, %v758_v24  ;;  %v829_v26 = vadd.f32 %v825_v25, %v815_v16 }
 0x141   : > { %833 = vst.msk [vmem:[#allocation2] sm:$0xff] %vm202_vm0, %v829_v26 }
 0x142   : > { %v687_v30 = vld [vmem:[#allocation2 + $0x18] sm:$0xff] }
 0x143   : > { %v691_v31 = vadd.f32 %v687_v30, %v681_v29 }
 0x144   : > { %v755_v32 = vld [vmem:[#allocation2 + $0x10] sm:$0xff] }
 0x145   : > { %695 = vst.msk [vmem:[#allocation2 + $0x18] sm:$0xff] %vm202_vm0, %v691_v31  ;;  %v759_v33 = vadd.f32 %v755_v32, %v748_v27 }
 0x146   : > { %v826_v34 = vld [vmem:[#allocation2 + $0x8] sm:$0xff] }
 0x147   : > { %763 = vst.msk [vmem:[#allocation2 + $0x10] sm:$0xff] %vm202_vm0, %v759_v33  ;;  %v830_v35 = vadd.f32 %v826_v34, %v817_v28 }
 0x148   : > { %v949_v36 = vld [vmem:[#allocation2] sm:$0xff] }
 0x149   : > { %834 = vst.msk [vmem:[#allocation2 + $0x8] sm:$0xff] %vm202_vm0, %v830_v35  ;;  %v953_v37 = vadd.f32 %v949_v36, %v939_v47 }
 0x14b   : > { %957 = vst.msk [vmem:[#allocation2] sm:$0xff] %vm202_vm0, %v953_v37 }
 0x14c   : > { %v756_v39 = vld [vmem:[#allocation2 + $0x18] sm:$0xff] }
 0x14d   : > { %v760_v42 = vadd.f32 %v756_v39, %v750_v38 }
 0x14e   : > { %v827_v43 = vld [vmem:[#allocation2 + $0x10] sm:$0xff] }
 0x14f   : > { %764 = vst.msk [vmem:[#allocation2 + $0x18] sm:$0xff] %vm202_vm0, %v760_v42  ;;  %v831_v45 = vadd.f32 %v827_v43, %v820_v40 }
 0x150   : > { %v950_v46 = vld [vmem:[#allocation2 + $0x8] sm:$0xff] }
 0x151   : > { %835 = vst.msk [vmem:[#allocation2 + $0x10] sm:$0xff] %vm202_vm0, %v831_v45  ;;  %v954_v48 = vadd.f32 %v950_v46, %v941_v41 }
 0x152   : > { %v961_v49 = vld [vmem:[#allocation2] sm:$0xff] }
 0x153   : > { %v969_v50 = vadd.f32 %v1304_v44, %v961_v49  ;;  %958 = vst.msk [vmem:[#allocation2 + $0x8] sm:$0xff] %vm202_vm0, %v954_v48 }
 0x155   : > { %vm973_vm4 = vcmp.ge.f32.partialorder %v969_v50, 0.0  ;;  %v977_v51 = vmul.f32 0.01, %v969_v50 }
 0x156   : > { %v828_v53 = vld [vmem:[#allocation2 + $0x18] sm:$0xff] }
 0x157   : > { %v981_v55 = vsel %vm973_vm4, %v969_v50, %v977_v51  ;;  %v832_v56 = vadd.f32 %v828_v53, %v822_v52 }
 0x158   : > { %v985_v57 = vpack.c.bf16 %v981_v55, %v981_v55  ;;  %v951_v58 = vld [vmem:[#allocation2 + $0x10] sm:$0xff] }
 0x159   : > { %836 = vst.msk [vmem:[#allocation2 + $0x18] sm:$0xff] %vm202_vm0, %v832_v56  ;;  %v955_v59 = vadd.f32 %v951_v58, %v944_v54 }
 0x15a   : > { %990 = vst.msk [vmem:[%s1545_s8] sm:$0xf] %vm989_vm5, %v985_v57  ;;  %v962_v60 = vld [vmem:[#allocation2 + $0x8] sm:$0xff] }
 0x15b   : > { %v970_v61 = vadd.f32 %v1304_v44, %v962_v60  ;;  %959 = vst.msk [vmem:[#allocation2 + $0x10] sm:$0xff] %vm202_vm0, %v955_v59 }
 0x15d   : > { %vm974_vm6 = vcmp.ge.f32.partialorder %v970_v61, 0.0  ;;  %v978_v62 = vmul.f32 0.01, %v970_v61 }
 0x15f   : > { %v982_v63 = vsel %vm974_vm6, %v970_v61, %v978_v62 }
 0x160   : > { %v986_v0 = vpack.c.bf16 %v982_v63, %v982_v63  ;;  %v952_v2 = vld [vmem:[#allocation2 + $0x18] sm:$0xff] }
 0x161   : > { %v956_v3 = vadd.f32 %v952_v2, %v946_v1 }
 0x162   : > { %991 = vst.msk [vmem:[%s1545_s8 + $0x4] sm:$0xf] %vm989_vm5, %v986_v0  ;;  %v963_v4 = vld [vmem:[#allocation2 + $0x10] sm:$0xff] }
 0x163   : > { %v971_v5 = vadd.f32 %v1304_v44, %v963_v4  ;;  %960 = vst.msk [vmem:[#allocation2 + $0x18] sm:$0xff] %vm202_vm0, %v956_v3 }
 0x165   : > { %vm975_vm7 = vcmp.ge.f32.partialorder %v971_v5, 0.0  ;;  %v979_v6 = vmul.f32 0.01, %v971_v5 }
 0x167   : > { %v983_v7 = vsel %vm975_vm7, %v971_v5, %v979_v6 }
 0x168   : > { %v987_v8 = vpack.c.bf16 %v983_v7, %v983_v7 }
 0x16a   : > { %992 = vst.msk [vmem:[%s1545_s8 + $0x8] sm:$0xf] %vm989_vm5, %v987_v8  ;;  %v964_v9 = vld [vmem:[#allocation2 + $0x18] sm:$0xff] }
 0x16b   : > { %v972_v10 = vadd.f32 %v1304_v44, %v964_v9 }
 0x16d   : > { %vm976_vm8 = vcmp.ge.f32.partialorder %v972_v10, 0.0  ;;  %v980_v11 = vmul.f32 0.01, %v972_v10 }
 0x16f   : > { %v984_v12 = vsel %vm976_vm8, %v972_v10, %v980_v11 }
 0x170   : > { %v988_v13 = vpack.c.bf16 %v984_v12, %v984_v12 }
 0x172   : > { %993 = vst.msk [vmem:[%s1545_s8 + $0xc] sm:$0xf] %vm989_vm5, %v988_v13 }
 0x173 PF: > { %s13_s12 = sadd.s32 1, %s1311_s12  }
 0x174   : > { %p10_p4 = scmp.ge.s32.totalorder %s13_s12, 4  }
 0x176   :  { %12 = sbr.rel (!%p10_p4) target bundleno = 1 (0x1), region = 72 }

// kernel: gradual_style_block_forward.6
= control target key start
LH: loop header
LB: loop body
LE: loop exit
PB: predicated region body
PF: predicated region fallthrough
CT: control target
= control target key end

     0   :  { %s988_s12 = smov 0   ;;  %s1135_s0 = inlined_call_operand.vmem [shape: bf16[2,3,2,9,64], index: 0, kind: input, shape index: {}]   ;;  %s1136_s1 = inlined_call_operand.vmem [shape: bf16[9,32,32], index: 1, kind: input, shape index: {}]   ;;  %s1137_s2 = inlined_call_operand.vmem [shape: f32[1,32], index: 2, kind: input, shape index: {}]   ;;  %s1138_s3 = inlined_call_operand.vmem [shape: bf16[2,16,32], index: 3, kind: output, shape index: {}]  }
   0x1 LB: > { %s760_s13 = sadd.s32 4294967295, %s965_s12   ;;  %p764_p0 = scmp.ge.s32.totalorder %s965_s12, 1  ;;  %s965_s12 = sphi %s988_s12, %s13_s12  }
   0x2   : > { %p137_p1 = scmp.lt.s32.totalorder %s965_s12, 3 }
   0x4   : > { %p138_p2 = pnand %p764_p0, %p137_p1 }
   0x5   : > { %p161_p3 = scmp.lt.s32.totalorder (!%p138_p2), %s760_s13, 1  ;;  %s967_s5 = smov (!%p138_p2), 96  }
   0x6   : > { %141 = sbr.rel (%p138_p2) target bundleno = 355 (0x163), region = 32 }
   0xb   : > { %v926_v0 = vld [vmem:[%s1136_s1 + $0x8] sm:$0xff]  ;;  %v929_v2 = vld [vmem:[%s1136_s1 + $0x18] sm:$0xff]  ;;  %s1142_s13 = smov (!%p161_p3, %s760_s13), 1  ;;  %v925_v3 = vld [vmem:[%s1136_s1] sm:$0xff]  ;;  %vm195_vm0 = vcmask 261120   ;;  %vm702_vm5 = vcmask 257024  }
   0xc   : > { %v931_v1 = vld [vmem:[%s1136_s1 + $0x28] sm:$0xff]  ;;  %205 = vmatpush.bf16.msra.mxu0 %v926_v0  ;;  %v930_v4 = vld [vmem:[%s1136_s1 + $0x20] sm:$0xff]  ;;  %v934_v5 = vld [vmem:[%s1136_s1 + $0x38] sm:$0xff]  ;;  %250 = vmatpush.bf16.msra.mxu1 %v929_v2  ;;  %s948_s28 = smul.u32 48, %s1142_s13  ;;  %vm268_vm1 = vsmask.f32 3328 }
   0xd   : > { %328 = vmatpush.bf16.msra.mxu2 %v931_v1  ;;  %v928_v6 = vld [vmem:[%s1136_s1 + $0x10] sm:$0xff]  ;;  %376 = vmatpush.bf16.msra.mxu3 %v934_v5  ;;  %vm269_vm2 = vsmask.f32 7440  ;;  %v937_v49 = vld [vmem:[%s1136_s1 + $0x48] sm:$0xff]  ;;  %v936_v50 = vld [vmem:[%s1136_s1 + $0x40] sm:$0xff] }
   0xe   : > { %s1023_s4 = scalar_lea.vmem %s1135_s0, %s948_s28  ;;  %vm1038_vm3 = vmor %vm268_vm1, %vm269_vm2  ;;  %v933_v45 = vld [vmem:[%s1136_s1 + $0x30] sm:$0xff]  ;;  %v939_v51 = vld [vmem:[%s1136_s1 + $0x58] sm:$0xff] }
   0xf   : > { %v787_v7 = vld [vmem:[%s1023_s4] sm:$0xf]  ;;  %v927_v8 = vld [vmem:[%s1023_s4 + $0xc] sm:$0xf0]  ;;  %v838_v12 = vld [vmem:[%s1023_s4 + $0x8] sm:$0xf] }
  0x10   : > { %206 = vmatpush.bf16.msra.mxu0 %v925_v3  ;;  %251 = vmatpush.bf16.msra.mxu1 %v928_v6  ;;  %v788_v9 = vor.u32 %v927_v8, %v787_v7  ;;  %v893_v10 = vld [vmem:[%s1023_s4 + $0x10] sm:$0xf]  ;;  %v943_v11 = vld [vmem:[%s1023_s4 + $0x1c] sm:$0xf0]  ;;  %v265_v18 = vld [vmem:[%s1023_s4 + $0x4] sm:$0x1] }
  0x11   : > { %329 = vmatpush.bf16.msra.mxu2 %v930_v4  ;;  %v894_v13 = vor.u32 %v943_v11, %v893_v10  ;;  %v770_v14 = vld [vmem:[%s1023_s4] sm:$0xf]  ;;  %v924_v15 = vld [vmem:[%s1023_s4 + $0xc] sm:$0xf0]  ;;  %v267_v20 = vld [vmem:[%s1023_s4 + $0x14] sm:$0x1]  ;;  %377 = vmatpush.bf16.msra.mxu3 %v933_v45 }
  0x12   : > { %v264_v16 = vld [vmem:[%s1023_s4] sm:$0xf]  ;;  %227 = vrot.lane.b32.xlu0 %v788_v9, %s967_s5  ;;  %v771_v17 = vor.u32 %v924_v15, %v770_v14  ;;  %v266_v19 = vld [vmem:[%s1023_s4 + $0x10] sm:$0xf]  ;;  %v935_v21 = vld [vmem:[%s1023_s4 + $0x14] sm:$0xf0] }
  0x13   : > { %574 = vrot.lane.b32.xlu1 %v894_v13, %s967_s5  ;;  %v272_v22 = vshrl.u32 %v264_v16, 16  ;;  %v275_v23 = vshll.u32 %v264_v16, 16  ;;  %v281_v24 = vshll.u32 %v265_v18, 16  ;;  %v286_v25 = vshrl.u32 %v266_v19, 16  ;;  %v819_v46 = vld [vmem:[%s1023_s4 + $0x8] sm:$0xf] }
  0x14   : > { %780 = vmatmul.msk.bf16.vlgmr.msra.gmra.mxu0 %vm195_vm0, %v771_v17  ;;  %v289_v26 = vshll.u32 %v266_v19, 16  ;;  %v295_v27 = vshll.u32 %v267_v20, 16  ;;  %v839_v31 = vor.u32 %v935_v21, %v838_v12  ;;  %v932_v47 = vld [vmem:[%s1023_s4 + $0x14] sm:$0xf0]  ;;  %v942_v52 = vld [vmem:[%s1136_s1 + $0x68] sm:$0xff]  ;;  %500 = vmatpush.bf16.msrb.mxu1 %v939_v51  ;;  %v938_v53 = vld [vmem:[%s1136_s1 + $0x50] sm:$0xff] }
  0x15   : > { %v274_v28 = vrot.slane %v272_v22, 4  ;;  %v277_v29 = vrot.slane %v275_v23, 5  ;;  %v288_v30 = vrot.slane %v286_v25, 4  ;;  %v283_v34 = vrot.slane %v281_v24, 5  ;;  %425 = vmatpush.bf16.msrb.mxu0 %v937_v49  ;;  %548 = vmatpush.bf16.msrb.mxu2 %v942_v52  ;;  %v849_v54 = vld [vmem:[%s1023_s4 + $0x8] sm:$0xf] }
  0x16   : > { %v291_v32 = vrot.slane %v289_v26, 5  ;;  %v297_v37 = vrot.slane %v295_v27, 5  ;;  %v820_v48 = vor.u32 %v932_v47, %v819_v46  ;;  %v941_v55 = vld [vmem:[%s1136_s1 + $0x60] sm:$0xff]  ;;  %v874_v56 = vld [vmem:[%s1023_s4 + $0x10] sm:$0xf]  ;;  %v945_v60 = vld [vmem:[%s1136_s1 + $0x78] sm:$0xff] }
  0x17   : > { %v278_v33 = vor.u32 %v277_v29, %v274_v28  ;;  %v940_v57 = vld [vmem:[%s1023_s4 + $0x1c] sm:$0xf0]  ;;  %v851_v58 = vld [vmem:[%s1023_s4 + $0x18] sm:$0xf]  ;;  %v947_v61 = vld [vmem:[%s1136_s1 + $0x88] sm:$0xff]  ;;  %597 = vmatpush.bf16.msrb.mxu3 %v945_v60  ;;  %v444_v0 = vshrl.u32 %v849_v54, 16 }
  0x18   : > { %v292_v36 = vor.u32 %v291_v32, %v288_v30  ;;  %829 = vmatmul.msk.bf16.vlgmr.msra.gmra.mxu3 %vm195_vm0, %v820_v48  ;;  %501 = vmatpush.bf16.msrb.mxu1 %v938_v53  ;;  %v875_v59 = vor.u32 %v940_v57, %v874_v56  ;;  %v944_v62 = vld [vmem:[%s1136_s1 + $0x70] sm:$0xff]  ;;  %v946_v63 = vld [vmem:[%s1136_s1 + $0x80] sm:$0xff]  ;;  %v447_v1 = vshll.u32 %v849_v54, 16  ;;  %v458_v2 = vshrl.u32 %v851_v58, 16  ;;  %v850_v8 = vld [vmem:[%s1023_s4 + $0xc] sm:$0x1] }
  0x19   : > { %v279_v38 = vrot.slane %v278_v33, 4  ;;  %426 = vmatpush.bf16.msrb.mxu0 %v936_v50  ;;  %549 = vmatpush.bf16.msrb.mxu2 %v941_v55  ;;  %v461_v3 = vshll.u32 %v851_v58, 16  ;;  %v446_v4 = vrot.slane %v444_v0, 4  ;;  %v852_v9 = vld [vmem:[%s1023_s4 + $0x1c] sm:$0x1]  ;;  %v453_v13 = vshll.u32 %v850_v8, 16 }
  0x1a   : > { %402 = vrot.lane.b32.xlu0 %v839_v31, %s967_s5  ;;  %v293_v39 = vrot.slane %v292_v36, 4  ;;  %v449_v5 = vrot.slane %v447_v1, 5  ;;  %v460_v6 = vrot.slane %v458_v2, 4  ;;  %v904_v10 = vld [vmem:[%s1023_s4 + $0x10] sm:$0xf]  ;;  %v467_v15 = vshll.u32 %v852_v9, 16 }
  0x1b   : > { %v284_v40 = vsel %vm1038_vm3, %v279_v38, %v283_v34  ;;  %598 = vmatpush.bf16.msrb.mxu3 %v944_v62  ;;  %v463_v7 = vrot.slane %v461_v3, 5  ;;  %v906_v11 = vld [vmem:[%s1023_s4 + $0x20] sm:$0xf]  ;;  %v616_v16 = vshrl.u32 %v904_v10, 16  ;;  %v619_v17 = vshll.u32 %v904_v10, 16  ;;  %s923_s5 = sshll.u32 %s1142_s13, 3 }
  0x1c   : > { %v298_v41 = vsel %vm1038_vm3, %v293_v39, %v297_v37  ;;  %v304_v42 = vunpack.c.l.b16 %v284_v40  ;;  %v450_v12 = vor.u32 %v449_v5, %v446_v4  ;;  %v630_v18 = vshrl.u32 %v906_v11, 16  ;;  %v905_v30 = vld [vmem:[%s1023_s4 + $0x14] sm:$0x1]  ;;  %v907_v31 = vld [vmem:[%s1023_s4 + $0x24] sm:$0x1]  ;;  %s170_s8 = scalar_lea.vmem %s1138_s3, %s923_s5 }
  0x1d   : > { %v305_v43 = vunpack.c.l.b16 %v298_v41  ;;  %672 = vmatpush.bf16.msra.mxu0 %v947_v61  ;;  %v464_v14 = vor.u32 %v463_v7, %v460_v6  ;;  %v633_v19 = vshll.u32 %v906_v11, 16  ;;  %v455_v22 = vrot.slane %v453_v13, 5 }
  0x1e   : > { %v451_v21 = vrot.slane %v450_v12, 4  ;;  %v469_v24 = vrot.slane %v467_v15, 5  ;;  %v618_v26 = vrot.slane %v616_v16, 4  ;;  %v621_v27 = vrot.slane %v619_v17, 5 }
  0x1f   : > { %v306_v44 = vpack.c.b16 %v305_v43, %v304_v42  ;;  %v465_v23 = vrot.slane %v464_v14, 4  ;;  %v632_v28 = vrot.slane %v630_v18, 4  ;;  %v635_v29 = vrot.slane %v633_v19, 5 }
  0x20   : > { %v456_v32 = vsel %vm1038_vm3, %v451_v21, %v455_v22  ;;  %v622_v34 = vor.u32 %v621_v27, %v618_v26  ;;  %v625_v36 = vshll.u32 %v905_v30, 16  ;;  %v639_v38 = vshll.u32 %v907_v31, 16 }
  0x21   : > { %810 = vmatmul.msk.bf16.vlgmr.msra.gmra.mxu2 %vm195_vm0, %v306_v44  ;;  %673 = vmatpush.bf16.msra.mxu0 %v946_v63  ;;  %v470_v33 = vsel %vm1038_vm3, %v465_v23, %v469_v24  ;;  %v636_v37 = vor.u32 %v635_v29, %v632_v28  ;;  %v476_v40 = vunpack.c.l.b16 %v456_v32 }
  0x22   : > { %v477_v41 = vunpack.c.l.b16 %v470_v33  ;;  %v623_v42 = vrot.slane %v622_v34, 4  ;;  %v627_v43 = vrot.slane %v625_v36, 5  ;;  %v641_v45 = vrot.slane %v639_v38, 5  ;;  %v958_v34 = vld [vmem:[%s1137_s2] ss:$0 sm:$0xff] }
  0x23   : > { %v637_v44 = vrot.slane %v636_v37, 4 }
  0x24   : > { %v478_v46 = vpack.c.b16 %v477_v41, %v476_v40  ;;  %v628_v48 = vsel %vm1038_vm3, %v623_v42, %v627_v43 }
  0x25   : > { %v642_v49 = vsel %vm1038_vm3, %v637_v44, %v641_v45  ;;  %v648_v50 = vunpack.c.l.b16 %v628_v48 }
  0x26   : > { %v649_v51 = vunpack.c.l.b16 %v642_v49 }
  0x28   : > { %v650_v52 = vpack.c.b16 %v649_v51, %v648_v50 }
  0x31   : > { %884 = vmatmul.msk.bf16.vlgmr.msrb.gmra.mxu2 %vm195_vm0, %v875_v59 }
  0x84   : > { %v228_v20 = vpop.permute.xlu0 %227 }
  0x85   : > { %797 = vmatmul.msk.bf16.vlgmr.msra.gmra.mxu1 %vm195_vm0, %v228_v20  ;;  %v575_v25 = vpop.permute.xlu1 %574 }
  0x86   : > { %903 = vmatmul.msk.bf16.vlgmr.msrb.gmra.mxu3 %vm195_vm0, %v575_v25 }
  0x8c   : > { %v403_v39 = vpop.permute.xlu0 %402 }
  0x8d   : > { %848 = vmatmul.msk.bf16.vlgmr.msrb.gmra.mxu0 %vm195_vm0, %v403_v39 }
  0x91   : > { %v208_v47 = vpop.f32.mrf.mxu0 }
  0x92   : > { %213 = vst.msk [vmem:[#allocation2] sm:$0xff] %vm195_vm0, %v208_v47 }
  0x95   : > { %865 = vmatmul.msk.bf16.vlgmr.msrb.gmra.mxu1 %vm195_vm0, %v478_v46 }
  0x99   : > { %v210_v53 = vpop.f32.mrf.mxu0  ;;  %v258_v54 = vld [vmem:[#allocation2] sm:$0xff] }
  0x9a   : > { %214 = vst.msk [vmem:[#allocation2 + $0x8] sm:$0xff] %vm195_vm0, %v210_v53 }
  0x9b   : > { %v379_v0 = vpop.f32.mrf.mxu3 }
  0x9d   : > { %920 = vmatmul.msk.bf16.vlgmr.msra.gmra.mxu0 %vm195_vm0, %v650_v52 }
  0xa1   : > { %v259_v58 = vld [vmem:[#allocation2 + $0x8] sm:$0xff] }
  0xa3   : > { %v381_v4 = vpop.f32.mrf.mxu3 }
  0xa4   : > { %v331_v57 = vpop.f32.mrf.mxu2 }
  0xac   : > { %v333_v62 = vpop.f32.mrf.mxu2 }
  0xb4   : > { %v551_v18 = vpop.f32.mrf.mxu2 }
  0xbc   : > { %v553_v22 = vpop.f32.mrf.mxu2 }
 0x102   : > { %v253_v55 = vpop.f32.mrf.mxu1 }
 0x103   : > { %v260_v56 = vadd.f32 %v258_v54, %v253_v55 }
 0x105   : > { %262 = vst.msk [vmem:[#allocation2] sm:$0xff] %vm195_vm0, %v260_v56 }
 0x109   : > { %v600_v24 = vpop.f32.mrf.mxu3 }
 0x10a   : > { %v255_v35 = vpop.f32.mrf.mxu1  ;;  %v428_v6 = vpop.f32.mrf.mxu0 }
 0x10b   : > { %v261_v59 = vadd.f32 %v259_v58, %v255_v35 }
 0x10c   : > { %v336_v60 = vld [vmem:[#allocation2] sm:$0xff] }
 0x10d   : > { %v338_v61 = vadd.f32 %v336_v60, %v331_v57  ;;  %263 = vst.msk [vmem:[#allocation2 + $0x8] sm:$0xff] %vm195_vm0, %v261_v59 }
 0x10f   : > { %340 = vst.msk [vmem:[#allocation2] sm:$0xff] %vm195_vm0, %v338_v61 }
 0x111   : > { %v602_v28 = vpop.f32.mrf.mxu3 }
 0x112   : > { %v430_v10 = vpop.f32.mrf.mxu0  ;;  %v503_v12 = vpop.f32.mrf.mxu1 }
 0x114   : > { %v337_v63 = vld [vmem:[#allocation2 + $0x8] sm:$0xff] }
 0x115   : > { %v339_v1 = vadd.f32 %v337_v63, %v333_v62 }
 0x116   : > { %v384_v2 = vld [vmem:[#allocation2] sm:$0xff] }
 0x117   : > { %341 = vst.msk [vmem:[#allocation2 + $0x8] sm:$0xff] %vm195_vm0, %v339_v1  ;;  %v386_v3 = vadd.f32 %v384_v2, %v379_v0 }
 0x119   : > { %388 = vst.msk [vmem:[#allocation2] sm:$0xff] %vm195_vm0, %v386_v3 }
 0x11a   : > { %v505_v16 = vpop.f32.mrf.mxu1  ;;  %v675_v30 = vpop.f32.mrf.mxu0 }
 0x11e   : > { %v385_v5 = vld [vmem:[#allocation2 + $0x8] sm:$0xff] }
 0x11f   : > { %v387_v7 = vadd.f32 %v385_v5, %v381_v4 }
 0x120   : > { %v433_v8 = vld [vmem:[#allocation2] sm:$0xff] }
 0x121   : > { %389 = vst.msk [vmem:[#allocation2 + $0x8] sm:$0xff] %vm195_vm0, %v387_v7  ;;  %v435_v9 = vadd.f32 %v433_v8, %v428_v6 }
 0x122   : > { %v677_v36 = vpop.f32.mrf.mxu0 }
 0x123   : > { %437 = vst.msk [vmem:[#allocation2] sm:$0xff] %vm195_vm0, %v435_v9 }
 0x128   : > { %v434_v11 = vld [vmem:[#allocation2 + $0x8] sm:$0xff] }
 0x129   : > { %v436_v13 = vadd.f32 %v434_v11, %v430_v10 }
 0x12a   : > { %v508_v14 = vld [vmem:[#allocation2] sm:$0xff] }
 0x12b   : > { %438 = vst.msk [vmem:[#allocation2 + $0x8] sm:$0xff] %vm195_vm0, %v436_v13  ;;  %v510_v15 = vadd.f32 %v508_v14, %v503_v12 }
 0x12d   : > { %512 = vst.msk [vmem:[#allocation2] sm:$0xff] %vm195_vm0, %v510_v15 }
 0x132   : > { %v509_v17 = vld [vmem:[#allocation2 + $0x8] sm:$0xff] }
 0x133   : > { %v511_v19 = vadd.f32 %v509_v17, %v505_v16 }
 0x134   : > { %v556_v20 = vld [vmem:[#allocation2] sm:$0xff] }
 0x135   : > { %513 = vst.msk [vmem:[#allocation2 + $0x8] sm:$0xff] %vm195_vm0, %v511_v19  ;;  %v558_v21 = vadd.f32 %v556_v20, %v551_v18 }
 0x137   : > { %560 = vst.msk [vmem:[#allocation2] sm:$0xff] %vm195_vm0, %v558_v21 }
 0x13c   : > { %v557_v23 = vld [vmem:[#allocation2 + $0x8] sm:$0xff] }
 0x13d   : > { %v559_v25 = vadd.f32 %v557_v23, %v553_v22 }
 0x13e   : > { %v605_v26 = vld [vmem:[#allocation2] sm:$0xff] }
 0x13f   : > { %561 = vst.msk [vmem:[#allocation2 + $0x8] sm:$0xff] %vm195_vm0, %v559_v25  ;;  %v607_v27 = vadd.f32 %v605_v26, %v600_v24 }
 0x141   : > { %609 = vst.msk [vmem:[#allocation2] sm:$0xff] %vm195_vm0, %v607_v27 }
 0x146   : > { %v606_v29 = vld [vmem:[#allocation2 + $0x8] sm:$0xff] }
 0x147   : > { %v608_v31 = vadd.f32 %v606_v29, %v602_v28 }
 0x148   : > { %v680_v32 = vld [vmem:[#allocation2] sm:$0xff] }
 0x149   : > { %610 = vst.msk [vmem:[#allocation2 + $0x8] sm:$0xff] %vm195_vm0, %v608_v31  ;;  %v682_v33 = vadd.f32 %v680_v32, %v675_v30 }
 0x14b   : > { %684 = vst.msk [vmem:[#allocation2] sm:$0xff] %vm195_vm0, %v682_v33 }
 0x150   : > { %v681_v37 = vld [vmem:[#allocation2 + $0x8] sm:$0xff] }
 0x151   : > { %v683_v38 = vadd.f32 %v681_v37, %v677_v36 }
 0x152   : > { %v686_v39 = vld [vmem:[#allocation2] sm:$0xff] }
 0x153   : > { %v692_v40 = vadd.f32 %v958_v34, %v686_v39  ;;  %685 = vst.msk [vmem:[#allocation2 + $0x8] sm:$0xff] %vm195_vm0, %v683_v38 }
 0x155   : > { %vm694_vm4 = vcmp.ge.f32.partialorder %v692_v40, 0.0  ;;  %v696_v41 = vmul.f32 0.01, %v692_v40 }
 0x157   : > { %v698_v42 = vsel %vm694_vm4, %v692_v40, %v696_v41 }
 0x158   : > { %v700_v43 = vpack.c.bf16 %v698_v42, %v698_v42 }
 0x15a   : > { %703 = vst.msk [vmem:[%s170_s8] sm:$0xf] %vm702_vm5, %v700_v43  ;;  %v687_v44 = vld [vmem:[#allocation2 + $0x8] sm:$0xff] }
 0x15b   : > { %v693_v45 = vadd.f32 %v958_v34, %v687_v44 }
 0x15d   : > { %vm695_vm6 = vcmp.ge.f32.partialorder %v693_v45, 0.0  ;;  %v697_v46 = vmul.f32 0.01, %v693_v45 }
 0x15f   : > { %v699_v47 = vsel %vm695_vm6, %v693_v45, %v697_v46 }
 0x160   : > { %v701_v48 = vpack.c.bf16 %v699_v47, %v699_v47 }
 0x162   : > { %704 = vst.msk [vmem:[%s170_s8 + $0x4] sm:$0xf] %vm702_vm5, %v701_v48 }
 0x163 PF: > { %s13_s12 = sadd.s32 1, %s965_s12  }
 0x164   : > { %p10_p4 = scmp.ge.s32.totalorder %s13_s12, 4  }
 0x166   :  { %12 = sbr.rel (!%p10_p4) target bundleno = 1 (0x1), region = 72 }

// kernel: gradual_style_block_forward.4
= control target key start
LH: loop header
LB: loop body
LE: loop exit
PB: predicated region body
PF: predicated region fallthrough
CT: control target
= control target key end

     0   :  { %s1803_s12 = smov 0   ;;  %s2163_s0 = inlined_call_operand.vmem [shape: bf16[2,9,2,9,8], index: 0, kind: input, shape index: {}]   ;;  %s2164_s1 = inlined_call_operand.vmem [shape: bf16[9,4,32], index: 1, kind: input, shape index: {}]   ;;  %s2165_s2 = inlined_call_operand.vmem [shape: f32[1,32], index: 2, kind: input, shape index: {}]   ;;  %s2166_s3 = inlined_call_operand.vmem [shape: bf16[2,64,32], index: 3, kind: output, shape index: {}]  }
   0x1 LB: > { %s1521_s13 = sadd.s32 4294967295, %s1780_s12   ;;  %p1525_p0 = scmp.ge.s32.totalorder %s1780_s12, 1  ;;  %s1780_s12 = sphi %s1803_s12, %s13_s12  }
   0x2   : > { %p137_p1 = scmp.lt.s32.totalorder %s1780_s12, 3 }
   0x4   : > { %p138_p2 = pnand %p1525_p0, %p137_p1 }
   0x5   : > { %p161_p3 = scmp.lt.s32.totalorder (!%p138_p2), %s1521_s13, 1  ;;  %s1782_s26 = smov (!%p138_p2), 124  }
   0x6   : > { %141 = sbr.rel (%p138_p2) target bundleno = 427 (0x1ab), region = 32 }
   0xb   : > { %s2170_s13 = smov (!%p161_p3, %s1521_s13), 1  ;;  %v180_v0 = vld [vmem:[%s2164_s1] sm:$0x3]  ;;  %vm214_vm0 = vcmask 1041408   ;;  %v1549_v2 = vld [vmem:[%s2164_s1 + $0x2] sm:$0x3] }
   0xc   : > { %v216_v1 = vsel %vm214_vm0, %v180_v0, 0  ;;  %v1570_v3 = vld [vmem:[%s2164_s1 + $0x4] sm:$0x3]  ;;  %s1763_s20 = smul.u32 144, %s2170_s13  ;;  %v307_v4 = vsel %vm214_vm0, %v1549_v2, 0  ;;  %vm201_vm1 = vcmask 31744  }
   0xd   : > { %1760 = vmatpush.bf16.msra.mxu1 %v216_v1  ;;  %1761 = vmatpush.bf16.msra.mxu2 %v216_v1  ;;  %v520_v5 = vsel %vm214_vm0, %v1570_v3, 0  ;;  %v1583_v6 = vld [vmem:[%s2164_s1 + $0x6] sm:$0x3]  ;;  %vm378_vm2 = vsmask.f32 3328  ;;  %vm247_vm5 = vcmask 261120  }
   0xe   : > { %1762 = vmatpush.bf16.msra.mxu3 %v216_v1  ;;  %s1832_s25 = scalar_lea.vmem %s2163_s0, %s1763_s20  ;;  %225 = vmatpush.bf16.msra.mxu0 %v216_v1  ;;  %v619_v7 = vsel %vm214_vm0, %v1583_v6, 0  ;;  %vm379_vm3 = vsmask.f32 7440  ;;  %s1735_s14 = sshll.u32 %s2170_s13, 5  ;;  %vm1457_vm7 = vcmask 257024  }
   0xf   : > { %v1552_v8 = vld [vmem:[%s1832_s25] sm:$0xf]  ;;  %v1740_v9 = vld [vmem:[%s1832_s25 + $0xc] sm:$0xf0]  ;;  %v1615_v10 = vld [vmem:[%s1832_s25 + $0x8] sm:$0xf]  ;;  %s2118_s17 = scalar_lea.vmem %s2166_s3, %s1735_s14 }
  0x10   : > { %v1553_v11 = vor.u32 %v1740_v9, %v1552_v8  ;;  %v1748_v12 = vld [vmem:[%s1832_s25 + $0x14] sm:$0xf0]  ;;  %v1619_v14 = vld [vmem:[%s1832_s25 + $0x28] sm:$0xf]  ;;  %v1556_v16 = vld [vmem:[%s1832_s25 + $0x20] sm:$0xf] }
  0x11   : > { %316 = vmatpush.bf16.msrb.mxu1 %v307_v4  ;;  %529 = vmatpush.bf16.msrb.mxu2 %v520_v5  ;;  %v1616_v13 = vor.u32 %v1748_v12, %v1615_v10  ;;  %v1749_v15 = vld [vmem:[%s1832_s25 + $0x34] sm:$0xf0]  ;;  %v1741_v17 = vld [vmem:[%s1832_s25 + $0x2c] sm:$0xf0]  ;;  %v1560_v19 = vld [vmem:[%s1832_s25 + $0x40] sm:$0xf] }
  0x12   : > { %628 = vmatpush.bf16.msrb.mxu3 %v619_v7  ;;  %286 = vrot.lane.b32.xlu0 %v1553_v11, %s1782_s26  ;;  %v1620_v18 = vor.u32 %v1749_v15, %v1619_v14  ;;  %v1742_v20 = vld [vmem:[%s1832_s25 + $0x4c] sm:$0xf0]  ;;  %v1564_v21 = vld [vmem:[%s1832_s25 + $0x60] sm:$0xf]  ;;  %v1557_v24 = vor.u32 %v1741_v17, %v1556_v16  ;;  %v1623_v35 = vld [vmem:[%s1832_s25 + $0x48] sm:$0xf] }
  0x13   : > { %704 = vrot.lane.b32.xlu1 %v1616_v13, %s1782_s26  ;;  %v1535_v22 = vld [vmem:[%s1832_s25 + $0x20] sm:$0xf]  ;;  %v1737_v23 = vld [vmem:[%s1832_s25 + $0x2c] sm:$0xf0]  ;;  %v1561_v29 = vor.u32 %v1742_v20, %v1560_v19  ;;  %v363_v40 = vld [vmem:[%s1832_s25 + $0x4] sm:$0x1] }
  0x14   : > { %706 = vrot.lane.b32.xlu2 %v1620_v18, %s1782_s26  ;;  %v1743_v25 = vld [vmem:[%s1832_s25 + $0x6c] sm:$0xf0]  ;;  %v1536_v26 = vor.u32 %v1737_v23, %v1535_v22  ;;  %v1539_v27 = vld [vmem:[%s1832_s25 + $0x40] sm:$0xf]  ;;  %v365_v42 = vld [vmem:[%s1832_s25 + $0x14] sm:$0x1] }
  0x15   : > { %v1738_v28 = vld [vmem:[%s1832_s25 + $0x4c] sm:$0xf0]  ;;  %v1543_v31 = vld [vmem:[%s1832_s25 + $0x60] sm:$0xf]  ;;  %v1565_v36 = vor.u32 %v1743_v25, %v1564_v21  ;;  %v391_v45 = vshll.u32 %v363_v40, 16  ;;  %v405_v50 = vshll.u32 %v365_v42, 16  ;;  %vm1877_vm4 = vmor %vm378_vm2, %vm379_vm3 }
  0x16   : > { %v1540_v30 = vor.u32 %v1738_v28, %v1539_v27  ;;  %1546 = vmatmul.msk.bf16.vlgmr.msra.gmra.mxu1 %vm201_vm1, %v1536_v26  ;;  %v1739_v32 = vld [vmem:[%s1832_s25 + $0x6c] sm:$0xf0]  ;;  %v1531_v33 = vld [vmem:[%s1832_s25] sm:$0xf]  ;;  %v1750_v47 = vld [vmem:[%s1832_s25 + $0x54] sm:$0xf0] }
  0x17   : > { %v1736_v34 = vld [vmem:[%s1832_s25 + $0xc] sm:$0xf0]  ;;  %v1544_v37 = vor.u32 %v1739_v32, %v1543_v31  ;;  %v362_v39 = vld [vmem:[%s1832_s25] sm:$0xf]  ;;  %v1627_v48 = vld [vmem:[%s1832_s25 + $0x68] sm:$0xf]  ;;  %v1624_v56 = vor.u32 %v1750_v47, %v1623_v35 }
  0x18   : > { %1547 = vmatmul.msk.bf16.vlgmr.msra.gmra.mxu2 %vm201_vm1, %v1540_v30  ;;  %v1532_v38 = vor.u32 %v1736_v34, %v1531_v33  ;;  %v364_v41 = vld [vmem:[%s1832_s25 + $0x10] sm:$0xf]  ;;  %v382_v43 = vshrl.u32 %v362_v39, 16  ;;  %v385_v44 = vshll.u32 %v362_v39, 16  ;;  %v1751_v51 = vld [vmem:[%s1832_s25 + $0x74] sm:$0xf0] }
  0x19   : > { %v396_v46 = vshrl.u32 %v364_v41, 16  ;;  %1548 = vmatmul.msk.bf16.vlgmr.msra.gmra.mxu3 %vm201_vm1, %v1544_v37  ;;  %v399_v49 = vshll.u32 %v364_v41, 16  ;;  %v1694_v57 = vld [vmem:[%s1832_s25 + $0x10] sm:$0xf]  ;;  %v1756_v58 = vld [vmem:[%s1832_s25 + $0x1c] sm:$0xf0]  ;;  %v1628_v61 = vor.u32 %v1751_v51, %v1627_v48 }
  0x1a   : > { %288 = vrot.lane.b32.xlu0 %v1557_v24, %s1782_s26  ;;  %1545 = vmatmul.msk.bf16.vlgmr.msra.gmra.mxu0 %vm201_vm1, %v1532_v38  ;;  %v384_v52 = vrot.slane %v382_v43, 4  ;;  %v387_v53 = vrot.slane %v385_v44, 5  ;;  %v393_v60 = vrot.slane %v391_v45, 5  ;;  %v407_v0 = vrot.slane %v405_v50, 5  ;;  %v1698_v5 = vld [vmem:[%s1832_s25 + $0x30] sm:$0xf] }
  0x1b   : > { %290 = vrot.lane.b32.xlu1 %v1561_v29, %s1782_s26  ;;  %v398_v54 = vrot.slane %v396_v46, 4  ;;  %v401_v55 = vrot.slane %v399_v49, 5  ;;  %v1695_v2 = vor.u32 %v1756_v58, %v1694_v57  ;;  %v1757_v6 = vld [vmem:[%s1832_s25 + $0x3c] sm:$0xf0]  ;;  %v1702_v9 = vld [vmem:[%s1832_s25 + $0x50] sm:$0xf] }
  0x1c   : > { %292 = vrot.lane.b32.xlu2 %v1565_v36, %s1782_s26  ;;  %v388_v59 = vor.u32 %v387_v53, %v384_v52  ;;  %v1758_v10 = vld [vmem:[%s1832_s25 + $0x5c] sm:$0xf0]  ;;  %v1699_v12 = vor.u32 %v1757_v6, %v1698_v5  ;;  %v368_v16 = vld [vmem:[%s1832_s25 + $0x30] sm:$0xf]  ;;  %v1649_v21 = vld [vmem:[%s2164_s1 + $0xa] sm:$0x3] }
  0x1d   : > { %v402_v63 = vor.u32 %v401_v55, %v398_v54  ;;  %v1703_v14 = vor.u32 %v1758_v10, %v1702_v9  ;;  %v366_v15 = vld [vmem:[%s1832_s25 + $0x20] sm:$0xf]  ;;  %v424_v19 = vshrl.u32 %v368_v16, 16  ;;  %v427_v20 = vshll.u32 %v368_v16, 16  ;;  %v1662_v22 = vld [vmem:[%s2164_s1 + $0xc] sm:$0x3] }
  0x1e   : > { %v389_v1 = vrot.slane %v388_v59, 4  ;;  %v410_v17 = vshrl.u32 %v366_v15, 16  ;;  %v413_v18 = vshll.u32 %v366_v15, 16  ;;  %v1586_v23 = vld [vmem:[%s1832_s25 + $0x8] sm:$0xf]  ;;  %v935_v24 = vsel %vm214_vm0, %v1649_v21, 0 }
  0x1f   : > { %v403_v3 = vrot.slane %v402_v63, 4  ;;  %v1034_v25 = vsel %vm214_vm0, %v1662_v22, 0  ;;  %v1744_v26 = vld [vmem:[%s1832_s25 + $0x14] sm:$0xf0]  ;;  %v367_v27 = vld [vmem:[%s1832_s25 + $0x24] sm:$0x1]  ;;  %944 = vmatpush.bf16.msra.mxu1 %v935_v24 }
  0x20   : > { %v394_v4 = vsel %vm1877_vm4, %v389_v1, %v393_v60  ;;  %1043 = vmatpush.bf16.msra.mxu2 %v1034_v25  ;;  %v1587_v28 = vor.u32 %v1744_v26, %v1586_v23  ;;  %v369_v29 = vld [vmem:[%s1832_s25 + $0x34] sm:$0x1]  ;;  %v412_v30 = vrot.slane %v410_v17, 4  ;;  %v415_v31 = vrot.slane %v413_v18, 5  ;;  %v1612_v36 = vld [vmem:[%s2164_s1 + $0x8] sm:$0x3] }
  0x21   : > { %v408_v7 = vsel %vm1877_vm4, %v403_v3, %v407_v0  ;;  %v495_v8 = vunpack.c.l.b16 %v394_v4  ;;  %v419_v32 = vshll.u32 %v367_v27, 16  ;;  %v426_v33 = vrot.slane %v424_v19, 4  ;;  %v1691_v40 = vld [vmem:[%s2164_s1 + $0xe] sm:$0x3]  ;;  %v370_v51 = vld [vmem:[%s1832_s25 + $0x40] sm:$0xf] }
  0x22   : > { %708 = vrot.lane.b32.xlu0 %v1624_v56, %s1782_s26  ;;  %v496_v11 = vunpack.c.l.b16 %v408_v7  ;;  %v429_v34 = vrot.slane %v427_v20, 5  ;;  %v433_v35 = vshll.u32 %v369_v29, 16  ;;  %v416_v37 = vor.u32 %v415_v31, %v412_v30  ;;  %v372_v52 = vld [vmem:[%s1832_s25 + $0x50] sm:$0xf]  ;;  %v1590_v57 = vld [vmem:[%s1832_s25 + $0x28] sm:$0xf] }
  0x23   : > { %710 = vrot.lane.b32.xlu1 %v1628_v61, %s1782_s26  ;;  %v421_v38 = vrot.slane %v419_v32, 5  ;;  %v725_v39 = vsel %vm214_vm0, %v1612_v36, 0  ;;  %v1140_v43 = vsel %vm214_vm0, %v1691_v40, 0  ;;  %v438_v53 = vshrl.u32 %v370_v51, 16  ;;  %v1745_v58 = vld [vmem:[%s1832_s25 + $0x34] sm:$0xf0] }
  0x24   : > { %1119 = vrot.lane.b32.xlu2 %v1695_v2, %s1782_s26  ;;  %v503_v13 = vpack.c.b16 %v496_v11, %v495_v8  ;;  %v430_v41 = vor.u32 %v429_v34, %v426_v33  ;;  %v435_v42 = vrot.slane %v433_v35, 5  ;;  %734 = vmatpush.bf16.msrb.mxu0 %v725_v39  ;;  %v417_v44 = vrot.slane %v416_v37, 4  ;;  %v1706_v59 = vld [vmem:[%s1832_s25 + $0x70] sm:$0xf]  ;;  %v1759_v61 = vld [vmem:[%s1832_s25 + $0x7c] sm:$0xf0] }
  0x25   : > { %1149 = vmatpush.bf16.msra.mxu3 %v1140_v43  ;;  %v441_v54 = vshll.u32 %v370_v51, 16  ;;  %v452_v55 = vshrl.u32 %v372_v52, 16  ;;  %v455_v56 = vshll.u32 %v372_v52, 16  ;;  %v1591_v60 = vor.u32 %v1745_v58, %v1590_v57  ;;  %v371_v63 = vld [vmem:[%s1832_s25 + $0x44] sm:$0x1] }
  0x26   : > { %v431_v45 = vrot.slane %v430_v41, 4  ;;  %v422_v46 = vsel %vm1877_vm4, %v417_v44, %v421_v38  ;;  %v373_v0 = vld [vmem:[%s1832_s25 + $0x54] sm:$0x1]  ;;  %v1707_v1 = vor.u32 %v1759_v61, %v1706_v59  ;;  %v440_v2 = vrot.slane %v438_v53, 4  ;;  %v1728_v5 = vld [vmem:[%s2164_s1 + $0x10] sm:$0x3] }
  0x27   : > { %v497_v48 = vunpack.c.l.b16 %v422_v46  ;;  %v443_v3 = vrot.slane %v441_v54, 5  ;;  %v447_v4 = vshll.u32 %v371_v63, 16  ;;  %v454_v6 = vrot.slane %v452_v55, 4  ;;  %v374_v21 = vld [vmem:[%s1832_s25 + $0x60] sm:$0xf] }
  0x28   : > { %1571 = vmatmul.msk.bf16.vlgmr.msrb.gmra.mxu2 %vm201_vm1, %v503_v13  ;;  %v436_v47 = vsel %vm1877_vm4, %v431_v45, %v435_v42  ;;  %v457_v7 = vrot.slane %v455_v56, 5  ;;  %v461_v8 = vshll.u32 %v373_v0, 16  ;;  %v1350_v9 = vsel %vm214_vm0, %v1728_v5, 0  ;;  %v376_v22 = vld [vmem:[%s1832_s25 + $0x70] sm:$0xf] }
  0x29   : > { %1600 = vmatmul.msk.bf16.vlgmr.msrb.gmra.mxu3 %vm201_vm1, %v1587_v28  ;;  %v498_v49 = vunpack.c.l.b16 %v436_v47  ;;  %v444_v10 = vor.u32 %v443_v3, %v440_v2  ;;  %v449_v11 = vrot.slane %v447_v4, 5  ;;  %1359 = vmatpush.bf16.msra.mxu0 %v1350_v9  ;;  %v466_v24 = vshrl.u32 %v374_v21, 16  ;;  %v1594_v29 = vld [vmem:[%s1832_s25 + $0x48] sm:$0xf]  ;;  %v1746_v30 = vld [vmem:[%s1832_s25 + $0x54] sm:$0xf0] }
  0x2a   : > { %1121 = vrot.lane.b32.xlu0 %v1699_v12, %s1782_s26  ;;  %v458_v12 = vor.u32 %v457_v7, %v454_v6  ;;  %v463_v13 = vrot.slane %v461_v8, 5  ;;  %v469_v25 = vshll.u32 %v374_v21, 16  ;;  %v480_v26 = vshrl.u32 %v376_v22, 16  ;;  %v375_v31 = vld [vmem:[%s1832_s25 + $0x64] sm:$0x1] }
  0x2b   : > { %1123 = vrot.lane.b32.xlu1 %v1703_v14, %s1782_s26  ;;  %v504_v50 = vpack.c.b16 %v498_v49, %v497_v48  ;;  %v445_v14 = vrot.slane %v444_v10, 4  ;;  %v483_v27 = vshll.u32 %v376_v22, 16  ;;  %v1595_v32 = vor.u32 %v1746_v30, %v1594_v29  ;;  %v377_v33 = vld [vmem:[%s1832_s25 + $0x74] sm:$0x1]  ;;  %v1598_v53 = vld [vmem:[%s1832_s25 + $0x68] sm:$0xf] }
  0x2c   : > { %1125 = vrot.lane.b32.xlu2 %v1707_v1, %s1782_s26  ;;  %v459_v15 = vrot.slane %v458_v12, 4  ;;  %v468_v34 = vrot.slane %v466_v24, 4  ;;  %v471_v35 = vrot.slane %v469_v25, 5  ;;  %v475_v36 = vshll.u32 %v375_v31, 16  ;;  %v1747_v54 = vld [vmem:[%s1832_s25 + $0x74] sm:$0xf0] }
  0x2d   : > { %v450_v16 = vsel %vm1877_vm4, %v445_v14, %v449_v11  ;;  %v482_v37 = vrot.slane %v480_v26, 4  ;;  %v485_v38 = vrot.slane %v483_v27, 5  ;;  %v489_v39 = vshll.u32 %v377_v33, 16  ;;  %v1665_v56 = vld [vmem:[%s1832_s25 + $0x10] sm:$0xf] }
  0x2e   : > { %v464_v17 = vsel %vm1877_vm4, %v459_v15, %v463_v13  ;;  %v499_v18 = vunpack.c.l.b16 %v450_v16  ;;  %v472_v40 = vor.u32 %v471_v35, %v468_v34  ;;  %v477_v41 = vrot.slane %v475_v36, 5  ;;  %v1752_v57 = vld [vmem:[%s1832_s25 + $0x1c] sm:$0xf0]  ;;  %v1633_v63 = vld [vmem:[%s1832_s25 + $0x8] sm:$0xf] }
  0x2f   : > { %v500_v19 = vunpack.c.l.b16 %v464_v17  ;;  %v486_v42 = vor.u32 %v485_v38, %v482_v37  ;;  %v491_v43 = vrot.slane %v489_v39, 5  ;;  %v1599_v55 = vor.u32 %v1747_v54, %v1598_v53  ;;  %v1635_v0 = vld [vmem:[%s1832_s25 + $0x18] sm:$0xf]  ;;  %v1634_v6 = vld [vmem:[%s1832_s25 + $0xc] sm:$0x1] }
  0x30   : > { %v473_v44 = vrot.slane %v472_v40, 4  ;;  %v1666_v59 = vor.u32 %v1752_v57, %v1665_v56  ;;  %v797_v2 = vshrl.u32 %v1633_v63, 16  ;;  %v800_v3 = vshll.u32 %v1633_v63, 16  ;;  %v1669_v8 = vld [vmem:[%s1832_s25 + $0x30] sm:$0xf] }
  0x31   : > { %v505_v20 = vpack.c.b16 %v500_v19, %v499_v18  ;;  %v487_v45 = vrot.slane %v486_v42, 4  ;;  %v811_v4 = vshrl.u32 %v1635_v0, 16  ;;  %v814_v5 = vshll.u32 %v1635_v0, 16  ;;  %v1753_v9 = vld [vmem:[%s1832_s25 + $0x3c] sm:$0xf0] }
  0x32   : > { %v478_v46 = vsel %vm1877_vm4, %v473_v44, %v477_v41  ;;  %v799_v7 = vrot.slane %v797_v2, 4  ;;  %v802_v10 = vrot.slane %v800_v3, 5  ;;  %v1712_v12 = vld [vmem:[%s1832_s25 + $0x10] sm:$0xf]  ;;  %v1714_v13 = vld [vmem:[%s1832_s25 + $0x20] sm:$0xf]  ;;  %v1670_v19 = vor.u32 %v1753_v9, %v1669_v8 }
  0x33   : > { %v492_v47 = vsel %vm1877_vm4, %v487_v45, %v491_v43  ;;  %v501_v48 = vunpack.c.l.b16 %v478_v46  ;;  %v813_v11 = vrot.slane %v811_v4, 4  ;;  %v816_v14 = vrot.slane %v814_v5, 5  ;;  %v1636_v18 = vld [vmem:[%s1832_s25 + $0x1c] sm:$0x1]  ;;  %v1713_v25 = vld [vmem:[%s1832_s25 + $0x14] sm:$0x1] }
  0x34   : > { %v502_v49 = vunpack.c.l.b16 %v492_v47  ;;  %v1212_v15 = vshrl.u32 %v1712_v12, 16  ;;  %v1215_v16 = vshll.u32 %v1712_v12, 16  ;;  %v1226_v17 = vshrl.u32 %v1714_v13, 16  ;;  %v1715_v26 = vld [vmem:[%s1832_s25 + $0x24] sm:$0x1] }
  0x35   : > { %v806_v21 = vshll.u32 %v1634_v6, 16  ;;  %v803_v24 = vor.u32 %v802_v10, %v799_v7  ;;  %v817_v29 = vor.u32 %v816_v14, %v813_v11  ;;  %v820_v30 = vshll.u32 %v1636_v18, 16  ;;  %v1637_v38 = vld [vmem:[%s1832_s25 + $0x28] sm:$0xf]  ;;  %v1639_v41 = vld [vmem:[%s1832_s25 + $0x38] sm:$0xf] }
  0x36   : > { %v1214_v22 = vrot.slane %v1212_v15, 4  ;;  %v1228_v27 = vrot.slane %v1226_v17, 4  ;;  %v1235_v35 = vshll.u32 %v1715_v26, 16  ;;  %v825_v47 = vshrl.u32 %v1637_v38, 16  ;;  %v1638_v54 = vld [vmem:[%s1832_s25 + $0x2c] sm:$0x1] }
  0x37   : > { %v804_v36 = vrot.slane %v803_v24, 4  ;;  %v808_v37 = vrot.slane %v806_v21, 5  ;;  %v818_v39 = vrot.slane %v817_v29, 4  ;;  %v822_v40 = vrot.slane %v820_v30, 5  ;;  %v1716_v3 = vld [vmem:[%s1832_s25 + $0x30] sm:$0xf] }
  0x38   : > { %1572 = vmatmul.msk.bf16.gmra.mxu2 %vm201_vm1, %v504_v50  ;;  %v506_v50 = vpack.c.b16 %v502_v49, %v501_v48  ;;  %v1237_v46 = vrot.slane %v1235_v35, 5  ;;  %v828_v48 = vshll.u32 %v1637_v38, 16  ;;  %v1718_v4 = vld [vmem:[%s1832_s25 + $0x40] sm:$0xf]  ;;  %v1240_v6 = vshrl.u32 %v1716_v3, 16 }
  0x39   : > { %1601 = vmatmul.msk.bf16.gmra.mxu3 %vm201_vm1, %v1591_v60  ;;  %v809_v49 = vsel %vm1877_vm4, %v804_v36, %v808_v37  ;;  %v1243_v7 = vshll.u32 %v1716_v3, 16  ;;  %v1254_v8 = vshrl.u32 %v1718_v4, 16  ;;  %v1257_v10 = vshll.u32 %v1718_v4, 16  ;;  %v1717_v17 = vld [vmem:[%s1832_s25 + $0x34] sm:$0x1] }
  0x3a   : > { %v910_v57 = vunpack.c.l.b16 %v809_v49  ;;  %v834_v11 = vshll.u32 %v1638_v54, 16  ;;  %v1719_v18 = vld [vmem:[%s1832_s25 + $0x44] sm:$0x1]  ;;  %v1249_v24 = vshll.u32 %v1717_v17, 16  ;;  %v1641_v30 = vld [vmem:[%s1832_s25 + $0x48] sm:$0xf] }
  0x3b   : > { %v1245_v14 = vrot.slane %v1243_v7, 5  ;;  %v1263_v26 = vshll.u32 %v1719_v18, 16  ;;  %v1755_v54 = vld [vmem:[%s1832_s25 + $0x7c] sm:$0xf0] }
  0x3c   : > { %v1251_v36 = vrot.slane %v1249_v24, 5 }
  0x48   : > { %1573 = vmatmul.msk.bf16.gmra.mxu2 %vm201_vm1, %v505_v20  ;;  %v1229_v20 = vshll.u32 %v1714_v13, 16  ;;  %v1242_v13 = vrot.slane %v1240_v6, 4 }
  0x49   : > { %1602 = vmatmul.msk.bf16.gmra.mxu3 %vm201_vm1, %v1595_v32  ;;  %v1221_v32 = vshll.u32 %v1713_v25, 16 }
  0x4b   : > { %v1223_v44 = vrot.slane %v1221_v32, 5 }
  0x58   : > { %1574 = vmatmul.msk.bf16.gmra.mxu2 %vm201_vm1, %v506_v50  ;;  %v839_v50 = vshrl.u32 %v1639_v41, 16 }
  0x59   : > { %1603 = vmatmul.msk.bf16.gmra.mxu3 %vm201_vm1, %v1599_v55  ;;  %v1640_v55 = vld [vmem:[%s1832_s25 + $0x3c] sm:$0x1] }
  0x5a   : > { %v841_v0 = vrot.slane %v839_v50, 4  ;;  %v848_v12 = vshll.u32 %v1640_v55, 16 }
  0x5c   : > { %v850_v29 = vrot.slane %v848_v12, 5 }
  0x68   : > { %1679 = vmatmul.msk.bf16.vlgmr.msra.gmra.mxu2 %vm201_vm1, %v1666_v59  ;;  %v830_v59 = vrot.slane %v828_v48, 5  ;;  %v1644_v48 = vld [vmem:[%s1832_s25 + $0x5c] sm:$0x1] }
  0x69   : > { %v876_v6 = vshll.u32 %v1644_v48, 16 }
  0x6e   : > { %v707_v52 = vpop.permute.xlu2 %706 }
  0x76   : > { %v293_v58 = vpop.permute.xlu2 %292 }
  0x78   : > { %1680 = vmatmul.msk.bf16.gmra.mxu2 %vm201_vm1, %v1670_v19  ;;  %v1256_v19 = vrot.slane %v1254_v8, 4 }
  0x7e   : > { %v1120_v1 = vpop.permute.xlu2 %1119 }
  0x7f   : > { %1708 = vmatmul.msk.bf16.vlgmr.msra.gmra.mxu3 %vm201_vm1, %v1120_v1 }
  0x84   : > { %v287_v23 = vpop.permute.xlu0 %286 }
  0x85   : > { %1566 = vmatmul.msk.bf16.vlgmr.msrb.gmra.mxu1 %vm201_vm1, %v287_v23  ;;  %v705_v28 = vpop.permute.xlu1 %704  ;;  %v1217_v23 = vrot.slane %v1215_v16, 5 }
  0x86   : > { %1629 = vmatmul.msk.bf16.vlgmr.msrb.gmra.mxu0 %vm201_vm1, %v705_v28  ;;  %v1231_v28 = vrot.slane %v1229_v20, 5  ;;  %v1259_v20 = vrot.slane %v1257_v10, 5 }
  0x87   : > { %v1218_v31 = vor.u32 %v1217_v23, %v1214_v22  ;;  %v1246_v23 = vor.u32 %v1245_v14, %v1242_v13  ;;  %v1721_v13 = vld [vmem:[%s1832_s25 + $0x54] sm:$0x1]  ;;  %v1723_v14 = vld [vmem:[%s1832_s25 + $0x64] sm:$0x1] }
  0x88   : > { %v1232_v34 = vor.u32 %v1231_v28, %v1228_v27  ;;  %v1260_v25 = vor.u32 %v1259_v20, %v1256_v19  ;;  %v836_v28 = vrot.slane %v834_v11, 5  ;;  %v1277_v18 = vshll.u32 %v1721_v13, 16 }
  0x89   : > { %v1219_v43 = vrot.slane %v1218_v31, 4  ;;  %v1247_v35 = vrot.slane %v1246_v23, 4  ;;  %v1291_v19 = vshll.u32 %v1723_v14, 16 }
  0x8a   : > { %v1233_v45 = vrot.slane %v1232_v34, 4  ;;  %v1261_v38 = vrot.slane %v1260_v25, 4  ;;  %v1645_v25 = vld [vmem:[%s1832_s25 + $0x68] sm:$0xf] }
  0x8b   : > { %v1224_v53 = vsel %vm1877_vm4, %v1219_v43, %v1223_v44 }
  0x8c   : > { %v289_v51 = vpop.permute.xlu0 %288  ;;  %v1238_v56 = vsel %vm1877_vm4, %v1233_v45, %v1237_v46  ;;  %v1325_v2 = vunpack.c.l.b16 %v1224_v53  ;;  %v1252_v46 = vsel %vm1877_vm4, %v1247_v35, %v1251_v36  ;;  %v1677_v53 = vld [vmem:[%s1832_s25 + $0x70] sm:$0xf]  ;;  %v881_v35 = vshrl.u32 %v1645_v25, 16 }
  0x8d   : > { %v291_v60 = vpop.permute.xlu1 %290  ;;  %v1326_v5 = vunpack.c.l.b16 %v1238_v56  ;;  %v1678_v4 = vor.u32 %v1755_v54, %v1677_v53  ;;  %v884_v36 = vshll.u32 %v1645_v25, 16  ;;  %v1724_v53 = vld [vmem:[%s1832_s25 + $0x70] sm:$0xf]  ;;  %v1726_v54 = vld [vmem:[%s1832_s25 + $0x80] sm:$0xf] }
  0x8f   : > { %v1333_v22 = vpack.c.b16 %v1326_v5, %v1325_v2 }
  0x93   : > { %v232_v31 = vpop.f32.mrf.mxu1 }
  0x94   : > { %v709_v61 = vpop.permute.xlu0 %708  ;;  %250 = vst.msk [vmem:[#allocation2 + $0x10] sm:$0xff] %vm247_vm5, %v232_v31 }
  0x95   : > { %1567 = vmatmul.msk.bf16.gmra.mxu1 %vm201_vm1, %v289_v51  ;;  %v711_v33 = vpop.permute.xlu1 %710  ;;  %v842_v51 = vshll.u32 %v1639_v41, 16  ;;  %v856_v41 = vshll.u32 %v1641_v30, 16 }
  0x96   : > { %1630 = vmatmul.msk.bf16.gmra.mxu0 %vm201_vm1, %v707_v52  ;;  %v823_v52 = vsel %vm1877_vm4, %v818_v39, %v822_v40  ;;  %v1265_v39 = vrot.slane %v1263_v26, 5  ;;  %v853_v40 = vshrl.u32 %v1641_v30, 16  ;;  %v1647_v26 = vld [vmem:[%s1832_s25 + $0x78] sm:$0xf]  ;;  %v1279_v30 = vrot.slane %v1277_v18, 5 }
  0x97   : > { %v911_v63 = vunpack.c.l.b16 %v823_v52  ;;  %v844_v1 = vrot.slane %v842_v51, 5  ;;  %v858_v52 = vrot.slane %v856_v41, 5 }
  0x98   : > { %v1266_v49 = vsel %vm1877_vm4, %v1261_v38, %v1265_v39  ;;  %v855_v51 = vrot.slane %v853_v40, 4  ;;  %v895_v39 = vshrl.u32 %v1647_v26, 16  ;;  %v898_v40 = vshll.u32 %v1647_v26, 16 }
  0x99   : > { %v918_v15 = vpack.c.b16 %v911_v63, %v910_v57  ;;  %v845_v21 = vor.u32 %v844_v1, %v841_v0  ;;  %v1328_v63 = vunpack.c.l.b16 %v1266_v49 }
  0x9a   : > { %v859_v11 = vor.u32 %v858_v52, %v855_v51  ;;  %v897_v48 = vrot.slane %v895_v39, 4  ;;  %v900_v49 = vrot.slane %v898_v40, 5 }
  0x9b   : > { %v846_v32 = vrot.slane %v845_v21, 4  ;;  %v237_v37 = vpop.f32.mrf.mxu2 }
  0x9c   : > { %v1122_v42 = vpop.permute.xlu0 %1121  ;;  %252 = vst.msk [vmem:[#allocation2 + $0x20] sm:$0xff] %vm247_vm5, %v237_v37  ;;  %v860_v23 = vrot.slane %v859_v11, 4 }
  0x9d   : > { %1709 = vmatmul.msk.bf16.gmra.mxu3 %vm201_vm1, %v1122_v42  ;;  %v1124_v34 = vpop.permute.xlu1 %1123  ;;  %v851_v45 = vsel %vm1877_vm4, %v846_v32, %v850_v29  ;;  %v1293_v32 = vrot.slane %v1291_v19, 5 }
  0x9e   : > { %v913_v55 = vunpack.c.l.b16 %v851_v45  ;;  %v1646_v45 = vld [vmem:[%s1832_s25 + $0x6c] sm:$0x1] }
  0xa5   : > { %1568 = vmatmul.msk.bf16.gmra.mxu1 %vm201_vm1, %v291_v60  ;;  %v1673_v60 = vld [vmem:[%s1832_s25 + $0x50] sm:$0xf] }
  0xa6   : > { %1631 = vmatmul.msk.bf16.gmra.mxu0 %vm201_vm1, %v709_v61  ;;  %v1754_v61 = vld [vmem:[%s1832_s25 + $0x5c] sm:$0xf0] }
  0xa7   : > { %v1674_v9 = vor.u32 %v1754_v61, %v1673_v60  ;;  %v1720_v60 = vld [vmem:[%s1832_s25 + $0x50] sm:$0xf]  ;;  %v1722_v61 = vld [vmem:[%s1832_s25 + $0x60] sm:$0xf] }
  0xa8   : > { %v1268_v0 = vshrl.u32 %v1720_v60, 16  ;;  %v1271_v1 = vshll.u32 %v1720_v60, 16  ;;  %v1282_v2 = vshrl.u32 %v1722_v61, 16  ;;  %v1285_v5 = vshll.u32 %v1722_v61, 16 }
  0xa9   : > { %1681 = vmatmul.msk.bf16.gmra.mxu2 %vm201_vm1, %v1674_v9 }
  0xaa   : > { %v1270_v7 = vrot.slane %v1268_v0, 4  ;;  %v1273_v8 = vrot.slane %v1271_v1, 5  ;;  %v1284_v9 = vrot.slane %v1282_v2, 4  ;;  %v890_v2 = vshll.u32 %v1646_v45, 16 }
  0xac   : > { %v1274_v17 = vor.u32 %v1273_v8, %v1270_v7  ;;  %v892_v14 = vrot.slane %v890_v2, 5 }
  0xad   : > { %1710 = vmatmul.msk.bf16.gmra.mxu3 %vm201_vm1, %v1124_v34  ;;  %v242_v34 = vpop.f32.mrf.mxu3 }
  0xae   : > { %v1275_v29 = vrot.slane %v1274_v17, 4  ;;  %254 = vst.msk [vmem:[#allocation2 + $0x30] sm:$0xff] %vm247_vm5, %v242_v34 }
  0xb0   : > { %v1280_v41 = vsel %vm1877_vm4, %v1275_v29, %v1279_v30 }
  0xb5   : > { %1569 = vmatmul.msk.bf16.gmra.mxu1 %vm201_vm1, %v293_v58  ;;  %v827_v58 = vrot.slane %v825_v47, 4  ;;  %v1642_v47 = vld [vmem:[%s1832_s25 + $0x4c] sm:$0x1]  ;;  %v244_v17 = vpop.f32.mrf.mxu3 }
  0xb6   : > { %1632 = vmatmul.msk.bf16.gmra.mxu0 %vm201_vm1, %v711_v33  ;;  %v1643_v33 = vld [vmem:[%s1832_s25 + $0x58] sm:$0xf]  ;;  %v862_v3 = vshll.u32 %v1642_v47, 16  ;;  %v886_v47 = vrot.slane %v884_v36, 5  ;;  %255 = vst.msk [vmem:[#allocation2 + $0x38] sm:$0xff] %vm247_vm5, %v244_v17 }
  0xb7   : > { %v831_v16 = vor.u32 %v830_v59, %v827_v58  ;;  %v867_v43 = vshrl.u32 %v1643_v33, 16  ;;  %v870_v44 = vshll.u32 %v1643_v33, 16  ;;  %v1327_v58 = vunpack.c.l.b16 %v1252_v46  ;;  %v234_v59 = vpop.f32.mrf.mxu1  ;;  %v239_v33 = vpop.f32.mrf.mxu2 }
  0xb8   : > { %251 = vst.msk [vmem:[#allocation2 + $0x18] sm:$0xff] %vm247_vm5, %v234_v59  ;;  %v864_v21 = vrot.slane %v862_v3, 5  ;;  %v883_v46 = vrot.slane %v881_v35, 4  ;;  %v1648_v59 = vld [vmem:[%s1832_s25 + $0x7c] sm:$0x1] }
  0xb9   : > { %v832_v27 = vrot.slane %v831_v16, 4  ;;  %v869_v56 = vrot.slane %v867_v43, 4  ;;  %v872_v57 = vrot.slane %v870_v44, 5  ;;  %v1334_v16 = vpack.c.b16 %v1328_v63, %v1327_v58  ;;  %1682 = vmatmul.msk.bf16.gmra.mxu2 %vm201_vm1, %v1678_v4  ;;  %253 = vst.msk [vmem:[#allocation2 + $0x28] sm:$0xff] %vm247_vm5, %v239_v33  ;;  %v1725_v3 = vld [vmem:[%s1832_s25 + $0x74] sm:$0x1] }
  0xba   : > { %v865_v37 = vsel %vm1877_vm4, %v860_v23, %v864_v21  ;;  %v1313_v58 = vshll.u32 %v1726_v54, 16  ;;  %v1727_v4 = vld [vmem:[%s1832_s25 + $0x84] sm:$0x1]  ;;  %v904_v7 = vshll.u32 %v1648_v59, 16 }
  0xbb   : > { %v837_v42 = vsel %vm1877_vm4, %v832_v27, %v836_v28  ;;  %v873_v12 = vor.u32 %v872_v57, %v869_v56  ;;  %v227_v27 = vpop.f32.mrf.mxu0  ;;  %v1126_v28 = vpop.permute.xlu2 %1125  ;;  %v914_v43 = vunpack.c.l.b16 %v865_v37  ;;  %v1299_v56 = vshll.u32 %v1724_v53, 16 }
  0xbc   : > { %v912_v50 = vunpack.c.l.b16 %v837_v42  ;;  %248 = vst.msk [vmem:[#allocation2] sm:$0xff] %vm247_vm5, %v227_v27  ;;  %v1310_v57 = vshrl.u32 %v1726_v54, 16  ;;  %v1315_v0 = vrot.slane %v1313_v58, 5 }
  0xbd   : > { %v874_v24 = vrot.slane %v873_v12, 4  ;;  %1711 = vmatmul.msk.bf16.gmra.mxu3 %vm201_vm1, %v1126_v28  ;;  %v1301_v61 = vrot.slane %v1299_v56, 5  ;;  %v1319_v12 = vshll.u32 %v1727_v4, 16  ;;  %v630_v34 = vpop.f32.mrf.mxu3 }
  0xbe   : > { %v919_v10 = vpack.c.b16 %v913_v55, %v912_v50  ;;  %v1329_v50 = vunpack.c.l.b16 %v1280_v41  ;;  %v1296_v55 = vshrl.u32 %v1724_v53, 16  ;;  %v1312_v63 = vrot.slane %v1310_v57, 4 }
  0xbf   : > { %v1321_v21 = vrot.slane %v1319_v12, 5  ;;  %v531_v28 = vpop.f32.mrf.mxu2  ;;  %v341_v59 = vld [vmem:[#allocation2 + $0x18] sm:$0xff] }
  0xc0   : > { %v1298_v60 = vrot.slane %v1296_v55, 4  ;;  %v1316_v11 = vor.u32 %v1315_v0, %v1312_v63 }
  0xc3   : > { %v229_v52 = vpop.f32.mrf.mxu0  ;;  %v338_v35 = vld [vmem:[#allocation2] sm:$0xff] }
  0xc4   : > { %249 = vst.msk [vmem:[#allocation2 + $0x8] sm:$0xff] %vm247_vm5, %v229_v52 }
  0xc5   : > { %1650 = vmatmul.msk.bf16.vlgmr.msra.gmra.mxu1 %vm201_vm1, %v918_v15  ;;  %v1287_v15 = vrot.slane %v1285_v5, 5  ;;  %v887_v5 = vor.u32 %v886_v47, %v883_v46  ;;  %v632_v37 = vpop.f32.mrf.mxu3 }
  0xc6   : > { %1729 = vmatmul.msk.bf16.vlgmr.msra.gmra.mxu0 %vm201_vm1, %v1333_v22  ;;  %v878_v22 = vrot.slane %v876_v6, 5  ;;  %v901_v6 = vor.u32 %v900_v49, %v897_v48  ;;  %v340_v49 = vld [vmem:[#allocation2 + $0x10] sm:$0xff] }
  0xc7   : > { %v1288_v20 = vor.u32 %v1287_v15, %v1284_v9  ;;  %v1302_v9 = vor.u32 %v1301_v61, %v1298_v60  ;;  %v888_v13 = vrot.slane %v887_v5, 4  ;;  %v533_v33 = vpop.f32.mrf.mxu2 }
  0xc8   : > { %v879_v38 = vsel %vm1877_vm4, %v874_v24, %v878_v22  ;;  %v902_v15 = vrot.slane %v901_v6, 4 }
  0xc9   : > { %v1289_v31 = vrot.slane %v1288_v20, 4  ;;  %v915_v44 = vunpack.c.l.b16 %v879_v38  ;;  %v1303_v18 = vrot.slane %v1302_v9, 4  ;;  %v1317_v20 = vrot.slane %v1316_v11, 4 }
  0xca   : > { %v893_v22 = vsel %vm1877_vm4, %v888_v13, %v892_v14 }
  0xcb   : > { %v1294_v42 = vsel %vm1877_vm4, %v1289_v31, %v1293_v32  ;;  %v920_v1 = vpack.c.b16 %v915_v44, %v914_v43  ;;  %v1322_v25 = vsel %vm1877_vm4, %v1317_v20, %v1321_v21  ;;  %v916_v26 = vunpack.c.l.b16 %v893_v22  ;;  %v339_v40 = vld [vmem:[#allocation2 + $0x8] sm:$0xff] }
  0xcc   : > { %v1330_v51 = vunpack.c.l.b16 %v1294_v42  ;;  %v1332_v30 = vunpack.c.l.b16 %v1322_v25 }
  0xcd   : > { %v635_v44 = vpop.f32.mrf.mxu3 }
  0xce   : > { %v1335_v8 = vpack.c.b16 %v1330_v51, %v1329_v50 }
  0xcf   : > { %v536_v36 = vpop.f32.mrf.mxu2 }
  0xd5   : > { %1651 = vmatmul.msk.bf16.gmra.mxu1 %vm201_vm1, %v919_v10  ;;  %v1305_v10 = vshll.u32 %v1725_v3, 16  ;;  %v637_v54 = vpop.f32.mrf.mxu3 }
  0xd6   : > { %1730 = vmatmul.msk.bf16.gmra.mxu0 %vm201_vm1, %v1334_v16  ;;  %v906_v16 = vrot.slane %v904_v7, 5  ;;  %v342_v7 = vld [vmem:[#allocation2 + $0x20] sm:$0xff] }
  0xd7   : > { %v1307_v19 = vrot.slane %v1305_v10, 5  ;;  %v538_v43 = vpop.f32.mrf.mxu2 }
  0xd8   : > { %v907_v23 = vsel %vm1877_vm4, %v902_v15, %v906_v16 }
  0xd9   : > { %v1308_v24 = vsel %vm1877_vm4, %v1303_v18, %v1307_v19  ;;  %v917_v27 = vunpack.c.l.b16 %v907_v23  ;;  %v343_v19 = vld [vmem:[#allocation2 + $0x28] sm:$0xff] }
  0xda   : > { %v1331_v29 = vunpack.c.l.b16 %v1308_v24 }
  0xdb   : > { %v921_v31 = vpack.c.b16 %v917_v27, %v916_v26 }
  0xdc   : > { %v1336_v32 = vpack.c.b16 %v1332_v30, %v1331_v29  ;;  %v344_v29 = vld [vmem:[#allocation2 + $0x30] sm:$0xff] }
  0xdd   : > { %v640_v3 = vpop.f32.mrf.mxu3 }
  0xdf   : > { %v541_v53 = vpop.f32.mrf.mxu2 }
  0xe5   : > { %1652 = vmatmul.msk.bf16.gmra.mxu1 %vm201_vm1, %v920_v1  ;;  %v642_v17 = vpop.f32.mrf.mxu3 }
  0xe6   : > { %1731 = vmatmul.msk.bf16.gmra.mxu0 %vm201_vm1, %v1335_v8 }
  0xe7   : > { %v543_v2 = vpop.f32.mrf.mxu2 }
  0xef   : > { %v546_v16 = vpop.f32.mrf.mxu2 }
  0xf5   : > { %1653 = vmatmul.msk.bf16.gmra.mxu1 %vm201_vm1, %v921_v31 }
  0xf6   : > { %1732 = vmatmul.msk.bf16.gmra.mxu0 %vm201_vm1, %v1336_v32  ;;  %v645_v32 = vpop.f32.mrf.mxu3 }
  0xf7   : > { %v548_v31 = vpop.f32.mrf.mxu2 }
 0x102   : > { %v318_v38 = vpop.f32.mrf.mxu1 }
 0x103   : > { %v346_v39 = vadd.f32 %v338_v35, %v318_v38  ;;  %v736_v62 = vpop.f32.mrf.mxu0 }
 0x105   : > { %354 = vst.msk [vmem:[#allocation2] sm:$0xff] %vm247_vm5, %v346_v39 }
 0x10a   : > { %v320_v41 = vpop.f32.mrf.mxu1 }
 0x10b   : > { %v347_v42 = vadd.f32 %v339_v40, %v320_v41  ;;  %v738_v47 = vpop.f32.mrf.mxu0  ;;  %v345_v40 = vld [vmem:[#allocation2 + $0x38] sm:$0xff] }
 0x10c   : > { %v551_v45 = vld [vmem:[#allocation2] sm:$0xff] }
 0x10d   : > { %v559_v46 = vadd.f32 %v551_v45, %v531_v28  ;;  %355 = vst.msk [vmem:[#allocation2 + $0x8] sm:$0xff] %vm247_vm5, %v347_v42  ;;  %v647_v45 = vpop.f32.mrf.mxu3 }
 0x10f   : > { %567 = vst.msk [vmem:[#allocation2] sm:$0xff] %vm247_vm5, %v559_v46 }
 0x112   : > { %v323_v48 = vpop.f32.mrf.mxu1 }
 0x113   : > { %v348_v50 = vadd.f32 %v340_v49, %v323_v48  ;;  %v741_v57 = vpop.f32.mrf.mxu0 }
 0x114   : > { %v552_v51 = vld [vmem:[#allocation2 + $0x8] sm:$0xff] }
 0x115   : > { %v560_v52 = vadd.f32 %v552_v51, %v533_v33  ;;  %356 = vst.msk [vmem:[#allocation2 + $0x10] sm:$0xff] %vm247_vm5, %v348_v50 }
 0x116   : > { %v650_v55 = vld [vmem:[#allocation2] sm:$0xff] }
 0x117   : > { %568 = vst.msk [vmem:[#allocation2 + $0x8] sm:$0xff] %vm247_vm5, %v560_v52  ;;  %v658_v56 = vadd.f32 %v650_v55, %v630_v34 }
 0x119   : > { %666 = vst.msk [vmem:[#allocation2] sm:$0xff] %vm247_vm5, %v658_v56 }
 0x11a   : > { %v325_v58 = vpop.f32.mrf.mxu1 }
 0x11b   : > { %v349_v60 = vadd.f32 %v341_v59, %v325_v58  ;;  %v743_v8 = vpop.f32.mrf.mxu0  ;;  %v1151_v59 = vpop.f32.mrf.mxu3 }
 0x11c   : > { %v553_v61 = vld [vmem:[#allocation2 + $0x10] sm:$0xff] }
 0x11d   : > { %v561_v63 = vadd.f32 %v553_v61, %v536_v36  ;;  %357 = vst.msk [vmem:[#allocation2 + $0x18] sm:$0xff] %vm247_vm5, %v349_v60 }
 0x11e   : > { %v651_v0 = vld [vmem:[#allocation2 + $0x8] sm:$0xff] }
 0x11f   : > { %569 = vst.msk [vmem:[#allocation2 + $0x10] sm:$0xff] %vm247_vm5, %v561_v63  ;;  %v659_v1 = vadd.f32 %v651_v0, %v632_v37 }
 0x120   : > { %v756_v4 = vld [vmem:[#allocation2] sm:$0xff] }
 0x121   : > { %v764_v5 = vadd.f32 %v756_v4, %v736_v62  ;;  %667 = vst.msk [vmem:[#allocation2 + $0x8] sm:$0xff] %vm247_vm5, %v659_v1 }
 0x122   : > { %v328_v6 = vpop.f32.mrf.mxu1 }
 0x123   : > { %772 = vst.msk [vmem:[#allocation2] sm:$0xff] %vm247_vm5, %v764_v5  ;;  %v350_v9 = vadd.f32 %v342_v7, %v328_v6  ;;  %v746_v20 = vpop.f32.mrf.mxu0 }
 0x124   : > { %v554_v10 = vld [vmem:[#allocation2 + $0x18] sm:$0xff] }
 0x125   : > { %v562_v11 = vadd.f32 %v554_v10, %v538_v43  ;;  %358 = vst.msk [vmem:[#allocation2 + $0x20] sm:$0xff] %vm247_vm5, %v350_v9  ;;  %v1153_v10 = vpop.f32.mrf.mxu3 }
 0x126   : > { %v652_v12 = vld [vmem:[#allocation2 + $0x10] sm:$0xff] }
 0x127   : > { %570 = vst.msk [vmem:[#allocation2 + $0x18] sm:$0xff] %vm247_vm5, %v562_v11  ;;  %v660_v13 = vadd.f32 %v652_v12, %v635_v44  ;;  %v1045_v44 = vpop.f32.mrf.mxu2 }
 0x128   : > { %v757_v14 = vld [vmem:[#allocation2 + $0x8] sm:$0xff] }
 0x129   : > { %v765_v15 = vadd.f32 %v757_v14, %v738_v47  ;;  %668 = vst.msk [vmem:[#allocation2 + $0x10] sm:$0xff] %vm247_vm5, %v660_v13 }
 0x12a   : > { %v330_v18 = vpop.f32.mrf.mxu1  ;;  %v966_v52 = vld [vmem:[#allocation2] sm:$0xff] }
 0x12b   : > { %773 = vst.msk [vmem:[#allocation2 + $0x8] sm:$0xff] %vm247_vm5, %v765_v15  ;;  %v351_v21 = vadd.f32 %v343_v19, %v330_v18  ;;  %v748_v34 = vpop.f32.mrf.mxu0 }
 0x12c   : > { %v555_v22 = vld [vmem:[#allocation2 + $0x20] sm:$0xff] }
 0x12d   : > { %v563_v23 = vadd.f32 %v555_v22, %v541_v53  ;;  %359 = vst.msk [vmem:[#allocation2 + $0x28] sm:$0xff] %vm247_vm5, %v351_v21 }
 0x12e   : > { %v653_v24 = vld [vmem:[#allocation2 + $0x18] sm:$0xff] }
 0x12f   : > { %571 = vst.msk [vmem:[#allocation2 + $0x20] sm:$0xff] %vm247_vm5, %v563_v23  ;;  %v661_v25 = vadd.f32 %v653_v24, %v637_v54  ;;  %v1047_v58 = vpop.f32.mrf.mxu2 }
 0x130   : > { %v758_v26 = vld [vmem:[#allocation2 + $0x10] sm:$0xff] }
 0x131   : > { %v766_v27 = vadd.f32 %v758_v26, %v741_v57  ;;  %669 = vst.msk [vmem:[#allocation2 + $0x18] sm:$0xff] %vm247_vm5, %v661_v25  ;;  %v1156_v25 = vpop.f32.mrf.mxu3 }
 0x132   : > { %v333_v28 = vpop.f32.mrf.mxu1  ;;  %v967_v1 = vld [vmem:[#allocation2 + $0x8] sm:$0xff] }
 0x133   : > { %774 = vst.msk [vmem:[#allocation2 + $0x10] sm:$0xff] %vm247_vm5, %v766_v27  ;;  %v352_v30 = vadd.f32 %v344_v29, %v333_v28  ;;  %v751_v47 = vpop.f32.mrf.mxu0 }
 0x134   : > { %v556_v33 = vld [vmem:[#allocation2 + $0x28] sm:$0xff] }
 0x135   : > { %v564_v35 = vadd.f32 %v556_v33, %v543_v2  ;;  %360 = vst.msk [vmem:[#allocation2 + $0x30] sm:$0xff] %vm247_vm5, %v352_v30 }
 0x136   : > { %v654_v36 = vld [vmem:[#allocation2 + $0x20] sm:$0xff] }
 0x137   : > { %572 = vst.msk [vmem:[#allocation2 + $0x28] sm:$0xff] %vm247_vm5, %v564_v35  ;;  %v662_v37 = vadd.f32 %v654_v36, %v640_v3  ;;  %v1050_v9 = vpop.f32.mrf.mxu2 }
 0x138   : > { %v759_v38 = vld [vmem:[#allocation2 + $0x18] sm:$0xff] }
 0x139   : > { %v767_v39 = vadd.f32 %v759_v38, %v743_v8  ;;  %670 = vst.msk [vmem:[#allocation2 + $0x20] sm:$0xff] %vm247_vm5, %v662_v37 }
 0x13a   : > { %v335_v62 = vpop.f32.mrf.mxu1  ;;  %v968_v12 = vld [vmem:[#allocation2 + $0x10] sm:$0xff] }
 0x13b   : > { %775 = vst.msk [vmem:[#allocation2 + $0x18] sm:$0xff] %vm247_vm5, %v767_v39  ;;  %v353_v41 = vadd.f32 %v345_v40, %v335_v62  ;;  %v753_v61 = vpop.f32.mrf.mxu0  ;;  %v1158_v39 = vpop.f32.mrf.mxu3 }
 0x13c   : > { %v557_v42 = vld [vmem:[#allocation2 + $0x30] sm:$0xff] }
 0x13d   : > { %v565_v43 = vadd.f32 %v557_v42, %v546_v16  ;;  %361 = vst.msk [vmem:[#allocation2 + $0x38] sm:$0xff] %vm247_vm5, %v353_v41  ;;  %v2107_v41 = vld [vmem:[%s2165_s2] ss:$0 sm:$0xff] }
 0x13e   : > { %v655_v46 = vld [vmem:[#allocation2 + $0x28] sm:$0xff] }
 0x13f   : > { %573 = vst.msk [vmem:[#allocation2 + $0x30] sm:$0xff] %vm247_vm5, %v565_v43  ;;  %v663_v48 = vadd.f32 %v655_v46, %v642_v17  ;;  %v1052_v24 = vpop.f32.mrf.mxu2 }
 0x140   : > { %v760_v49 = vld [vmem:[#allocation2 + $0x20] sm:$0xff] }
 0x141   : > { %671 = vst.msk [vmem:[#allocation2 + $0x28] sm:$0xff] %vm247_vm5, %v663_v48  ;;  %v768_v50 = vadd.f32 %v760_v49, %v746_v20 }
 0x142   : > { %v946_v51 = vpop.f32.mrf.mxu1  ;;  %v969_v22 = vld [vmem:[#allocation2 + $0x18] sm:$0xff] }
 0x143   : > { %776 = vst.msk [vmem:[#allocation2 + $0x20] sm:$0xff] %vm247_vm5, %v768_v50  ;;  %v974_v53 = vadd.f32 %v966_v52, %v946_v51  ;;  %v1361_v13 = vpop.f32.mrf.mxu0 }
 0x144   : > { %v558_v54 = vld [vmem:[#allocation2 + $0x38] sm:$0xff] }
 0x145   : > { %v566_v55 = vadd.f32 %v558_v54, %v548_v31  ;;  %982 = vst.msk [vmem:[#allocation2] sm:$0xff] %vm247_vm5, %v974_v53 }
 0x146   : > { %v656_v56 = vld [vmem:[#allocation2 + $0x30] sm:$0xff] }
 0x147   : > { %574 = vst.msk [vmem:[#allocation2 + $0x38] sm:$0xff] %vm247_vm5, %v566_v55  ;;  %v664_v57 = vadd.f32 %v656_v56, %v645_v32  ;;  %v1055_v38 = vpop.f32.mrf.mxu2 }
 0x148   : > { %v761_v60 = vld [vmem:[#allocation2 + $0x28] sm:$0xff] }
 0x149   : > { %672 = vst.msk [vmem:[#allocation2 + $0x30] sm:$0xff] %vm247_vm5, %v664_v57  ;;  %v769_v63 = vadd.f32 %v761_v60, %v748_v34  ;;  %v1161_v57 = vpop.f32.mrf.mxu3 }
 0x14a   : > { %v948_v0 = vpop.f32.mrf.mxu1  ;;  %v970_v34 = vld [vmem:[#allocation2 + $0x20] sm:$0xff] }
 0x14b   : > { %777 = vst.msk [vmem:[#allocation2 + $0x28] sm:$0xff] %vm247_vm5, %v769_v63  ;;  %v975_v2 = vadd.f32 %v967_v1, %v948_v0  ;;  %v1363_v27 = vpop.f32.mrf.mxu0 }
 0x14c   : > { %v1065_v3 = vld [vmem:[#allocation2] sm:$0xff] }
 0x14d   : > { %v1073_v4 = vadd.f32 %v1065_v3, %v1045_v44  ;;  %983 = vst.msk [vmem:[#allocation2 + $0x8] sm:$0xff] %vm247_vm5, %v975_v2 }
 0x14e   : > { %v657_v5 = vld [vmem:[#allocation2 + $0x38] sm:$0xff] }
 0x14f   : > { %1081 = vst.msk [vmem:[#allocation2] sm:$0xff] %vm247_vm5, %v1073_v4  ;;  %v665_v6 = vadd.f32 %v657_v5, %v647_v45  ;;  %v1057_v56 = vpop.f32.mrf.mxu2 }
 0x150   : > { %v762_v7 = vld [vmem:[#allocation2 + $0x30] sm:$0xff] }
 0x151   : > { %673 = vst.msk [vmem:[#allocation2 + $0x38] sm:$0xff] %vm247_vm5, %v665_v6  ;;  %v770_v8 = vadd.f32 %v762_v7, %v751_v47 }
 0x152   : > { %v951_v11 = vpop.f32.mrf.mxu1  ;;  %v971_v47 = vld [vmem:[#allocation2 + $0x28] sm:$0xff] }
 0x153   : > { %778 = vst.msk [vmem:[#allocation2 + $0x30] sm:$0xff] %vm247_vm5, %v770_v8  ;;  %v976_v14 = vadd.f32 %v968_v12, %v951_v11  ;;  %v1366_v40 = vpop.f32.mrf.mxu0 }
 0x154   : > { %v1066_v15 = vld [vmem:[#allocation2 + $0x8] sm:$0xff] }
 0x155   : > { %v1074_v16 = vadd.f32 %v1066_v15, %v1047_v58  ;;  %984 = vst.msk [vmem:[#allocation2 + $0x10] sm:$0xff] %vm247_vm5, %v976_v14  ;;  %v1163_v14 = vpop.f32.mrf.mxu3 }
 0x156   : > { %v1171_v17 = vld [vmem:[#allocation2] sm:$0xff] }
 0x157   : > { %1082 = vst.msk [vmem:[#allocation2 + $0x8] sm:$0xff] %vm247_vm5, %v1074_v16  ;;  %v1179_v18 = vadd.f32 %v1171_v17, %v1151_v59 }
 0x158   : > { %v763_v19 = vld [vmem:[#allocation2 + $0x38] sm:$0xff] }
 0x159   : > { %1187 = vst.msk [vmem:[#allocation2] sm:$0xff] %vm247_vm5, %v1179_v18  ;;  %v771_v20 = vadd.f32 %v763_v19, %v753_v61 }
 0x15a   : > { %v953_v21 = vpop.f32.mrf.mxu1  ;;  %v972_v1 = vld [vmem:[#allocation2 + $0x30] sm:$0xff] }
 0x15b   : > { %779 = vst.msk [vmem:[#allocation2 + $0x38] sm:$0xff] %vm247_vm5, %v771_v20  ;;  %v977_v23 = vadd.f32 %v969_v22, %v953_v21  ;;  %v1368_v60 = vpop.f32.mrf.mxu0 }
 0x15c   : > { %v1067_v26 = vld [vmem:[#allocation2 + $0x10] sm:$0xff] }
 0x15d   : > { %v1075_v28 = vadd.f32 %v1067_v26, %v1050_v9  ;;  %985 = vst.msk [vmem:[#allocation2 + $0x18] sm:$0xff] %vm247_vm5, %v977_v23 }
 0x15e   : > { %v1172_v29 = vld [vmem:[#allocation2 + $0x8] sm:$0xff] }
 0x15f   : > { %1083 = vst.msk [vmem:[#allocation2 + $0x10] sm:$0xff] %vm247_vm5, %v1075_v28  ;;  %v1180_v30 = vadd.f32 %v1172_v29, %v1153_v10 }
 0x160   : > { %v1381_v31 = vld [vmem:[#allocation2] sm:$0xff] }
 0x161   : > { %1188 = vst.msk [vmem:[#allocation2 + $0x8] sm:$0xff] %vm247_vm5, %v1180_v30  ;;  %v1389_v32 = vadd.f32 %v1381_v31, %v1361_v13  ;;  %v1060_v13 = vpop.f32.mrf.mxu2 }
 0x162   : > { %v956_v33 = vpop.f32.mrf.mxu1  ;;  %v973_v18 = vld [vmem:[#allocation2 + $0x38] sm:$0xff] }
 0x163   : > { %1397 = vst.msk [vmem:[#allocation2] sm:$0xff] %vm247_vm5, %v1389_v32  ;;  %v978_v35 = vadd.f32 %v970_v34, %v956_v33  ;;  %v1371_v16 = vpop.f32.mrf.mxu0  ;;  %v1166_v34 = vpop.f32.mrf.mxu3 }
 0x164   : > { %v1068_v36 = vld [vmem:[#allocation2 + $0x18] sm:$0xff] }
 0x165   : > { %v1076_v37 = vadd.f32 %v1068_v36, %v1052_v24  ;;  %986 = vst.msk [vmem:[#allocation2 + $0x20] sm:$0xff] %vm247_vm5, %v978_v35 }
 0x166   : > { %v1173_v62 = vld [vmem:[#allocation2 + $0x10] sm:$0xff] }
 0x167   : > { %1084 = vst.msk [vmem:[#allocation2 + $0x18] sm:$0xff] %vm247_vm5, %v1076_v37  ;;  %v1181_v42 = vadd.f32 %v1173_v62, %v1156_v25 }
 0x168   : > { %v1382_v43 = vld [vmem:[#allocation2 + $0x8] sm:$0xff] }
 0x169   : > { %1189 = vst.msk [vmem:[#allocation2 + $0x10] sm:$0xff] %vm247_vm5, %v1181_v42  ;;  %v1390_v44 = vadd.f32 %v1382_v43, %v1363_v27  ;;  %v1062_v32 = vpop.f32.mrf.mxu2 }
 0x16a   : > { %v1405_v45 = vld [vmem:[#allocation2] sm:$0xff]  ;;  %v958_v46 = vpop.f32.mrf.mxu1 }
 0x16b   : > { %v1417_v48 = vadd.f32 %v2107_v41, %v1405_v45  ;;  %1398 = vst.msk [vmem:[#allocation2 + $0x8] sm:$0xff] %vm247_vm5, %v1390_v44  ;;  %v979_v49 = vadd.f32 %v971_v47, %v958_v46  ;;  %v1373_v35 = vpop.f32.mrf.mxu0  ;;  %v1168_v47 = vpop.f32.mrf.mxu3 }
 0x16c   : > { %v1069_v50 = vld [vmem:[#allocation2 + $0x20] sm:$0xff] }
 0x16d   : > { %vm1425_vm6 = vcmp.ge.f32.partialorder %v1417_v48, 0.0  ;;  %v1433_v51 = vmul.f32 0.01, %v1417_v48  ;;  %v1077_v52 = vadd.f32 %v1069_v50, %v1055_v38  ;;  %987 = vst.msk [vmem:[#allocation2 + $0x28] sm:$0xff] %vm247_vm5, %v979_v49 }
 0x16e   : > { %v1174_v53 = vld [vmem:[#allocation2 + $0x18] sm:$0xff] }
 0x16f   : > { %v1441_v54 = vsel %vm1425_vm6, %v1417_v48, %v1433_v51  ;;  %1085 = vst.msk [vmem:[#allocation2 + $0x20] sm:$0xff] %vm247_vm5, %v1077_v52  ;;  %v1182_v55 = vadd.f32 %v1174_v53, %v1158_v39 }
 0x170   : > { %v1449_v58 = vpack.c.bf16 %v1441_v54, %v1441_v54  ;;  %v1383_v59 = vld [vmem:[#allocation2 + $0x10] sm:$0xff] }
 0x171   : > { %1190 = vst.msk [vmem:[#allocation2 + $0x18] sm:$0xff] %vm247_vm5, %v1182_v55  ;;  %v1391_v61 = vadd.f32 %v1383_v59, %v1366_v40 }
 0x172   : > { %1458 = vst.msk [vmem:[%s2118_s17] sm:$0xf] %vm1457_vm7, %v1449_v58  ;;  %v1406_v63 = vld [vmem:[#allocation2 + $0x8] sm:$0xff]  ;;  %v961_v0 = vpop.f32.mrf.mxu1 }
 0x173   : > { %v1418_v2 = vadd.f32 %v2107_v41, %v1406_v63  ;;  %1399 = vst.msk [vmem:[#allocation2 + $0x10] sm:$0xff] %vm247_vm5, %v1391_v61  ;;  %v980_v3 = vadd.f32 %v972_v1, %v961_v0  ;;  %v1376_v49 = vpop.f32.mrf.mxu0 }
 0x174   : > { %v1070_v4 = vld [vmem:[#allocation2 + $0x28] sm:$0xff] }
 0x175   : > { %vm1426_vm8 = vcmp.ge.f32.partialorder %v1418_v2, 0.0  ;;  %v1434_v5 = vmul.f32 0.01, %v1418_v2  ;;  %v1078_v6 = vadd.f32 %v1070_v4, %v1057_v56  ;;  %988 = vst.msk [vmem:[#allocation2 + $0x30] sm:$0xff] %vm247_vm5, %v980_v3 }
 0x176   : > { %v1175_v7 = vld [vmem:[#allocation2 + $0x20] sm:$0xff] }
 0x177   : > { %v1442_v8 = vsel %vm1426_vm8, %v1418_v2, %v1434_v5  ;;  %1086 = vst.msk [vmem:[#allocation2 + $0x28] sm:$0xff] %vm247_vm5, %v1078_v6  ;;  %v1183_v9 = vadd.f32 %v1175_v7, %v1161_v57 }
 0x178   : > { %v1450_v10 = vpack.c.bf16 %v1442_v8, %v1442_v8  ;;  %v1384_v11 = vld [vmem:[#allocation2 + $0x18] sm:$0xff] }
 0x179   : > { %1191 = vst.msk [vmem:[#allocation2 + $0x20] sm:$0xff] %vm247_vm5, %v1183_v9  ;;  %v1392_v12 = vadd.f32 %v1384_v11, %v1368_v60 }
 0x17a   : > { %1459 = vst.msk [vmem:[%s2118_s17 + $0x4] sm:$0xf] %vm1457_vm7, %v1450_v10  ;;  %v1407_v15 = vld [vmem:[#allocation2 + $0x10] sm:$0xff]  ;;  %v963_v17 = vpop.f32.mrf.mxu1 }
 0x17b   : > { %v1419_v19 = vadd.f32 %v2107_v41, %v1407_v15  ;;  %1400 = vst.msk [vmem:[#allocation2 + $0x18] sm:$0xff] %vm247_vm5, %v1392_v12  ;;  %v981_v20 = vadd.f32 %v973_v18, %v963_v17  ;;  %v1378_v60 = vpop.f32.mrf.mxu0 }
 0x17c   : > { %v1071_v21 = vld [vmem:[#allocation2 + $0x30] sm:$0xff] }
 0x17d   : > { %vm1427_vm9 = vcmp.ge.f32.partialorder %v1419_v19, 0.0  ;;  %v1435_v22 = vmul.f32 0.01, %v1419_v19  ;;  %v1079_v23 = vadd.f32 %v1071_v21, %v1060_v13  ;;  %989 = vst.msk [vmem:[#allocation2 + $0x38] sm:$0xff] %vm247_vm5, %v981_v20 }
 0x17e   : > { %v1176_v24 = vld [vmem:[#allocation2 + $0x28] sm:$0xff] }
 0x17f   : > { %v1443_v25 = vsel %vm1427_vm9, %v1419_v19, %v1435_v22  ;;  %1087 = vst.msk [vmem:[#allocation2 + $0x30] sm:$0xff] %vm247_vm5, %v1079_v23  ;;  %v1184_v26 = vadd.f32 %v1176_v24, %v1163_v14 }
 0x180   : > { %v1451_v27 = vpack.c.bf16 %v1443_v25, %v1443_v25  ;;  %v1385_v28 = vld [vmem:[#allocation2 + $0x20] sm:$0xff] }
 0x181   : > { %1192 = vst.msk [vmem:[#allocation2 + $0x28] sm:$0xff] %vm247_vm5, %v1184_v26  ;;  %v1393_v29 = vadd.f32 %v1385_v28, %v1371_v16 }
 0x182   : > { %1460 = vst.msk [vmem:[%s2118_s17 + $0x8] sm:$0xf] %vm1457_vm7, %v1451_v27  ;;  %v1408_v30 = vld [vmem:[#allocation2 + $0x18] sm:$0xff] }
 0x183   : > { %v1420_v31 = vadd.f32 %v2107_v41, %v1408_v30  ;;  %1401 = vst.msk [vmem:[#allocation2 + $0x20] sm:$0xff] %vm247_vm5, %v1393_v29 }
 0x184   : > { %v1072_v33 = vld [vmem:[#allocation2 + $0x38] sm:$0xff] }
 0x185   : > { %vm1428_vm10 = vcmp.ge.f32.partialorder %v1420_v31, 0.0  ;;  %v1436_v36 = vmul.f32 0.01, %v1420_v31  ;;  %v1080_v37 = vadd.f32 %v1072_v33, %v1062_v32 }
 0x186   : > { %v1177_v38 = vld [vmem:[#allocation2 + $0x30] sm:$0xff] }
 0x187   : > { %v1444_v39 = vsel %vm1428_vm10, %v1420_v31, %v1436_v36  ;;  %1088 = vst.msk [vmem:[#allocation2 + $0x38] sm:$0xff] %vm247_vm5, %v1080_v37  ;;  %v1185_v62 = vadd.f32 %v1177_v38, %v1166_v34 }
 0x188   : > { %v1452_v40 = vpack.c.bf16 %v1444_v39, %v1444_v39  ;;  %v1386_v42 = vld [vmem:[#allocation2 + $0x28] sm:$0xff] }
 0x189   : > { %1193 = vst.msk [vmem:[#allocation2 + $0x30] sm:$0xff] %vm247_vm5, %v1185_v62  ;;  %v1394_v43 = vadd.f32 %v1386_v42, %v1373_v35 }
 0x18a   : > { %1461 = vst.msk [vmem:[%s2118_s17 + $0xc] sm:$0xf] %vm1457_vm7, %v1452_v40  ;;  %v1409_v44 = vld [vmem:[#allocation2 + $0x20] sm:$0xff] }
 0x18b   : > { %v1421_v45 = vadd.f32 %v2107_v41, %v1409_v44  ;;  %1402 = vst.msk [vmem:[#allocation2 + $0x28] sm:$0xff] %vm247_vm5, %v1394_v43 }
 0x18d   : > { %vm1429_vm11 = vcmp.ge.f32.partialorder %v1421_v45, 0.0  ;;  %v1437_v46 = vmul.f32 0.01, %v1421_v45 }
 0x18e   : > { %v1178_v48 = vld [vmem:[#allocation2 + $0x38] sm:$0xff] }
 0x18f   : > { %v1445_v50 = vsel %vm1429_vm11, %v1421_v45, %v1437_v46  ;;  %v1186_v51 = vadd.f32 %v1178_v48, %v1168_v47 }
 0x190   : > { %v1453_v52 = vpack.c.bf16 %v1445_v50, %v1445_v50  ;;  %v1387_v53 = vld [vmem:[#allocation2 + $0x30] sm:$0xff] }
 0x191   : > { %1194 = vst.msk [vmem:[#allocation2 + $0x38] sm:$0xff] %vm247_vm5, %v1186_v51  ;;  %v1395_v54 = vadd.f32 %v1387_v53, %v1376_v49 }
 0x192   : > { %1462 = vst.msk [vmem:[%s2118_s17 + $0x10] sm:$0xf] %vm1457_vm7, %v1453_v52  ;;  %v1410_v55 = vld [vmem:[#allocation2 + $0x28] sm:$0xff] }
 0x193   : > { %v1422_v56 = vadd.f32 %v2107_v41, %v1410_v55  ;;  %1403 = vst.msk [vmem:[#allocation2 + $0x30] sm:$0xff] %vm247_vm5, %v1395_v54 }
 0x195   : > { %vm1430_vm12 = vcmp.ge.f32.partialorder %v1422_v56, 0.0  ;;  %v1438_v57 = vmul.f32 0.01, %v1422_v56 }
 0x197   : > { %v1446_v58 = vsel %vm1430_vm12, %v1422_v56, %v1438_v57 }
 0x198   : > { %v1454_v59 = vpack.c.bf16 %v1446_v58, %v1446_v58  ;;  %v1388_v61 = vld [vmem:[#allocation2 + $0x38] sm:$0xff] }
 0x199   : > { %v1396_v63 = vadd.f32 %v1388_v61, %v1378_v60 }
 0x19a   : > { %1463 = vst.msk [vmem:[%s2118_s17 + $0x14] sm:$0xf] %vm1457_vm7, %v1454_v59  ;;  %v1411_v0 = vld [vmem:[#allocation2 + $0x30] sm:$0xff] }
 0x19b   : > { %v1423_v1 = vadd.f32 %v2107_v41, %v1411_v0  ;;  %1404 = vst.msk [vmem:[#allocation2 + $0x38] sm:$0xff] %vm247_vm5, %v1396_v63 }
 0x19d   : > { %vm1431_vm13 = vcmp.ge.f32.partialorder %v1423_v1, 0.0  ;;  %v1439_v2 = vmul.f32 0.01, %v1423_v1 }
 0x19f   : > { %v1447_v3 = vsel %vm1431_vm13, %v1423_v1, %v1439_v2 }
 0x1a0   : > { %v1455_v4 = vpack.c.bf16 %v1447_v3, %v1447_v3 }
 0x1a2   : > { %1464 = vst.msk [vmem:[%s2118_s17 + $0x18] sm:$0xf] %vm1457_vm7, %v1455_v4  ;;  %v1412_v5 = vld [vmem:[#allocation2 + $0x38] sm:$0xff] }
 0x1a3   : > { %v1424_v6 = vadd.f32 %v2107_v41, %v1412_v5 }
 0x1a5   : > { %vm1432_vm14 = vcmp.ge.f32.partialorder %v1424_v6, 0.0  ;;  %v1440_v7 = vmul.f32 0.01, %v1424_v6 }
 0x1a7   : > { %v1448_v8 = vsel %vm1432_vm14, %v1424_v6, %v1440_v7 }
 0x1a8   : > { %v1456_v9 = vpack.c.bf16 %v1448_v8, %v1448_v8 }
 0x1aa   : > { %1465 = vst.msk [vmem:[%s2118_s17 + $0x1c] sm:$0xf] %vm1457_vm7, %v1456_v9 }
 0x1ab PF: > { %s13_s12 = sadd.s32 1, %s1780_s12  }
 0x1ac   : > { %p10_p4 = scmp.ge.s32.totalorder %s13_s12, 4  }
 0x1ae   :  { %12 = sbr.rel (!%p10_p4) target bundleno = 1 (0x1), region = 72 }

// kernel: gradual_style_block_forward.7
= control target key start
LH: loop header
LB: loop body
LE: loop exit
PB: predicated region body
PF: predicated region fallthrough
CT: control target
= control target key end

     0   :  { %10 = vsyncpa [#allocation4], 0  ;;  %s1217_s0 = inlined_call_operand.vmem [shape: bf16[2,2,2,9,64], index: 0, kind: input, shape index: {}]   ;;  %s1218_s1 = inlined_call_operand.vmem [shape: bf16[9,32,32], index: 1, kind: input, shape index: {}]   ;;  %s1219_s2 = inlined_call_operand.vmem [shape: f32[1,32], index: 2, kind: input, shape index: {}]   ;;  %s1220_s3 = inlined_call_operand.vmem [shape: bf16[32,32], index: 3, kind: input, shape index: {}]   ;;  %s1221_s4 = inlined_call_operand.vmem [shape: f32[1,32], index: 4, kind: input, shape index: {}]   ;;  %s1222_s5 = inlined_call_operand.hbm [shape: f32[2,1,32], index: 5, kind: output, shape index: {}]  }
   0x1   :  { %12 = vsyncpa [#allocation4 + $0x1], 0  ;;  %s1033_s18 = smov 0   ;;  %s1035_s19 = smov 0  }
   0x2   :  { %s1037_s20 = smov 0   ;;  %s1039_s21 = smov 0  }
   0x3 LB: > { %s1054_s22 = sadd.s32 4294967295, %s1000_s21   ;;  %s723_s23 = sadd.s32 4294967294, %s1000_s21   ;;  %s1000_s21 = sphi %s1039_s21, %s1228_s21   ;;  %s996_s20 = sphi %s1037_s20, %s1227_s20   ;;  %s992_s19 = sphi %s1035_s19, %s1226_s19   ;;  %s988_s18 = sphi %s1033_s18, %s1225_s18  }
   0x4   : > { %s1058_s24 = sadd.s32 1, %s1000_s21   ;;  %s135_s25 = sadd.s32 1, %s996_s20 }
   0x5   : > { %s132_s26 = ssub.s32 %s1000_s21, %s1058_s24  ;;  %p145_p0 = scmp.ne.s32.totalorder %s996_s20, %s992_s19 }
   0x6   : > { %p133_p1 = scmp.eq.s32.totalorder %s132_s26, 0  ;;  %p146_p2 = scmp.eq.s32.totalorder %s1054_s22, 1 }
   0x7   : > { %p151_p3 = scmp.ne.s32.totalorder %s992_s19, %s988_s18  ;;  %p152_p4 = scmp.eq.s32.totalorder %s723_s23, 1 }
   0x8   : > { %s1069_s27 = scalar_select %p133_p1, %s996_s20, %s135_s25  }
   0x9   : > { %p1071_p5 = por %p146_p2, %p145_p0  ;;  %p1075_p6 = por %p152_p4, %p151_p3 }
   0xa   : > { %p726_p7 = scmp.ge.s32.totalorder %s1000_s21, 1  ;;  %p190_p8 = scmp.lt.s32.totalorder %s1000_s21, 3 }
   0xc   : > { %p191_p9 = pnand %p726_p7, %p190_p8 }
   0xd   : > { %p217_p10 = scmp.lt.s32.totalorder (!%p191_p9), %s1054_s22, 1  ;;  %s1002_s8 = smov (!%p191_p9), 96  }
   0xe   : > { %194 = sbr.rel (%p191_p9) target bundleno = 490 (0x1ea), region = 40  ;;  %s215_s30 = sand.u32 (!%p191_p9), 1, %s992_s19  }
   0xf   : > { %s664_s9 = scalar_lea.hbm (!%p191_p9), %s1222_s5, %s1054_s22  ;;  %s216_s12 = scalar_lea.vmem (!%p191_p9), [#allocation3], %s215_s30 }
  0x10   : > { %s668_s14 = sshll.u32 (!%p191_p9), %s664_s9, 4  ;;  %s656_s15 = scalar_lea.sflag (!%p191_p9), [#allocation4], %s215_s30  ;;  %s669_s14 = int_to_ptr.hbm [resolvable:$true] %s668_s14 }
  0x11   : > { %s958_s23 = scalar_lea.hbm (!%p191_p9), %s1222_s5, 2 }
  0x13   : > { %v875_v0 = vld [vmem:[%s1218_s1 + $0x8] sm:$0xff]  ;;  %v874_v2 = vld [vmem:[%s1218_s1] sm:$0xff]  ;;  %v877_v3 = vld [vmem:[%s1218_s1 + $0x18] sm:$0xff]  ;;  %s218_s13 = scalar_select %p217_p10, %s1054_s22, 1  ;;  %vm240_vm0 = vcmask 261120   ;;  %vm653_vm2 = vcmask 253952  }
  0x14   : > { %v880_v1 = vld [vmem:[%s1218_s1 + $0x28] sm:$0xff]  ;;  %250 = vmatpush.bf16.msra.mxu0 %v875_v0  ;;  %v879_v4 = vld [vmem:[%s1218_s1 + $0x20] sm:$0xff]  ;;  %v882_v5 = vld [vmem:[%s1218_s1 + $0x38] sm:$0xff]  ;;  %290 = vmatpush.bf16.msra.mxu1 %v877_v3 }
  0x15   : > { %340 = vmatpush.bf16.msra.mxu2 %v880_v1  ;;  %v876_v6 = vld [vmem:[%s1218_s1 + $0x10] sm:$0xff]  ;;  %s873_s26 = sshll.u32 %s218_s13, 5  ;;  %378 = vmatpush.bf16.msra.mxu3 %v882_v5  ;;  %v884_v25 = vld [vmem:[%s1218_s1 + $0x48] sm:$0xff]  ;;  %v883_v27 = vld [vmem:[%s1218_s1 + $0x40] sm:$0xff]  ;;  %s666_s13 = sshll.u32 %s216_s12, 4  ;;  %s667_s13 = int_to_ptr.vmem [resolvable:$true] %s666_s13 }
  0x16   : > { %s1107_s7 = scalar_lea.vmem %s1217_s0, %s873_s26  ;;  %v881_v24 = vld [vmem:[%s1218_s1 + $0x30] sm:$0xff]  ;;  %v887_v28 = vld [vmem:[%s1218_s1 + $0x58] sm:$0xff]  ;;  %v889_v29 = vld [vmem:[%s1218_s1 + $0x68] sm:$0xff] }
  0x17   : > { %v258_v7 = vld [vmem:[%s1107_s7] sm:$0xf]  ;;  %v829_v8 = vld [vmem:[%s1107_s7 + $0x10] sm:$0xf]  ;;  %v878_v13 = vld [vmem:[%s1107_s7] sm:$0x10] }
  0x18   : > { %251 = vmatpush.bf16.msra.mxu0 %v874_v2  ;;  %v265_v9 = vunpack.c.l.b16 %v258_v7  ;;  %v525_v10 = vunpack.c.l.b16 %v829_v8  ;;  %v223_v11 = vld [vmem:[%s1107_s7] sm:$0xf]  ;;  %291 = vmatpush.bf16.msra.mxu1 %v876_v6  ;;  %v782_v14 = vld [vmem:[%s1107_s7 + $0x8] sm:$0xf]  ;;  %v886_v30 = vld [vmem:[%s1218_s1 + $0x50] sm:$0xff] }
  0x19   : > { %341 = vmatpush.bf16.msra.mxu2 %v879_v4  ;;  %v757_v12 = vld [vmem:[%s1107_s7] sm:$0xf]  ;;  %v395_v20 = vunpack.c.l.b16 %v782_v14  ;;  %379 = vmatpush.bf16.msra.mxu3 %v881_v24  ;;  %v768_v26 = vld [vmem:[%s1107_s7 + $0x8] sm:$0xf]  ;;  %v891_v32 = vld [vmem:[%s1218_s1 + $0x78] sm:$0xff] }
  0x1a   : > { %v758_v15 = vor.u32 %v878_v13, %v757_v12  ;;  %v266_v16 = vpack.c.b16 %v265_v9, %v265_v9  ;;  %v526_v17 = vpack.c.b16 %v525_v10, %v525_v10  ;;  %v888_v31 = vld [vmem:[%s1218_s1 + $0x60] sm:$0xff]  ;;  %v894_v33 = vld [vmem:[%s1218_s1 + $0x88] sm:$0xff]  ;;  %v815_v34 = vld [vmem:[%s1107_s7 + $0x10] sm:$0xf] }
  0x1b   : > { %737 = vmatmul.msk.bf16.vlgmr.msra.gmra.mxu0 %vm240_vm0, %v223_v11  ;;  %v396_v23 = vpack.c.b16 %v395_v20, %v395_v20  ;;  %v890_v35 = vld [vmem:[%s1218_s1 + $0x70] sm:$0xff]  ;;  %v893_v36 = vld [vmem:[%s1218_s1 + $0x80] sm:$0xff]  ;;  %v804_v37 = vld [vmem:[%s1107_s7 + $0x8] sm:$0xf] }
  0x1c   : > { %v313_v18 = vshrl.u32 %v758_v15, 16  ;;  %v315_v19 = vshll.u32 %v758_v15, 16  ;;  %267 = vrot.lane.b32.xlu0 %v266_v16, %s1002_s8  ;;  %527 = vrot.lane.b32.xlu1 %v526_v17, %s1002_s8  ;;  %v885_v38 = vld [vmem:[%s1107_s7 + $0x8] sm:$0x10]  ;;  %v851_v43 = vld [vmem:[%s1107_s7 + $0x10] sm:$0xf] }
  0x1d   : > { %420 = vmatpush.bf16.msrb.mxu0 %v884_v25  ;;  %781 = vmatmul.msk.bf16.vlgmr.msra.gmra.mxu3 %vm240_vm0, %v768_v26  ;;  %v805_v41 = vor.u32 %v885_v38, %v804_v37  ;;  %v892_v44 = vld [vmem:[%s1107_s7 + $0x10] sm:$0x10]  ;;  %v937_v26 = vld [vmem:[%s1219_s2] ss:$0 sm:$0xff]  ;;  %s952_s7 = sshra.s32 %s669_s14, 4  ;;  %s953_s7 = int_to_ptr.hbm [resolvable:$true] %s952_s7 }
  0x1e   : > { %v317_v21 = vrot.slane %v315_v19, 1  ;;  %470 = vmatpush.bf16.msrb.mxu1 %v887_v28  ;;  %508 = vmatpush.bf16.msrb.mxu2 %v889_v29  ;;  %v852_v48 = vor.u32 %v892_v44, %v851_v43  ;;  %v895_v19 = vld [vmem:[%s1220_s3] sm:$0xff]  ;;  %s954_s16 = scalar_lea.hbm %s953_s7, 1  ;;  %p959_p0 = scmp.lt.s32.totalorder %s953_s7, %s1222_s5 }
  0x1f   : > { %550 = vmatpush.bf16.msrb.mxu3 %v891_v32  ;;  %v445_v42 = vshll.u32 %v805_v41, 16  ;;  %v443_v46 = vshrl.u32 %v805_v41, 16  ;;  %v624_v32 = vld [vmem:[%s1221_s4] sm:$0x1]  ;;  %p955_p11 = scmp.ne.s32.totalorder %s953_s7, %s954_s16  ;;  %p960_p1 = scmp.lt.s32.totalorder %s958_s23, %s954_s16 }
  0x20   : > { %v318_v22 = vor.u32 %v317_v21, %v313_v18  ;;  %v575_v51 = vshll.u32 %v852_v48, 16  ;;  %v573_v52 = vshrl.u32 %v852_v48, 16  ;;  %v896_v18 = vld [vmem:[%s1220_s3 + $0x8] sm:$0xff] }
  0x21   : > { %421 = vmatpush.bf16.msrb.mxu0 %v883_v27  ;;  %v447_v47 = vrot.slane %v445_v42, 1  ;;  %p956_p12 = pnand %p955_p11, %p1071_p5  ;;  %p961_p2 = por %p960_p1, %p959_p0 }
  0x22   : > { %767 = vmatmul.msk.bf16.vlgmr.msra.gmra.mxu2 %vm240_vm0, %v318_v22  ;;  %471 = vmatpush.bf16.msrb.mxu1 %v886_v30  ;;  %v577_v53 = vrot.slane %v575_v51, 1 }
  0x23   : > { %509 = vmatpush.bf16.msrb.mxu2 %v888_v31  ;;  %551 = vmatpush.bf16.msrb.mxu3 %v890_v35  ;;  %v448_v50 = vor.u32 %v447_v47, %v443_v46  ;;  %p957_p13 = pneg %p956_p12 }
  0x24   : > { %397 = vrot.lane.b32.xlu0 %v396_v23, %s1002_s8  ;;  %v578_v55 = vor.u32 %v577_v53, %v573_v52 }
  0x25   : > { %600 = vmatpush.bf16.msra.mxu0 %v894_v33  ;;  %p962_p3 = pnand %p961_p2, %p957_p13 }
  0x29   : > { %601 = vmatpush.bf16.msra.mxu0 %v893_v36 }
  0x32   : > { %828 = vmatmul.msk.bf16.vlgmr.msrb.gmra.mxu2 %vm240_vm0, %v815_v34 }
  0x8e   : > { %v268_v39 = vpop.permute.xlu0 %267  ;;  %v528_v40 = vpop.permute.xlu1 %527 }
  0x8f   : > { %750 = vmatmul.msk.bf16.vlgmr.msra.gmra.mxu1 %vm240_vm0, %v268_v39  ;;  %842 = vmatmul.msk.bf16.vlgmr.msrb.gmra.mxu3 %vm240_vm0, %v528_v40 }
  0x90   : > { %646 = vmatpush.bf16.msra.mxu1 %v896_v18 }
  0x94   : > { %647 = vmatpush.bf16.msra.mxu1 %v895_v19 }
  0x96   : > { %v398_v45 = vpop.permute.xlu0 %397 }
  0x97   : > { %795 = vmatmul.msk.bf16.vlgmr.msrb.gmra.mxu0 %vm240_vm0, %v398_v45 }
  0x98   : > { %v253_v49 = vpop.f32.mrf.mxu0 }
  0x99   : > { %257 = vst.msk [vmem:[#allocation2] sm:$0xff] %vm240_vm0, %v253_v49 }
  0x9f   : > { %814 = vmatmul.msk.bf16.vlgmr.msrb.gmra.mxu1 %vm240_vm0, %v448_v50 }
  0xa0   : > { %v255_v54 = vpop.f32.mrf.mxu0  ;;  %v381_v58 = vpop.f32.mrf.mxu3  ;;  %v297_v60 = vld [vmem:[#allocation2] sm:$0xff] }
  0xa5   : > { %v343_v56 = vpop.f32.mrf.mxu2 }
  0xa7   : > { %861 = vmatmul.msk.bf16.vlgmr.msra.gmra.mxu0 %vm240_vm0, %v578_v55 }
  0xa8   : > { %v383_v59 = vpop.f32.mrf.mxu3 }
  0xad   : > { %v345_v57 = vpop.f32.mrf.mxu2 }
  0xb5   : > { %v511_v2 = vpop.f32.mrf.mxu2 }
  0xbd   : > { %v513_v6 = vpop.f32.mrf.mxu2 }
 0x10c   : > { %v293_v61 = vpop.f32.mrf.mxu1 }
 0x10d   : > { %v298_v62 = vadd.f32 %v297_v60, %v293_v61 }
 0x10f   : > { %299 = vst.msk [vmem:[#allocation2] sm:$0xff] %vm240_vm0, %v298_v62 }
 0x112   : > { %v553_v8 = vpop.f32.mrf.mxu3 }
 0x114   : > { %v295_v63 = vpop.f32.mrf.mxu1  ;;  %v423_v0 = vpop.f32.mrf.mxu0 }
 0x116   : > { %v347_v1 = vld [vmem:[#allocation2] sm:$0xff] }
 0x117   : > { %v348_v3 = vadd.f32 %v347_v1, %v343_v56 }
 0x119   : > { %349 = vst.msk [vmem:[#allocation2] sm:$0xff] %vm240_vm0, %v348_v3 }
 0x11a   : > { %v555_v11 = vpop.f32.mrf.mxu3 }
 0x11c   : > { %v425_v4 = vpop.f32.mrf.mxu0  ;;  %v473_v5 = vpop.f32.mrf.mxu1 }
 0x120   : > { %v385_v7 = vld [vmem:[#allocation2] sm:$0xff] }
 0x121   : > { %v386_v9 = vadd.f32 %v385_v7, %v381_v58 }
 0x123   : > { %387 = vst.msk [vmem:[#allocation2] sm:$0xff] %vm240_vm0, %v386_v9 }
 0x124   : > { %v475_v10 = vpop.f32.mrf.mxu1  ;;  %v603_v13 = vpop.f32.mrf.mxu0 }
 0x12a   : > { %v427_v12 = vld [vmem:[#allocation2] sm:$0xff] }
 0x12b   : > { %v428_v14 = vadd.f32 %v427_v12, %v423_v0 }
 0x12c   : > { %v605_v15 = vpop.f32.mrf.mxu0 }
 0x12d   : > { %429 = vst.msk [vmem:[#allocation2] sm:$0xff] %vm240_vm0, %v428_v14 }
 0x134   : > { %v477_v16 = vld [vmem:[#allocation2] sm:$0xff] }
 0x135   : > { %v478_v17 = vadd.f32 %v477_v16, %v473_v5 }
 0x137   : > { %479 = vst.msk [vmem:[#allocation2] sm:$0xff] %vm240_vm0, %v478_v17 }
 0x13e   : > { %v515_v20 = vld [vmem:[#allocation2] sm:$0xff] }
 0x13f   : > { %v516_v21 = vadd.f32 %v515_v20, %v511_v2 }
 0x141   : > { %517 = vst.msk [vmem:[#allocation2] sm:$0xff] %vm240_vm0, %v516_v21 }
 0x148   : > { %v557_v22 = vld [vmem:[#allocation2] sm:$0xff] }
 0x149   : > { %v558_v23 = vadd.f32 %v557_v22, %v553_v8 }
 0x14b   : > { %559 = vst.msk [vmem:[#allocation2] sm:$0xff] %vm240_vm0, %v558_v23 }
 0x152   : > { %v607_v24 = vld [vmem:[#allocation2] sm:$0xff] }
 0x153   : > { %v608_v25 = vadd.f32 %v607_v24, %v603_v13 }
 0x155   : > { %609 = vst.msk [vmem:[#allocation2] sm:$0xff] %vm240_vm0, %v608_v25 }
 0x15c   : > { %v610_v27 = vld [vmem:[#allocation2] sm:$0xff] }
 0x15d   : > { %v615_v28 = vadd.f32 %v937_v26, %v610_v27 }
 0x15f   : > { %vm616_vm1 = vcmp.ge.f32.partialorder %v615_v28, 0.0  ;;  %v617_v29 = vmul.f32 0.01, %v615_v28 }
 0x161   : > { %v618_v30 = vsel %vm616_vm1, %v615_v28, %v617_v29 }
 0x162   : > { %v619_v31 = vpack.c.bf16 %v618_v30, %v618_v30 }
 0x164   : > { %870 = vmatmul.msk.bf16.vlgmr.msra.gmra.mxu1 %vm240_vm0, %v619_v31 }
 0x1e1   : > { %v649_v33 = vpop.f32.mrf.mxu1 }
 0x1e2   : > { %v650_v34 = vadd.f32 %v649_v33, %v624_v32 }
 0x1e4   : > { %654 = vst.msk [vmem:[%s216_s12] sm:$0x1] %vm653_vm2, %v650_v34 }
 0x1e5   : > { %965 = shalt.err (!%p962_p3)
}
 0x1e6   : > { %897 = dma.vmem_to_hbm [thread:$0]  (%p1071_p5), %s667_s13, 16, %s669_s14, %s656_s15  }
 0x1e9   : > { %v651_v35 = vpop.f32.mrf.mxu1 }
 0x1ea PF: > { %p903_p4 = scmp.ge.s32.totalorder %s1000_s21, 2  ;;  %s680_s30 = sand.u32 1, %s988_s18  }
 0x1eb   : > { %s681_s6 = scalar_lea.sflag [#allocation4], %s680_s30 }
 0x1ec   : > { %p900_p7 = pnand %p903_p4, %p1075_p6 }
 0x1ee   : > { %p901_p8 = pneg %p900_p7 }
 0x1f0   : > { %983 = dma.done.wait (%p901_p8), %s681_s6, 16  }
 0x1f1   : > { %985 = vsyncadd (%p901_p8), %s681_s6, 4294967280  ;;  %p15_p9 = scmp.ge.s32.totalorder %s1058_s24, 4   ;;  %s1225_s18 = smov %s992_s19 }
 0x1f2   : > { %s1226_s19 = smov %s996_s20  ;;  %s1227_s20 = smov %s1069_s27 }
 0x1f3   : > { %s1228_s21 = smov %s1058_s24  ;;  %17 = sbr.rel (!%p15_p9) target bundleno = 3 (0x3), region = 85 }
 0x1f8   :  { %686 = vsyncpa [#allocation4], 1 }
 0x1f9   :  { %688 = vsyncpa [#allocation4 + $0x1], 1 }

</bundles_post_ra>
